<compile_context>
chip_gen: v7x
topology: tpu7x:2x2x1
jax: 0.10.0
libtpu: 0.0.40
codegen_flags: <defaults>
</compile_context>

<pallas_src>
import functools
import math

import jax
import jax.numpy as jnp
from jax import lax
from jax.experimental import pallas as pl
from jax.experimental.pallas import tpu as pltpu

SOS_TOKEN = 2
_NEG_BIG = -1e30


def _round_up(x, m):
    return (x + m - 1) // m * m


def _vmem_capacity_bytes():
    try:
        info = pltpu.get_tpu_info()
        for name in ("vmem_capacity_bytes", "vmem_bytes", "vmem_size_bytes"):
            v = getattr(info, name, None)
            if v:
                return int(v)
    except Exception:
        pass
    return 64 * 1024 * 1024          # conservative: v7x per-core VMEM


def _decoder_kernel(*args, sos_token, use_teacher_forcing, return_scores,
                    v_real, t_total, t_chunk):
    # ---- unpack positional refs: inputs, outputs, scratch ---------------------
    enc_hbm, wpT_hbm, bp_hbm, bias_hbm, wihT_hbm, whhT_hbm, embT_hbm = args[:7]
    idx = 7
    if use_teacher_forcing:
        xemb_ref = args[idx]; idx += 1          # pipelined (Tt, B_pad, E_pad) bf16
        emb_hbm = None
    else:
        emb_hbm = args[idx]; idx += 1           # (V_pad, E_pad) table in HBM
        xemb_ref = None
    if return_scores:
        scores_out_ref = args[idx]; idx += 1
    else:
        scores_out_ref = None
    topv_out_ref = args[idx]; idx += 1
    enc_v, wpT_v, bp_v, bias_v, wihT_v, whhT_v, embT_v, hidden_v = args[idx:idx + 8]
    idx += 8
    if use_teacher_forcing:
        emb_v = ids_v = None
    else:
        emb_v, ids_v = args[idx:idx + 2]; idx += 2
    load_sem = args[idx]

    chunk = pl.program_id(0)
    B_pad, E_pad = hidden_v.shape
    V_pad = embT_v.shape[1]

    # ---- chunk 0: one-time HBM -> VMEM load of every loop-invariant operand ---
    @pl.when(chunk == 0)
    def _init():
        loads = [(embT_hbm, embT_v)]                       # largest first
        if not use_teacher_forcing:
            loads.append((emb_hbm, emb_v))
        loads += [(wihT_hbm, wihT_v), (whhT_hbm, whhT_v), (bias_hbm, bias_v)]
        n_late = len(loads)                                # loads we may wait on later
        loads += [(enc_hbm, enc_v), (wpT_hbm, wpT_v), (bp_hbm, bp_v)]
        for i, (src, dst) in enumerate(loads):
            pltpu.make_async_copy(src, dst, load_sem.at[i]).start()
        # wait only on the projector operands; the big table/weight copies
        # continue streaming behind the h0 compute.
        for i in range(n_late, len(loads)):
            src, dst = loads[i]
            pltpu.make_async_copy(src, dst, load_sem.at[i]).wait()
        # hidden = relu(projector(encode_hidden))
        h0 = jnp.dot(enc_v[...], wpT_v[...],
                     preferred_element_type=jnp.float32) + bp_v[...]
        hidden_v[...] = jnp.maximum(h0, 0.0)
        if not use_teacher_forcing:
            # decoder_input = SOS_token for every batch row
            ids_v[...] = jnp.full((B_pad, 1), sos_token, jnp.int32)
        for i in range(n_late):
            src, dst = loads[i]
            pltpu.make_async_copy(src, dst, load_sem.at[i]).wait()

    # ---- loop-invariant constants, hoisted out of the unrolled step loop ------
    iota_row = lax.broadcasted_iota(jnp.int32, (1, V_pad), 1)           # (1, V_pad)
    if v_real < V_pad:
        vocab_mask = jnp.where(iota_row < v_real, 0.0, _NEG_BIG).astype(jnp.float32)
    else:
        vocab_mask = None
    b_r = jnp.broadcast_to(bias_v[0:1, :], (B_pad, E_pad))     # b_ir + b_hr (pre-summed)
    b_z = jnp.broadcast_to(bias_v[1:2, :], (B_pad, E_pad))     # b_iz + b_hz (pre-summed)
    b_in = jnp.broadcast_to(bias_v[2:3, :], (B_pad, E_pad))    # b_in (n gate, input side)
    b_hn = jnp.broadcast_to(bias_v[3:4, :], (B_pad, E_pad))    # b_hn (n gate, hidden side)

    def step(tt, carry):
        t_global = chunk * t_chunk + tt

        @pl.when(t_global < t_total)            # tail guard (grid uses cdiv)
        def _do_step():
            # embedding of decoder_input; dropout_layer == identity (eval mode)
            if use_teacher_forcing:
                embed = xemb_ref[tt]                                   # (B, E) bf16
            else:
                onehot = (iota_row == ids_v[...]).astype(jnp.bfloat16)  # (B, V_pad)
                embed = jnp.dot(onehot, emb_v[...],
                                preferred_element_type=jnp.float32
                                ).astype(jnp.bfloat16)                  # lossless

            h = hidden_v[...]                                          # f32 carry
            gx = jnp.dot(embed, wihT_v[...], preferred_element_type=jnp.float32)
            gh = jnp.dot(h.astype(jnp.bfloat16), whhT_v[...],
                         preferred_element_type=jnp.float32)

            # PyTorch GRU gate order r, z, n; per-gate column blocks are
            # lane-aligned (E_pad % 128 == 0).
            r = jax.nn.sigmoid(gx[:, 0:E_pad] + gh[:, 0:E_pad] + b_r)
            z = jax.nn.sigmoid(gx[:, E_pad:2 * E_pad] + gh[:, E_pad:2 * E_pad] + b_z)
            n = jnp.tanh(gx[:, 2 * E_pad:] + b_in + r * (gh[:, 2 * E_pad:] + b_hn))
            h_new = (1.0 - z) * n + z * h
            hidden_v[...] = h_new

            # p_vocab = hidden @ C.weight.T  (NN matmul against the pre-transposed table)
            scores = jnp.dot(h_new.astype(jnp.bfloat16), embT_v[...],
                             preferred_element_type=jnp.float32)       # (B, V_pad)
            if return_scores:
                scores_out_ref[tt] = scores.astype(scores_out_ref.dtype)

            # topk(1): first index of the maximum over the real vocabulary
            masked = scores if vocab_mask is None else scores + vocab_mask
            maxv = jnp.max(masked, axis=1, keepdims=True)
            cand = jnp.where(masked == maxv, iota_row, V_pad)
            topv = jnp.min(cand, axis=1, keepdims=True)                # (B, 1) int32
            topv_out_ref[t_global] = topv

            if not use_teacher_forcing:
                @pl.when(t_global < t_total - 1)
                def _next_input():
                    ids_v[...] = topv

        return carry

    lax.fori_loop(0, t_chunk, step, 0, unroll=True)


def decoder_forward(encode_hidden, target_batches, params, *,
                    max_target_length, use_teacher_forcing,
                    sos_token=SOS_TOKEN, return_scores=True,
                    scores_dtype=jnp.bfloat16, time_chunk=None):
    f32, bf16 = jnp.float32, jnp.bfloat16
    B, threeE = encode_hidden.shape
    V, E = params["emb"].shape
    T = int(max_target_length)

    # pad to the hardware grain: sublane (8) for batch, lane (128) for E / V / 3E
    B_pad = _round_up(max(B, 8), 8)
    E_pad = _round_up(E, 128)
    V_pad = _round_up(V, 128)
    C_pad = _round_up(threeE, 128)
    score_bytes = jnp.dtype(scores_dtype).itemsize

    # T-chunking: large enough that per-chunk slabs amortize the ~0.35us grid
    # step overhead, capped to bound unrolled code size / output double-buffers.
    if time_chunk is None:
        per_step = (B_pad * V_pad * score_bytes if return_scores else 0)
        per_step += (B_pad * E_pad * 2 if use_teacher_forcing else 0)
        Tt = T if per_step == 0 else max(1, (1 << 20) // per_step)
        Tt = max(1, min(T, Tt, 16))
    else:
        Tt = max(1, min(int(time_chunk), T))
    num_chunks = int(pl.cdiv(T, Tt))
    T_padded = num_chunks * Tt

    # ---- weight prep: pad + cast matmul operands to bf16 (biases stay f32) ----
    emb_bf = params["emb"].astype(bf16)                                     # (V, E)
    embT_p = jnp.zeros((E_pad, V_pad), bf16).at[:E, :V].set(emb_bf.T)       # scores table
    wpT_p = jnp.zeros((C_pad, E_pad), bf16).at[:threeE, :E].set(
        params["wp"].T.astype(bf16))
    bp_p = jnp.zeros((1, E_pad), f32).at[0, :E].set(params["bp"].astype(f32))

    def pad_gate_wT(w):     # (3E, E) -> (E_pad, 3*E_pad), per-gate column blocks
        w3 = jnp.transpose(w.reshape(3, E, E), (0, 2, 1))                   # [gate,in,out]
        w3p = jnp.zeros((3, E_pad, E_pad), bf16).at[:, :E, :E].set(w3.astype(bf16))
        return jnp.transpose(w3p, (1, 0, 2)).reshape(E_pad, 3 * E_pad)

    wihT_p = pad_gate_wT(params["wih"])
    whhT_p = pad_gate_wT(params["whh"])

    bih = params["bih"].astype(f32).reshape(3, E)
    bhh = params["bhh"].astype(f32).reshape(3, E)
    bias_rows = jnp.stack([bih[0] + bhh[0],     # r gate (b_ir + b_hr pre-summed)
                           bih[1] + bhh[1],     # z gate (b_iz + b_hz pre-summed)
                           bih[2],              # n gate, input-side bias
                           bhh[2]])             # n gate, hidden-side bias
    bias_p = jnp.zeros((4, E_pad), f32).at[:, :E].set(bias_rows)

    enc_p = jnp.zeros((B_pad, C_pad), bf16).at[:B, :threeE].set(
        encode_hidden.astype(bf16))

    inputs = [enc_p, wpT_p, bp_p, bias_p, wihT_p, whhT_p, embT_p]
    in_specs = [pl.BlockSpec(memory_space=pl.ANY) for _ in range(7)]
    n_loads = 7
    if use_teacher_forcing:
        # precompute per-step input embeddings [SOS, targets[:, :-1]] in the wrapper;
        # streamed per T-chunk -> no in-kernel embedding lookup at all.
        tgt = target_batches.astype(jnp.int32)                              # (B, T)
        step_ids = jnp.concatenate(
            [jnp.full((1, B), int(sos_token), jnp.int32), tgt.T[:-1]], axis=0)  # (T, B)
        x_emb = emb_bf[step_ids]                                             # (T, B, E)
        x_emb_p = jnp.zeros((T_padded, B_pad, E_pad), bf16).at[:T, :B, :E].set(x_emb)
        inputs.append(x_emb_p)
        in_specs.append(pl.BlockSpec((Tt, B_pad, E_pad), lambda c: (c, 0, 0)))
    else:
        emb_p = jnp.zeros((V_pad, E_pad), bf16).at[:V, :E].set(emb_bf)
        inputs.append(emb_p)
        in_specs.append(pl.BlockSpec(memory_space=pl.ANY))
        n_loads = 8

    topv_struct = jax.ShapeDtypeStruct((T, B_pad, 1), jnp.int32)
    topv_spec = pl.BlockSpec((T, B_pad, 1), lambda c: (0, 0, 0))     # resident block
    if return_scores:
        out_shape = (jax.ShapeDtypeStruct((T_padded, B_pad, V_pad), scores_dtype),
                     topv_struct)
        out_specs = (pl.BlockSpec((Tt, B_pad, V_pad), lambda c: (c, 0, 0)),
                     topv_spec)
    else:
        out_shape = topv_struct
        out_specs = topv_spec

    scratch = [
        pltpu.VMEM((B_pad, C_pad), bf16),         # encode_hidden
        pltpu.VMEM((C_pad, E_pad), bf16),         # projector W^T
        pltpu.VMEM((1, E_pad), f32),              # projector bias
        pltpu.VMEM((4, E_pad), f32),              # GRU biases [r, z, n_in, n_hid]
        pltpu.VMEM((E_pad, 3 * E_pad), bf16),     # W_ih^T
        pltpu.VMEM((E_pad, 3 * E_pad), bf16),     # W_hh^T
        pltpu.VMEM((E_pad, V_pad), bf16),         # C.weight^T (score projection)
        pltpu.VMEM((B_pad, E_pad), f32),          # GRU hidden carry
    ]
    if not use_teacher_forcing:
        scratch += [pltpu.VMEM((V_pad, E_pad), bf16),     # C.weight (greedy lookup)
                    pltpu.VMEM((B_pad, 1), jnp.int32)]    # decoder-input ids carry
    scratch.append(pltpu.SemaphoreType.DMA((n_loads,)))

    # vmem limit derived from the actual footprint, capped by device capacity
    scratch_bytes = (B_pad * C_pad * 2 + C_pad * E_pad * 2 + E_pad * 4
                     + 4 * E_pad * 4 + 2 * (E_pad * 3 * E_pad) * 2
                     + E_pad * V_pad * 2 + B_pad * E_pad * 4)
    if not use_teacher_forcing:
        scratch_bytes += V_pad * E_pad * 2 + B_pad * 4
    pipe_bytes = 2 * T * B_pad * 4
    if use_teacher_forcing:
        pipe_bytes += 2 * Tt * B_pad * E_pad * 2
    if return_scores:
        pipe_bytes += 2 * Tt * B_pad * V_pad * score_bytes
    footprint = scratch_bytes + pipe_bytes
    vmem_cap = _vmem_capacity_bytes()
    vmem_limit = max(2 * footprint + (4 << 20), 32 << 20)
    vmem_limit = min(vmem_limit, max(int(vmem_cap * 0.85), footprint + (2 << 20)))

    kernel = functools.partial(
        _decoder_kernel,
        sos_token=int(sos_token),
        use_teacher_forcing=bool(use_teacher_forcing),
        return_scores=bool(return_scores),
        v_real=V, t_total=T, t_chunk=Tt)

    grid_spec = pltpu.PrefetchScalarGridSpec(
        num_scalar_prefetch=0,
        grid=(num_chunks,),
        in_specs=in_specs,
        out_specs=out_specs,
        scratch_shapes=scratch)

    outs = pl.pallas_call(
        kernel,
        grid_spec=grid_spec,
        out_shape=out_shape,
        compiler_params=pltpu.CompilerParams(
            dimension_semantics=("arbitrary",),      # recurrence: sequential T axis
            vmem_limit_bytes=int(vmem_limit)),
    )(*inputs)

    if return_scores:
        scores_p, topv_p = outs
        return scores_p[:T, :B, :V], topv_p[:, :B, :]
    return None, outs[:, :B, :]


# ---------------------------------------------------------------------------
# pure-JAX reference (mirrors the kernel's precision policy: bf16 matmul
# inputs, f32 biases / gate math / accumulation, f32 hidden state & scores).
# ---------------------------------------------------------------------------
def decoder_reference(encode_hidden, target_batches, params, *,
                      max_target_length, use_teacher_forcing,
                      sos_token=SOS_TOKEN):
    f32, bf16 = jnp.float32, jnp.bfloat16
    rb = lambda x: x.astype(bf16).astype(f32)
    B = encode_hidden.shape[0]
    V, E = params["emb"].shape
    embW = rb(params["emb"])
    wp, wih, whh = rb(params["wp"]), rb(params["wih"]), rb(params["whh"])
    bp, bih, bhh = params["bp"], params["bih"], params["bhh"]
    h = jax.nn.relu(rb(encode_hidden) @ wp.T + bp)
    dec_in = jnp.full((B,), sos_token, jnp.int32)
    outs, tops = [], []
    for t in range(max_target_length):
        x = embW[dec_in]
        gx = rb(x) @ wih.T + bih
        gh = rb(h) @ whh.T + bhh
        r = jax.nn.sigmoid(gx[:, :E] + gh[:, :E])
        z = jax.nn.sigmoid(gx[:, E:2 * E] + gh[:, E:2 * E])
        n = jnp.tanh(gx[:, 2 * E:] + r * gh[:, 2 * E:])
        h = (1.0 - z) * n + z * h
        scores = rb(h) @ embW.T
        outs.append(scores)
        top = jnp.argmax(scores, axis=1).astype(jnp.int32)
        tops.append(top)
        dec_in = target_batches[:, t].astype(jnp.int32) if use_teacher_forcing else top
    return jnp.stack(outs), jnp.stack(tops)


if __name__ == "__main__":
    B, E, V, T = 4, 32, 48, 8          # batch, embedding_dim, n_words, max_target_length

    key = jax.random.PRNGKey(0)
    ks = jax.random.split(key, 10)
    bound_gru = 1.0 / math.sqrt(E)
    bound_proj = 1.0 / math.sqrt(3 * E)
    params = {
        "emb": jax.random.normal(ks[0], (V, E), jnp.float32) * 0.1,                          # shared_emb.weight
        "wp":  jax.random.uniform(ks[1], (E, 3 * E), jnp.float32, -bound_proj, bound_proj),  # projector.weight
        "bp":  jax.random.uniform(ks[2], (E,), jnp.float32, -bound_proj, bound_proj),        # projector.bias
        "wih": jax.random.uniform(ks[3], (3 * E, E), jnp.float32, -bound_gru, bound_gru),    # rnn.weight_ih_l0
        "whh": jax.random.uniform(ks[4], (3 * E, E), jnp.float32, -bound_gru, bound_gru),    # rnn.weight_hh_l0
        "bih": jax.random.uniform(ks[5], (3 * E,), jnp.float32, -bound_gru, bound_gru),      # rnn.bias_ih_l0
        "bhh": jax.random.uniform(ks[6], (3 * E,), jnp.float32, -bound_gru, bound_gru),      # rnn.bias_hh_l0
    }

    encode_hidden = jax.random.normal(ks[7], (B, 3 * E), jnp.float32)
    target_batches = jax.random.randint(ks[8], (B, T), 0, V, jnp.int32)

    # teacher-forced run (pre-gathered step embeddings, bf16 score writeback),
    # checked against the pure-JAX reference.
    scores, topv = decoder_forward(encode_hidden, target_batches, params,
                                   max_target_length=T, use_teacher_forcing=True,
                                   return_scores=True)
    jax.block_until_ready(topv)
    ref_scores, ref_top = decoder_reference(encode_hidden, target_batches, params,
                                            max_target_length=T,
                                            use_teacher_forcing=True)
    assert scores.shape == (T, B, V) and topv.shape == (T, B, 1)
    assert jnp.allclose(scores.astype(jnp.float32), ref_scores,
                        atol=1e-2, rtol=1e-2), "score mismatch"
    assert jnp.array_equal(topv[..., 0], ref_top), "top-1 token mismatch"

    # greedy (non-teacher-forced) run: in-kernel argmax feedback, score output
    # skipped entirely (only token ids are consumed) + host-side index2word mapping.
    scores_g, topv_g = decoder_forward(encode_hidden, target_batches, params,
                                       max_target_length=T, use_teacher_forcing=False,
                                       return_scores=False)
    jax.block_until_ready(topv_g)
    assert scores_g is None
    assert topv_g.shape == (T, B, 1)
    assert int(topv_g.min()) >= 0 and int(topv_g.max()) < V
    index2word = {i: f"w{i}" for i in range(V)}     # synthetic lang.index2word
    decoded_fine = [[index2word[int(topv_g[t, b, 0])] for b in range(B)] for t in range(T)]
    decoded_coarse = [row[:] for row in decoded_fine]
    assert len(decoded_fine) == T and len(decoded_fine[0]) == B

    print("KERNEL_OK")
</pallas_src>

<mosaic_0001>
module attributes {stable_mosaic.version = 11 : i64} {
  func.func @_decoder_kernel(%arg0: i32, %arg1: memref<8x128xbf16, #tpu.memory_space<any>>, %arg2: memref<128x128xbf16, #tpu.memory_space<any>>, %arg3: memref<1x128xf32, #tpu.memory_space<any>>, %arg4: memref<4x128xf32, #tpu.memory_space<any>>, %arg5: memref<128x384xbf16, #tpu.memory_space<any>>, %arg6: memref<128x384xbf16, #tpu.memory_space<any>>, %arg7: memref<128x128xbf16, #tpu.memory_space<any>>, %arg8: memref<8x8x128xbf16, #tpu.memory_space<vmem>>, %arg9: memref<8x8x128xbf16, #tpu.memory_space<vmem>>, %arg10: memref<8x8x1xi32, #tpu.memory_space<vmem>>, %arg11: memref<8x128xbf16, #tpu.memory_space<vmem>>, %arg12: memref<128x128xbf16, #tpu.memory_space<vmem>>, %arg13: memref<1x128xf32, #tpu.memory_space<vmem>>, %arg14: memref<4x128xf32, #tpu.memory_space<vmem>>, %arg15: memref<128x384xbf16, #tpu.memory_space<vmem>>, %arg16: memref<128x384xbf16, #tpu.memory_space<vmem>>, %arg17: memref<128x128xbf16, #tpu.memory_space<vmem>>, %arg18: memref<8x128xf32, #tpu.memory_space<vmem>>, %arg19: memref<7x!tpu.dma_semaphore, #tpu.memory_space<semaphore_mem>>) attributes {dimension_semantics = [#tpu.dimension_semantics<arbitrary>], iteration_bounds = array<i64: 1>, scalar_prefetch = 0 : i64, scratch_operands = 9 : i64, tpu.core_type = #tpu.core_type<tc>, window_params = [{}, {}, {}, {}, {}, {}, {}, {transform_indices = @transform_7, window_bounds = array<i64: 8, 8, 128>}, {transform_indices = @transform_8, window_bounds = array<i64: 8, 8, 128>}, {pipeline_mode = #tpu.pipeline_mode<synchronous>, transform_indices = @transform_9, window_bounds = array<i64: 8, 8, 1>}]} {
    %c0_i32 = arith.constant 0 : i32
    %0 = arith.cmpi eq, %arg0, %c0_i32 : i32
    %1 = arith.extui %0 : i1 to i32
    %c0_i32_0 = arith.constant 0 : i32
    %2 = arith.cmpi ne, %1, %c0_i32_0 : i32
    scf.if %2 {
      %c0_i32_31 = arith.constant 0 : i32
      %61 = tpu.memref_slice %arg19[%c0_i32_31] : memref<7x!tpu.dma_semaphore, #tpu.memory_space<semaphore_mem>> -> memref<1x!tpu.dma_semaphore, #tpu.memory_space<semaphore_mem>>
      %62 = tpu.memref_squeeze %61 : memref<1x!tpu.dma_semaphore, #tpu.memory_space<semaphore_mem>> -> memref<!tpu.dma_semaphore, #tpu.memory_space<semaphore_mem>>
      tpu.enqueue_dma source(%arg7 : memref<128x128xbf16, #tpu.memory_space<any>>) target(%arg17 : memref<128x128xbf16, #tpu.memory_space<vmem>>) target_semaphore(%62 : memref<!tpu.dma_semaphore, #tpu.memory_space<semaphore_mem>>)
      %c1_i32_32 = arith.constant 1 : i32
      %63 = tpu.memref_slice %arg19[%c1_i32_32] : memref<7x!tpu.dma_semaphore, #tpu.memory_space<semaphore_mem>> -> memref<1x!tpu.dma_semaphore, #tpu.memory_space<semaphore_mem>>
      %64 = tpu.memref_squeeze %63 : memref<1x!tpu.dma_semaphore, #tpu.memory_space<semaphore_mem>> -> memref<!tpu.dma_semaphore, #tpu.memory_space<semaphore_mem>>
      tpu.enqueue_dma source(%arg5 : memref<128x384xbf16, #tpu.memory_space<any>>) target(%arg15 : memref<128x384xbf16, #tpu.memory_space<vmem>>) target_semaphore(%64 : memref<!tpu.dma_semaphore, #tpu.memory_space<semaphore_mem>>)
      %c2_i32_33 = arith.constant 2 : i32
      %65 = tpu.memref_slice %arg19[%c2_i32_33] : memref<7x!tpu.dma_semaphore, #tpu.memory_space<semaphore_mem>> -> memref<1x!tpu.dma_semaphore, #tpu.memory_space<semaphore_mem>>
      %66 = tpu.memref_squeeze %65 : memref<1x!tpu.dma_semaphore, #tpu.memory_space<semaphore_mem>> -> memref<!tpu.dma_semaphore, #tpu.memory_space<semaphore_mem>>
      tpu.enqueue_dma source(%arg6 : memref<128x384xbf16, #tpu.memory_space<any>>) target(%arg16 : memref<128x384xbf16, #tpu.memory_space<vmem>>) target_semaphore(%66 : memref<!tpu.dma_semaphore, #tpu.memory_space<semaphore_mem>>)
      %c3_i32_34 = arith.constant 3 : i32
      %67 = tpu.memref_slice %arg19[%c3_i32_34] : memref<7x!tpu.dma_semaphore, #tpu.memory_space<semaphore_mem>> -> memref<1x!tpu.dma_semaphore, #tpu.memory_space<semaphore_mem>>
      %68 = tpu.memref_squeeze %67 : memref<1x!tpu.dma_semaphore, #tpu.memory_space<semaphore_mem>> -> memref<!tpu.dma_semaphore, #tpu.memory_space<semaphore_mem>>
      tpu.enqueue_dma source(%arg4 : memref<4x128xf32, #tpu.memory_space<any>>) target(%arg14 : memref<4x128xf32, #tpu.memory_space<vmem>>) target_semaphore(%68 : memref<!tpu.dma_semaphore, #tpu.memory_space<semaphore_mem>>)
      %c4_i32_35 = arith.constant 4 : i32
      %69 = tpu.memref_slice %arg19[%c4_i32_35] : memref<7x!tpu.dma_semaphore, #tpu.memory_space<semaphore_mem>> -> memref<1x!tpu.dma_semaphore, #tpu.memory_space<semaphore_mem>>
      %70 = tpu.memref_squeeze %69 : memref<1x!tpu.dma_semaphore, #tpu.memory_space<semaphore_mem>> -> memref<!tpu.dma_semaphore, #tpu.memory_space<semaphore_mem>>
      tpu.enqueue_dma source(%arg1 : memref<8x128xbf16, #tpu.memory_space<any>>) target(%arg11 : memref<8x128xbf16, #tpu.memory_space<vmem>>) target_semaphore(%70 : memref<!tpu.dma_semaphore, #tpu.memory_space<semaphore_mem>>)
      %c5_i32_36 = arith.constant 5 : i32
      %71 = tpu.memref_slice %arg19[%c5_i32_36] : memref<7x!tpu.dma_semaphore, #tpu.memory_space<semaphore_mem>> -> memref<1x!tpu.dma_semaphore, #tpu.memory_space<semaphore_mem>>
      %72 = tpu.memref_squeeze %71 : memref<1x!tpu.dma_semaphore, #tpu.memory_space<semaphore_mem>> -> memref<!tpu.dma_semaphore, #tpu.memory_space<semaphore_mem>>
      tpu.enqueue_dma source(%arg2 : memref<128x128xbf16, #tpu.memory_space<any>>) target(%arg12 : memref<128x128xbf16, #tpu.memory_space<vmem>>) target_semaphore(%72 : memref<!tpu.dma_semaphore, #tpu.memory_space<semaphore_mem>>)
      %c6_i32_37 = arith.constant 6 : i32
      %73 = tpu.memref_slice %arg19[%c6_i32_37] : memref<7x!tpu.dma_semaphore, #tpu.memory_space<semaphore_mem>> -> memref<1x!tpu.dma_semaphore, #tpu.memory_space<semaphore_mem>>
      %74 = tpu.memref_squeeze %73 : memref<1x!tpu.dma_semaphore, #tpu.memory_space<semaphore_mem>> -> memref<!tpu.dma_semaphore, #tpu.memory_space<semaphore_mem>>
      tpu.enqueue_dma source(%arg3 : memref<1x128xf32, #tpu.memory_space<any>>) target(%arg13 : memref<1x128xf32, #tpu.memory_space<vmem>>) target_semaphore(%74 : memref<!tpu.dma_semaphore, #tpu.memory_space<semaphore_mem>>)
      %c4_i32_38 = arith.constant 4 : i32
      %75 = tpu.memref_slice %arg19[%c4_i32_38] : memref<7x!tpu.dma_semaphore, #tpu.memory_space<semaphore_mem>> -> memref<1x!tpu.dma_semaphore, #tpu.memory_space<semaphore_mem>>
      %76 = tpu.memref_squeeze %75 : memref<1x!tpu.dma_semaphore, #tpu.memory_space<semaphore_mem>> -> memref<!tpu.dma_semaphore, #tpu.memory_space<semaphore_mem>>
      tpu.wait_dma2 semaphore(%76 : memref<!tpu.dma_semaphore, #tpu.memory_space<semaphore_mem>>) src(%arg1 : memref<8x128xbf16, #tpu.memory_space<any>>) dst(%arg11 : memref<8x128xbf16, #tpu.memory_space<vmem>>)
      %c5_i32_39 = arith.constant 5 : i32
      %77 = tpu.memref_slice %arg19[%c5_i32_39] : memref<7x!tpu.dma_semaphore, #tpu.memory_space<semaphore_mem>> -> memref<1x!tpu.dma_semaphore, #tpu.memory_space<semaphore_mem>>
      %78 = tpu.memref_squeeze %77 : memref<1x!tpu.dma_semaphore, #tpu.memory_space<semaphore_mem>> -> memref<!tpu.dma_semaphore, #tpu.memory_space<semaphore_mem>>
      tpu.wait_dma2 semaphore(%78 : memref<!tpu.dma_semaphore, #tpu.memory_space<semaphore_mem>>) src(%arg2 : memref<128x128xbf16, #tpu.memory_space<any>>) dst(%arg12 : memref<128x128xbf16, #tpu.memory_space<vmem>>)
      %c6_i32_40 = arith.constant 6 : i32
      %79 = tpu.memref_slice %arg19[%c6_i32_40] : memref<7x!tpu.dma_semaphore, #tpu.memory_space<semaphore_mem>> -> memref<1x!tpu.dma_semaphore, #tpu.memory_space<semaphore_mem>>
      %80 = tpu.memref_squeeze %79 : memref<1x!tpu.dma_semaphore, #tpu.memory_space<semaphore_mem>> -> memref<!tpu.dma_semaphore, #tpu.memory_space<semaphore_mem>>
      tpu.wait_dma2 semaphore(%80 : memref<!tpu.dma_semaphore, #tpu.memory_space<semaphore_mem>>) src(%arg3 : memref<1x128xf32, #tpu.memory_space<any>>) dst(%arg13 : memref<1x128xf32, #tpu.memory_space<vmem>>)
      %c0_41 = arith.constant 0 : index
      %c0_42 = arith.constant 0 : index
      %81 = vector.load %arg11[%c0_41, %c0_42] : memref<8x128xbf16, #tpu.memory_space<vmem>>, vector<8x128xbf16>
      %c0_43 = arith.constant 0 : index
      %c0_44 = arith.constant 0 : index
      %82 = vector.load %arg12[%c0_43, %c0_44] : memref<128x128xbf16, #tpu.memory_space<vmem>>, vector<128x128xbf16>
      %cst_45 = arith.constant dense<0.000000e+00> : vector<8x128xf32>
      %83 = tpu.matmul %81, %82, %cst_45 {dimension_numbers = #tpu.dot_dimension_numbers<[1], [0], [0], [1], [0, 0, 1, 1], [], []>} : vector<8x128xbf16>, vector<128x128xbf16>, vector<8x128xf32> -> vector<8x128xf32>
      %c0_46 = arith.constant 0 : index
      %c0_47 = arith.constant 0 : index
      %84 = vector.load %arg13[%c0_46, %c0_47] : memref<1x128xf32, #tpu.memory_space<vmem>>, vector<1x128xf32>
      %85 = vector.broadcast %84 : vector<1x128xf32> to vector<8x128xf32>
      %86 = arith.addf %83, %85 : vector<8x128xf32>
      %cst_48 = arith.constant 0.000000e+00 : f32
      %87 = vector.broadcast %cst_48 : f32 to vector<8x128xf32>
      %88 = arith.maximumf %86, %87 : vector<8x128xf32>
      %c0_49 = arith.constant 0 : index
      %c0_50 = arith.constant 0 : index
      %89 = vector.load %arg18[%c0_49, %c0_50] : memref<8x128xf32, #tpu.memory_space<vmem>>, vector<8x128xf32>
      tpu.vector_store %arg18[%c0_49, %c0_50], %88 {strides = array<i32>} : memref<8x128xf32, #tpu.memory_space<vmem>>, vector<8x128xf32>,
      %c0_i32_51 = arith.constant 0 : i32
      %90 = tpu.memref_slice %arg19[%c0_i32_51] : memref<7x!tpu.dma_semaphore, #tpu.memory_space<semaphore_mem>> -> memref<1x!tpu.dma_semaphore, #tpu.memory_space<semaphore_mem>>
      %91 = tpu.memref_squeeze %90 : memref<1x!tpu.dma_semaphore, #tpu.memory_space<semaphore_mem>> -> memref<!tpu.dma_semaphore, #tpu.memory_space<semaphore_mem>>
      tpu.wait_dma2 semaphore(%91 : memref<!tpu.dma_semaphore, #tpu.memory_space<semaphore_mem>>) src(%arg7 : memref<128x128xbf16, #tpu.memory_space<any>>) dst(%arg17 : memref<128x128xbf16, #tpu.memory_space<vmem>>)
      %c1_i32_52 = arith.constant 1 : i32
      %92 = tpu.memref_slice %arg19[%c1_i32_52] : memref<7x!tpu.dma_semaphore, #tpu.memory_space<semaphore_mem>> -> memref<1x!tpu.dma_semaphore, #tpu.memory_space<semaphore_mem>>
      %93 = tpu.memref_squeeze %92 : memref<1x!tpu.dma_semaphore, #tpu.memory_space<semaphore_mem>> -> memref<!tpu.dma_semaphore, #tpu.memory_space<semaphore_mem>>
      tpu.wait_dma2 semaphore(%93 : memref<!tpu.dma_semaphore, #tpu.memory_space<semaphore_mem>>) src(%arg5 : memref<128x384xbf16, #tpu.memory_space<any>>) dst(%arg15 : memref<128x384xbf16, #tpu.memory_space<vmem>>)
      %c2_i32_53 = arith.constant 2 : i32
      %94 = tpu.memref_slice %arg19[%c2_i32_53] : memref<7x!tpu.dma_semaphore, #tpu.memory_space<semaphore_mem>> -> memref<1x!tpu.dma_semaphore, #tpu.memory_space<semaphore_mem>>
      %95 = tpu.memref_squeeze %94 : memref<1x!tpu.dma_semaphore, #tpu.memory_space<semaphore_mem>> -> memref<!tpu.dma_semaphore, #tpu.memory_space<semaphore_mem>>
      tpu.wait_dma2 semaphore(%95 : memref<!tpu.dma_semaphore, #tpu.memory_space<semaphore_mem>>) src(%arg6 : memref<128x384xbf16, #tpu.memory_space<any>>) dst(%arg16 : memref<128x384xbf16, #tpu.memory_space<vmem>>)
      %c3_i32_54 = arith.constant 3 : i32
      %96 = tpu.memref_slice %arg19[%c3_i32_54] : memref<7x!tpu.dma_semaphore, #tpu.memory_space<semaphore_mem>> -> memref<1x!tpu.dma_semaphore, #tpu.memory_space<semaphore_mem>>
      %97 = tpu.memref_squeeze %96 : memref<1x!tpu.dma_semaphore, #tpu.memory_space<semaphore_mem>> -> memref<!tpu.dma_semaphore, #tpu.memory_space<semaphore_mem>>
      tpu.wait_dma2 semaphore(%97 : memref<!tpu.dma_semaphore, #tpu.memory_space<semaphore_mem>>) src(%arg4 : memref<4x128xf32, #tpu.memory_space<any>>) dst(%arg14 : memref<4x128xf32, #tpu.memory_space<vmem>>)
    } else {
    }
    %3 = tpu.iota {dimensions = array<i32: 1>} : vector<1x128xi32>
    %c48_i32 = arith.constant 48 : i32
    %4 = vector.broadcast %c48_i32 : i32 to vector<1x128xi32>
    %5 = arith.cmpi slt, %3, %4 : vector<1x128xi32>
    %cst = arith.constant 0.000000e+00 : f32
    %cst_1 = arith.constant -1.000000e+30 : f32
    %6 = vector.broadcast %cst : f32 to vector<1x128xf32>
    %7 = vector.broadcast %cst_1 : f32 to vector<1x128xf32>
    %8 = arith.select %5, %6, %7 : vector<1x128xi1>, vector<1x128xf32>
    %c0 = arith.constant 0 : index
    %c0_2 = arith.constant 0 : index
    %9 = vector.load %arg14[%c0, %c0_2] : memref<4x128xf32, #tpu.memory_space<vmem>>, vector<1x128xf32>
    %10 = vector.shape_cast %9 : vector<1x128xf32> to vector<1x128xf32>
    %11 = vector.broadcast %10 : vector<1x128xf32> to vector<8x128xf32>
    %c1 = arith.constant 1 : index
    %c0_3 = arith.constant 0 : index
    %12 = vector.load %arg14[%c1, %c0_3] : memref<4x128xf32, #tpu.memory_space<vmem>>, vector<1x128xf32>
    %13 = vector.shape_cast %12 : vector<1x128xf32> to vector<1x128xf32>
    %14 = vector.broadcast %13 : vector<1x128xf32> to vector<8x128xf32>
    %c2 = arith.constant 2 : index
    %c0_4 = arith.constant 0 : index
    %15 = vector.load %arg14[%c2, %c0_4] : memref<4x128xf32, #tpu.memory_space<vmem>>, vector<1x128xf32>
    %16 = vector.shape_cast %15 : vector<1x128xf32> to vector<1x128xf32>
    %17 = vector.broadcast %16 : vector<1x128xf32> to vector<8x128xf32>
    %c3 = arith.constant 3 : index
    %c0_5 = arith.constant 0 : index
    %18 = vector.load %arg14[%c3, %c0_5] : memref<4x128xf32, #tpu.memory_space<vmem>>, vector<1x128xf32>
    %19 = vector.shape_cast %18 : vector<1x128xf32> to vector<1x128xf32>
    %20 = vector.broadcast %19 : vector<1x128xf32> to vector<8x128xf32>
    %c0_i32_6 = arith.constant 0 : i32
    %c8_i32 = arith.constant 8 : i32
    %21 = arith.muli %arg0, %c8_i32 : i32
    %22 = arith.addi %21, %c0_i32_6 : i32
    %c8_i32_7 = arith.constant 8 : i32
    %23 = arith.cmpi slt, %22, %c8_i32_7 : i32
    %24 = arith.extui %23 : i1 to i32
    %c0_i32_8 = arith.constant 0 : i32
    %25 = arith.cmpi ne, %24, %c0_i32_8 : i32
    scf.if %25 {
      %61 = arith.index_cast %c0_i32_6 : i32 to index
      %c0_31 = arith.constant 0 : index
      %c0_32 = arith.constant 0 : index
      %62 = vector.load %arg8[%61, %c0_31, %c0_32] : memref<8x8x128xbf16, #tpu.memory_space<vmem>>, vector<1x8x128xbf16>
      %63 = vector.shape_cast %62 : vector<1x8x128xbf16> to vector<8x128xbf16>
      %c0_33 = arith.constant 0 : index
      %c0_34 = arith.constant 0 : index
      %64 = vector.load %arg18[%c0_33, %c0_34] : memref<8x128xf32, #tpu.memory_space<vmem>>, vector<8x128xf32>
      %c0_35 = arith.constant 0 : index
      %c0_36 = arith.constant 0 : index
      %65 = vector.load %arg15[%c0_35, %c0_36] : memref<128x384xbf16, #tpu.memory_space<vmem>>, vector<128x384xbf16>
      %cst_37 = arith.constant dense<0.000000e+00> : vector<8x384xf32>
      %66 = tpu.matmul %63, %65, %cst_37 {dimension_numbers = #tpu.dot_dimension_numbers<[1], [0], [0], [1], [0, 0, 1, 1], [], []>} : vector<8x128xbf16>, vector<128x384xbf16>, vector<8x384xf32> -> vector<8x384xf32>
      %67 = arith.truncf %64 : vector<8x128xf32> to vector<8x128xbf16>
      %c0_38 = arith.constant 0 : index
      %c0_39 = arith.constant 0 : index
      %68 = vector.load %arg16[%c0_38, %c0_39] : memref<128x384xbf16, #tpu.memory_space<vmem>>, vector<128x384xbf16>
      %cst_40 = arith.constant dense<0.000000e+00> : vector<8x384xf32>
      %69 = tpu.matmul %67, %68, %cst_40 {dimension_numbers = #tpu.dot_dimension_numbers<[1], [0], [0], [1], [0, 0, 1, 1], [], []>} : vector<8x128xbf16>, vector<128x384xbf16>, vector<8x384xf32> -> vector<8x384xf32>
      %70 = vector.extract_strided_slice %66 {offsets = [0, 0], sizes = [8, 128], strides = [1, 1]} : vector<8x384xf32> to vector<8x128xf32>
      %71 = vector.extract_strided_slice %69 {offsets = [0, 0], sizes = [8, 128], strides = [1, 1]} : vector<8x384xf32> to vector<8x128xf32>
      %72 = arith.addf %70, %71 : vector<8x128xf32>
      %73 = arith.addf %72, %11 : vector<8x128xf32>
      %74 = arith.negf %73 : vector<8x128xf32>
      %75 = math.exp %74 : vector<8x128xf32>
      %cst_41 = arith.constant 1.000000e+00 : f32
      %76 = vector.broadcast %cst_41 : f32 to vector<8x128xf32>
      %77 = arith.addf %76, %75 : vector<8x128xf32>
      %78 = arith.divf %76, %77 : vector<8x128xf32>
      %79 = vector.extract_strided_slice %66 {offsets = [0, 128], sizes = [8, 128], strides = [1, 1]} : vector<8x384xf32> to vector<8x128xf32>
      %80 = vector.extract_strided_slice %69 {offsets = [0, 128], sizes = [8, 128], strides = [1, 1]} : vector<8x384xf32> to vector<8x128xf32>
      %81 = arith.addf %79, %80 : vector<8x128xf32>
      %82 = arith.addf %81, %14 : vector<8x128xf32>
      %83 = arith.negf %82 : vector<8x128xf32>
      %84 = math.exp %83 : vector<8x128xf32>
      %cst_42 = arith.constant 1.000000e+00 : f32
      %85 = vector.broadcast %cst_42 : f32 to vector<8x128xf32>
      %86 = arith.addf %85, %84 : vector<8x128xf32>
      %87 = arith.divf %85, %86 : vector<8x128xf32>
      %88 = vector.extract_strided_slice %66 {offsets = [0, 256], sizes = [8, 128], strides = [1, 1]} : vector<8x384xf32> to vector<8x128xf32>
      %89 = arith.addf %88, %17 : vector<8x128xf32>
      %90 = vector.extract_strided_slice %69 {offsets = [0, 256], sizes = [8, 128], strides = [1, 1]} : vector<8x384xf32> to vector<8x128xf32>
      %91 = arith.addf %90, %20 : vector<8x128xf32>
      %92 = arith.mulf %78, %91 : vector<8x128xf32>
      %93 = arith.addf %89, %92 : vector<8x128xf32>
      %94 = math.tanh %93 : vector<8x128xf32>
      %cst_43 = arith.constant 1.000000e+00 : f32
      %95 = vector.broadcast %cst_43 : f32 to vector<8x128xf32>
      %96 = arith.subf %95, %87 : vector<8x128xf32>
      %97 = arith.mulf %96, %94 : vector<8x128xf32>
      %98 = arith.mulf %87, %64 : vector<8x128xf32>
      %99 = arith.addf %97, %98 : vector<8x128xf32>
      %c0_44 = arith.constant 0 : index
      %c0_45 = arith.constant 0 : index
      %100 = vector.load %arg18[%c0_44, %c0_45] : memref<8x128xf32, #tpu.memory_space<vmem>>, vector<8x128xf32>
      tpu.vector_store %arg18[%c0_44, %c0_45], %99 {strides = array<i32>} : memref<8x128xf32, #tpu.memory_space<vmem>>, vector<8x128xf32>,
      %101 = arith.truncf %99 : vector<8x128xf32> to vector<8x128xbf16>
      %c0_46 = arith.constant 0 : index
      %c0_47 = arith.constant 0 : index
      %102 = vector.load %arg17[%c0_46, %c0_47] : memref<128x128xbf16, #tpu.memory_space<vmem>>, vector<128x128xbf16>
      %cst_48 = arith.constant dense<0.000000e+00> : vector<8x128xf32>
      %103 = tpu.matmul %101, %102, %cst_48 {dimension_numbers = #tpu.dot_dimension_numbers<[1], [0], [0], [1], [0, 0, 1, 1], [], []>} : vector<8x128xbf16>, vector<128x128xbf16>, vector<8x128xf32> -> vector<8x128xf32>
      %104 = arith.truncf %103 : vector<8x128xf32> to vector<8x128xbf16>
      %105 = arith.index_cast %c0_i32_6 : i32 to index
      %c0_49 = arith.constant 0 : index
      %c0_50 = arith.constant 0 : index
      %106 = vector.load %arg9[%105, %c0_49, %c0_50] : memref<8x8x128xbf16, #tpu.memory_space<vmem>>, vector<1x8x128xbf16>
      %107 = vector.shape_cast %106 : vector<1x8x128xbf16> to vector<8x128xbf16>
      %108 = vector.shape_cast %104 : vector<8x128xbf16> to vector<1x8x128xbf16>
      tpu.vector_store %arg9[%105, %c0_49, %c0_50], %108 {strides = array<i32>} : memref<8x8x128xbf16, #tpu.memory_space<vmem>>, vector<1x8x128xbf16>,
      %109 = vector.broadcast %8 : vector<1x128xf32> to vector<8x128xf32>
      %110 = arith.addf %103, %109 : vector<8x128xf32>
      %cst_51 = arith.constant dense<0xFF800000> : vector<8xf32>
      %111 = vector.multi_reduction <maximumf>, %110, %cst_51 [1] : vector<8x128xf32> to vector<8xf32>
      %112 = vector.shape_cast %111 : vector<8xf32> to vector<8x1xf32>
      %113 = vector.broadcast %112 : vector<8x1xf32> to vector<8x128xf32>
      %114 = arith.cmpf oeq, %110, %113 : vector<8x128xf32>
      %c128_i32 = arith.constant 128 : i32
      %115 = vector.shape_cast %3 : vector<1x128xi32> to vector<1x128xi32>
      %116 = vector.broadcast %115 : vector<1x128xi32> to vector<8x128xi32>
      %117 = vector.broadcast %c128_i32 : i32 to vector<8x128xi32>
      %118 = arith.select %114, %116, %117 : vector<8x128xi1>, vector<8x128xi32>
      %cst_52 = arith.constant dense<2147483647> : vector<8xi32>
      %119 = vector.multi_reduction <minsi>, %118, %cst_52 [1] : vector<8x128xi32> to vector<8xi32>
      %120 = vector.shape_cast %119 : vector<8xi32> to vector<8x1xi32>
      %121 = arith.index_cast %22 : i32 to index
      %c0_53 = arith.constant 0 : index
      %c0_54 = arith.constant 0 : index
      %122 = vector.load %arg10[%121, %c0_53, %c0_54] : memref<8x8x1xi32, #tpu.memory_space<vmem>>, vector<1x8x1xi32>
      %123 = vector.shape_cast %122 : vector<1x8x1xi32> to vector<8x1xi32>
      %124 = vector.shape_cast %120 : vector<8x1xi32> to vector<1x8x1xi32>
      tpu.vector_store %arg10[%121, %c0_53, %c0_54], %124 {strides = array<i32>} : memref<8x8x1xi32, #tpu.memory_space<vmem>>, vector<1x8x1xi32>,
    } else {
    }
    %c1_i32 = arith.constant 1 : i32
    %c8_i32_9 = arith.constant 8 : i32
    %26 = arith.muli %arg0, %c8_i32_9 : i32
    %27 = arith.addi %26, %c1_i32 : i32
    %c8_i32_10 = arith.constant 8 : i32
    %28 = arith.cmpi slt, %27, %c8_i32_10 : i32
    %29 = arith.extui %28 : i1 to i32
    %c0_i32_11 = arith.constant 0 : i32
    %30 = arith.cmpi ne, %29, %c0_i32_11 : i32
    scf.if %30 {
      %61 = arith.index_cast %c1_i32 : i32 to index
      %c0_31 = arith.constant 0 : index
      %c0_32 = arith.constant 0 : index
      %62 = vector.load %arg8[%61, %c0_31, %c0_32] : memref<8x8x128xbf16, #tpu.memory_space<vmem>>, vector<1x8x128xbf16>
      %63 = vector.shape_cast %62 : vector<1x8x128xbf16> to vector<8x128xbf16>
      %c0_33 = arith.constant 0 : index
      %c0_34 = arith.constant 0 : index
      %64 = vector.load %arg18[%c0_33, %c0_34] : memref<8x128xf32, #tpu.memory_space<vmem>>, vector<8x128xf32>
      %c0_35 = arith.constant 0 : index
      %c0_36 = arith.constant 0 : index
      %65 = vector.load %arg15[%c0_35, %c0_36] : memref<128x384xbf16, #tpu.memory_space<vmem>>, vector<128x384xbf16>
      %cst_37 = arith.constant dense<0.000000e+00> : vector<8x384xf32>
      %66 = tpu.matmul %63, %65, %cst_37 {dimension_numbers = #tpu.dot_dimension_numbers<[1], [0], [0], [1], [0, 0, 1, 1], [], []>} : vector<8x128xbf16>, vector<128x384xbf16>, vector<8x384xf32> -> vector<8x384xf32>
      %67 = arith.truncf %64 : vector<8x128xf32> to vector<8x128xbf16>
      %c0_38 = arith.constant 0 : index
      %c0_39 = arith.constant 0 : index
      %68 = vector.load %arg16[%c0_38, %c0_39] : memref<128x384xbf16, #tpu.memory_space<vmem>>, vector<128x384xbf16>
      %cst_40 = arith.constant dense<0.000000e+00> : vector<8x384xf32>
      %69 = tpu.matmul %67, %68, %cst_40 {dimension_numbers = #tpu.dot_dimension_numbers<[1], [0], [0], [1], [0, 0, 1, 1], [], []>} : vector<8x128xbf16>, vector<128x384xbf16>, vector<8x384xf32> -> vector<8x384xf32>
      %70 = vector.extract_strided_slice %66 {offsets = [0, 0], sizes = [8, 128], strides = [1, 1]} : vector<8x384xf32> to vector<8x128xf32>
      %71 = vector.extract_strided_slice %69 {offsets = [0, 0], sizes = [8, 128], strides = [1, 1]} : vector<8x384xf32> to vector<8x128xf32>
      %72 = arith.addf %70, %71 : vector<8x128xf32>
      %73 = arith.addf %72, %11 : vector<8x128xf32>
      %74 = arith.negf %73 : vector<8x128xf32>
      %75 = math.exp %74 : vector<8x128xf32>
      %cst_41 = arith.constant 1.000000e+00 : f32
      %76 = vector.broadcast %cst_41 : f32 to vector<8x128xf32>
      %77 = arith.addf %76, %75 : vector<8x128xf32>
      %78 = arith.divf %76, %77 : vector<8x128xf32>
      %79 = vector.extract_strided_slice %66 {offsets = [0, 128], sizes = [8, 128], strides = [1, 1]} : vector<8x384xf32> to vector<8x128xf32>
      %80 = vector.extract_strided_slice %69 {offsets = [0, 128], sizes = [8, 128], strides = [1, 1]} : vector<8x384xf32> to vector<8x128xf32>
      %81 = arith.addf %79, %80 : vector<8x128xf32>
      %82 = arith.addf %81, %14 : vector<8x128xf32>
      %83 = arith.negf %82 : vector<8x128xf32>
      %84 = math.exp %83 : vector<8x128xf32>
      %cst_42 = arith.constant 1.000000e+00 : f32
      %85 = vector.broadcast %cst_42 : f32 to vector<8x128xf32>
      %86 = arith.addf %85, %84 : vector<8x128xf32>
      %87 = arith.divf %85, %86 : vector<8x128xf32>
      %88 = vector.extract_strided_slice %66 {offsets = [0, 256], sizes = [8, 128], strides = [1, 1]} : vector<8x384xf32> to vector<8x128xf32>
      %89 = arith.addf %88, %17 : vector<8x128xf32>
      %90 = vector.extract_strided_slice %69 {offsets = [0, 256], sizes = [8, 128], strides = [1, 1]} : vector<8x384xf32> to vector<8x128xf32>
      %91 = arith.addf %90, %20 : vector<8x128xf32>
      %92 = arith.mulf %78, %91 : vector<8x128xf32>
      %93 = arith.addf %89, %92 : vector<8x128xf32>
      %94 = math.tanh %93 : vector<8x128xf32>
      %cst_43 = arith.constant 1.000000e+00 : f32
      %95 = vector.broadcast %cst_43 : f32 to vector<8x128xf32>
      %96 = arith.subf %95, %87 : vector<8x128xf32>
      %97 = arith.mulf %96, %94 : vector<8x128xf32>
      %98 = arith.mulf %87, %64 : vector<8x128xf32>
      %99 = arith.addf %97, %98 : vector<8x128xf32>
      %c0_44 = arith.constant 0 : index
      %c0_45 = arith.constant 0 : index
      %100 = vector.load %arg18[%c0_44, %c0_45] : memref<8x128xf32, #tpu.memory_space<vmem>>, vector<8x128xf32>
      tpu.vector_store %arg18[%c0_44, %c0_45], %99 {strides = array<i32>} : memref<8x128xf32, #tpu.memory_space<vmem>>, vector<8x128xf32>,
      %101 = arith.truncf %99 : vector<8x128xf32> to vector<8x128xbf16>
      %c0_46 = arith.constant 0 : index
      %c0_47 = arith.constant 0 : index
      %102 = vector.load %arg17[%c0_46, %c0_47] : memref<128x128xbf16, #tpu.memory_space<vmem>>, vector<128x128xbf16>
      %cst_48 = arith.constant dense<0.000000e+00> : vector<8x128xf32>
      %103 = tpu.matmul %101, %102, %cst_48 {dimension_numbers = #tpu.dot_dimension_numbers<[1], [0], [0], [1], [0, 0, 1, 1], [], []>} : vector<8x128xbf16>, vector<128x128xbf16>, vector<8x128xf32> -> vector<8x128xf32>
      %104 = arith.truncf %103 : vector<8x128xf32> to vector<8x128xbf16>
      %105 = arith.index_cast %c1_i32 : i32 to index
      %c0_49 = arith.constant 0 : index
      %c0_50 = arith.constant 0 : index
      %106 = vector.load %arg9[%105, %c0_49, %c0_50] : memref<8x8x128xbf16, #tpu.memory_space<vmem>>, vector<1x8x128xbf16>
      %107 = vector.shape_cast %106 : vector<1x8x128xbf16> to vector<8x128xbf16>
      %108 = vector.shape_cast %104 : vector<8x128xbf16> to vector<1x8x128xbf16>
      tpu.vector_store %arg9[%105, %c0_49, %c0_50], %108 {strides = array<i32>} : memref<8x8x128xbf16, #tpu.memory_space<vmem>>, vector<1x8x128xbf16>,
      %109 = vector.broadcast %8 : vector<1x128xf32> to vector<8x128xf32>
      %110 = arith.addf %103, %109 : vector<8x128xf32>
      %cst_51 = arith.constant dense<0xFF800000> : vector<8xf32>
      %111 = vector.multi_reduction <maximumf>, %110, %cst_51 [1] : vector<8x128xf32> to vector<8xf32>
      %112 = vector.shape_cast %111 : vector<8xf32> to vector<8x1xf32>
      %113 = vector.broadcast %112 : vector<8x1xf32> to vector<8x128xf32>
      %114 = arith.cmpf oeq, %110, %113 : vector<8x128xf32>
      %c128_i32 = arith.constant 128 : i32
      %115 = vector.shape_cast %3 : vector<1x128xi32> to vector<1x128xi32>
      %116 = vector.broadcast %115 : vector<1x128xi32> to vector<8x128xi32>
      %117 = vector.broadcast %c128_i32 : i32 to vector<8x128xi32>
      %118 = arith.select %114, %116, %117 : vector<8x128xi1>, vector<8x128xi32>
      %cst_52 = arith.constant dense<2147483647> : vector<8xi32>
      %119 = vector.multi_reduction <minsi>, %118, %cst_52 [1] : vector<8x128xi32> to vector<8xi32>
      %120 = vector.shape_cast %119 : vector<8xi32> to vector<8x1xi32>
      %121 = arith.index_cast %27 : i32 to index
      %c0_53 = arith.constant 0 : index
      %c0_54 = arith.constant 0 : index
      %122 = vector.load %arg10[%121, %c0_53, %c0_54] : memref<8x8x1xi32, #tpu.memory_space<vmem>>, vector<1x8x1xi32>
      %123 = vector.shape_cast %122 : vector<1x8x1xi32> to vector<8x1xi32>
      %124 = vector.shape_cast %120 : vector<8x1xi32> to vector<1x8x1xi32>
      tpu.vector_store %arg10[%121, %c0_53, %c0_54], %124 {strides = array<i32>} : memref<8x8x1xi32, #tpu.memory_space<vmem>>, vector<1x8x1xi32>,
    } else {
    }
    %c2_i32 = arith.constant 2 : i32
    %c8_i32_12 = arith.constant 8 : i32
    %31 = arith.muli %arg0, %c8_i32_12 : i32
    %32 = arith.addi %31, %c2_i32 : i32
    %c8_i32_13 = arith.constant 8 : i32
    %33 = arith.cmpi slt, %32, %c8_i32_13 : i32
    %34 = arith.extui %33 : i1 to i32
    %c0_i32_14 = arith.constant 0 : i32
    %35 = arith.cmpi ne, %34, %c0_i32_14 : i32
    scf.if %35 {
      %61 = arith.index_cast %c2_i32 : i32 to index
      %c0_31 = arith.constant 0 : index
      %c0_32 = arith.constant 0 : index
      %62 = vector.load %arg8[%61, %c0_31, %c0_32] : memref<8x8x128xbf16, #tpu.memory_space<vmem>>, vector<1x8x128xbf16>
      %63 = vector.shape_cast %62 : vector<1x8x128xbf16> to vector<8x128xbf16>
      %c0_33 = arith.constant 0 : index
      %c0_34 = arith.constant 0 : index
      %64 = vector.load %arg18[%c0_33, %c0_34] : memref<8x128xf32, #tpu.memory_space<vmem>>, vector<8x128xf32>
      %c0_35 = arith.constant 0 : index
      %c0_36 = arith.constant 0 : index
      %65 = vector.load %arg15[%c0_35, %c0_36] : memref<128x384xbf16, #tpu.memory_space<vmem>>, vector<128x384xbf16>
      %cst_37 = arith.constant dense<0.000000e+00> : vector<8x384xf32>
      %66 = tpu.matmul %63, %65, %cst_37 {dimension_numbers = #tpu.dot_dimension_numbers<[1], [0], [0], [1], [0, 0, 1, 1], [], []>} : vector<8x128xbf16>, vector<128x384xbf16>, vector<8x384xf32> -> vector<8x384xf32>
      %67 = arith.truncf %64 : vector<8x128xf32> to vector<8x128xbf16>
      %c0_38 = arith.constant 0 : index
      %c0_39 = arith.constant 0 : index
      %68 = vector.load %arg16[%c0_38, %c0_39] : memref<128x384xbf16, #tpu.memory_space<vmem>>, vector<128x384xbf16>
      %cst_40 = arith.constant dense<0.000000e+00> : vector<8x384xf32>
      %69 = tpu.matmul %67, %68, %cst_40 {dimension_numbers = #tpu.dot_dimension_numbers<[1], [0], [0], [1], [0, 0, 1, 1], [], []>} : vector<8x128xbf16>, vector<128x384xbf16>, vector<8x384xf32> -> vector<8x384xf32>
      %70 = vector.extract_strided_slice %66 {offsets = [0, 0], sizes = [8, 128], strides = [1, 1]} : vector<8x384xf32> to vector<8x128xf32>
      %71 = vector.extract_strided_slice %69 {offsets = [0, 0], sizes = [8, 128], strides = [1, 1]} : vector<8x384xf32> to vector<8x128xf32>
      %72 = arith.addf %70, %71 : vector<8x128xf32>
      %73 = arith.addf %72, %11 : vector<8x128xf32>
      %74 = arith.negf %73 : vector<8x128xf32>
      %75 = math.exp %74 : vector<8x128xf32>
      %cst_41 = arith.constant 1.000000e+00 : f32
      %76 = vector.broadcast %cst_41 : f32 to vector<8x128xf32>
      %77 = arith.addf %76, %75 : vector<8x128xf32>
      %78 = arith.divf %76, %77 : vector<8x128xf32>
      %79 = vector.extract_strided_slice %66 {offsets = [0, 128], sizes = [8, 128], strides = [1, 1]} : vector<8x384xf32> to vector<8x128xf32>
      %80 = vector.extract_strided_slice %69 {offsets = [0, 128], sizes = [8, 128], strides = [1, 1]} : vector<8x384xf32> to vector<8x128xf32>
      %81 = arith.addf %79, %80 : vector<8x128xf32>
      %82 = arith.addf %81, %14 : vector<8x128xf32>
      %83 = arith.negf %82 : vector<8x128xf32>
      %84 = math.exp %83 : vector<8x128xf32>
      %cst_42 = arith.constant 1.000000e+00 : f32
      %85 = vector.broadcast %cst_42 : f32 to vector<8x128xf32>
      %86 = arith.addf %85, %84 : vector<8x128xf32>
      %87 = arith.divf %85, %86 : vector<8x128xf32>
      %88 = vector.extract_strided_slice %66 {offsets = [0, 256], sizes = [8, 128], strides = [1, 1]} : vector<8x384xf32> to vector<8x128xf32>
      %89 = arith.addf %88, %17 : vector<8x128xf32>
      %90 = vector.extract_strided_slice %69 {offsets = [0, 256], sizes = [8, 128], strides = [1, 1]} : vector<8x384xf32> to vector<8x128xf32>
      %91 = arith.addf %90, %20 : vector<8x128xf32>
      %92 = arith.mulf %78, %91 : vector<8x128xf32>
      %93 = arith.addf %89, %92 : vector<8x128xf32>
      %94 = math.tanh %93 : vector<8x128xf32>
      %cst_43 = arith.constant 1.000000e+00 : f32
      %95 = vector.broadcast %cst_43 : f32 to vector<8x128xf32>
      %96 = arith.subf %95, %87 : vector<8x128xf32>
      %97 = arith.mulf %96, %94 : vector<8x128xf32>
      %98 = arith.mulf %87, %64 : vector<8x128xf32>
      %99 = arith.addf %97, %98 : vector<8x128xf32>
      %c0_44 = arith.constant 0 : index
      %c0_45 = arith.constant 0 : index
      %100 = vector.load %arg18[%c0_44, %c0_45] : memref<8x128xf32, #tpu.memory_space<vmem>>, vector<8x128xf32>
      tpu.vector_store %arg18[%c0_44, %c0_45], %99 {strides = array<i32>} : memref<8x128xf32, #tpu.memory_space<vmem>>, vector<8x128xf32>,
      %101 = arith.truncf %99 : vector<8x128xf32> to vector<8x128xbf16>
      %c0_46 = arith.constant 0 : index
      %c0_47 = arith.constant 0 : index
      %102 = vector.load %arg17[%c0_46, %c0_47] : memref<128x128xbf16, #tpu.memory_space<vmem>>, vector<128x128xbf16>
      %cst_48 = arith.constant dense<0.000000e+00> : vector<8x128xf32>
      %103 = tpu.matmul %101, %102, %cst_48 {dimension_numbers = #tpu.dot_dimension_numbers<[1], [0], [0], [1], [0, 0, 1, 1], [], []>} : vector<8x128xbf16>, vector<128x128xbf16>, vector<8x128xf32> -> vector<8x128xf32>
      %104 = arith.truncf %103 : vector<8x128xf32> to vector<8x128xbf16>
      %105 = arith.index_cast %c2_i32 : i32 to index
      %c0_49 = arith.constant 0 : index
      %c0_50 = arith.constant 0 : index
      %106 = vector.load %arg9[%105, %c0_49, %c0_50] : memref<8x8x128xbf16, #tpu.memory_space<vmem>>, vector<1x8x128xbf16>
      %107 = vector.shape_cast %106 : vector<1x8x128xbf16> to vector<8x128xbf16>
      %108 = vector.shape_cast %104 : vector<8x128xbf16> to vector<1x8x128xbf16>
      tpu.vector_store %arg9[%105, %c0_49, %c0_50], %108 {strides = array<i32>} : memref<8x8x128xbf16, #tpu.memory_space<vmem>>, vector<1x8x128xbf16>,
      %109 = vector.broadcast %8 : vector<1x128xf32> to vector<8x128xf32>
      %110 = arith.addf %103, %109 : vector<8x128xf32>
      %cst_51 = arith.constant dense<0xFF800000> : vector<8xf32>
      %111 = vector.multi_reduction <maximumf>, %110, %cst_51 [1] : vector<8x128xf32> to vector<8xf32>
      %112 = vector.shape_cast %111 : vector<8xf32> to vector<8x1xf32>
      %113 = vector.broadcast %112 : vector<8x1xf32> to vector<8x128xf32>
      %114 = arith.cmpf oeq, %110, %113 : vector<8x128xf32>
      %c128_i32 = arith.constant 128 : i32
      %115 = vector.shape_cast %3 : vector<1x128xi32> to vector<1x128xi32>
      %116 = vector.broadcast %115 : vector<1x128xi32> to vector<8x128xi32>
      %117 = vector.broadcast %c128_i32 : i32 to vector<8x128xi32>
      %118 = arith.select %114, %116, %117 : vector<8x128xi1>, vector<8x128xi32>
      %cst_52 = arith.constant dense<2147483647> : vector<8xi32>
      %119 = vector.multi_reduction <minsi>, %118, %cst_52 [1] : vector<8x128xi32> to vector<8xi32>
      %120 = vector.shape_cast %119 : vector<8xi32> to vector<8x1xi32>
      %121 = arith.index_cast %32 : i32 to index
      %c0_53 = arith.constant 0 : index
      %c0_54 = arith.constant 0 : index
      %122 = vector.load %arg10[%121, %c0_53, %c0_54] : memref<8x8x1xi32, #tpu.memory_space<vmem>>, vector<1x8x1xi32>
      %123 = vector.shape_cast %122 : vector<1x8x1xi32> to vector<8x1xi32>
      %124 = vector.shape_cast %120 : vector<8x1xi32> to vector<1x8x1xi32>
      tpu.vector_store %arg10[%121, %c0_53, %c0_54], %124 {strides = array<i32>} : memref<8x8x1xi32, #tpu.memory_space<vmem>>, vector<1x8x1xi32>,
    } else {
    }
    %c3_i32 = arith.constant 3 : i32
    %c8_i32_15 = arith.constant 8 : i32
    %36 = arith.muli %arg0, %c8_i32_15 : i32
    %37 = arith.addi %36, %c3_i32 : i32
    %c8_i32_16 = arith.constant 8 : i32
    %38 = arith.cmpi slt, %37, %c8_i32_16 : i32
    %39 = arith.extui %38 : i1 to i32
    %c0_i32_17 = arith.constant 0 : i32
    %40 = arith.cmpi ne, %39, %c0_i32_17 : i32
    scf.if %40 {
      %61 = arith.index_cast %c3_i32 : i32 to index
      %c0_31 = arith.constant 0 : index
      %c0_32 = arith.constant 0 : index
      %62 = vector.load %arg8[%61, %c0_31, %c0_32] : memref<8x8x128xbf16, #tpu.memory_space<vmem>>, vector<1x8x128xbf16>
      %63 = vector.shape_cast %62 : vector<1x8x128xbf16> to vector<8x128xbf16>
      %c0_33 = arith.constant 0 : index
      %c0_34 = arith.constant 0 : index
      %64 = vector.load %arg18[%c0_33, %c0_34] : memref<8x128xf32, #tpu.memory_space<vmem>>, vector<8x128xf32>
      %c0_35 = arith.constant 0 : index
      %c0_36 = arith.constant 0 : index
      %65 = vector.load %arg15[%c0_35, %c0_36] : memref<128x384xbf16, #tpu.memory_space<vmem>>, vector<128x384xbf16>
      %cst_37 = arith.constant dense<0.000000e+00> : vector<8x384xf32>
      %66 = tpu.matmul %63, %65, %cst_37 {dimension_numbers = #tpu.dot_dimension_numbers<[1], [0], [0], [1], [0, 0, 1, 1], [], []>} : vector<8x128xbf16>, vector<128x384xbf16>, vector<8x384xf32> -> vector<8x384xf32>
      %67 = arith.truncf %64 : vector<8x128xf32> to vector<8x128xbf16>
      %c0_38 = arith.constant 0 : index
      %c0_39 = arith.constant 0 : index
      %68 = vector.load %arg16[%c0_38, %c0_39] : memref<128x384xbf16, #tpu.memory_space<vmem>>, vector<128x384xbf16>
      %cst_40 = arith.constant dense<0.000000e+00> : vector<8x384xf32>
      %69 = tpu.matmul %67, %68, %cst_40 {dimension_numbers = #tpu.dot_dimension_numbers<[1], [0], [0], [1], [0, 0, 1, 1], [], []>} : vector<8x128xbf16>, vector<128x384xbf16>, vector<8x384xf32> -> vector<8x384xf32>
      %70 = vector.extract_strided_slice %66 {offsets = [0, 0], sizes = [8, 128], strides = [1, 1]} : vector<8x384xf32> to vector<8x128xf32>
      %71 = vector.extract_strided_slice %69 {offsets = [0, 0], sizes = [8, 128], strides = [1, 1]} : vector<8x384xf32> to vector<8x128xf32>
      %72 = arith.addf %70, %71 : vector<8x128xf32>
      %73 = arith.addf %72, %11 : vector<8x128xf32>
      %74 = arith.negf %73 : vector<8x128xf32>
      %75 = math.exp %74 : vector<8x128xf32>
      %cst_41 = arith.constant 1.000000e+00 : f32
      %76 = vector.broadcast %cst_41 : f32 to vector<8x128xf32>
      %77 = arith.addf %76, %75 : vector<8x128xf32>
      %78 = arith.divf %76, %77 : vector<8x128xf32>
      %79 = vector.extract_strided_slice %66 {offsets = [0, 128], sizes = [8, 128], strides = [1, 1]} : vector<8x384xf32> to vector<8x128xf32>
      %80 = vector.extract_strided_slice %69 {offsets = [0, 128], sizes = [8, 128], strides = [1, 1]} : vector<8x384xf32> to vector<8x128xf32>
      %81 = arith.addf %79, %80 : vector<8x128xf32>
      %82 = arith.addf %81, %14 : vector<8x128xf32>
      %83 = arith.negf %82 : vector<8x128xf32>
      %84 = math.exp %83 : vector<8x128xf32>
      %cst_42 = arith.constant 1.000000e+00 : f32
      %85 = vector.broadcast %cst_42 : f32 to vector<8x128xf32>
      %86 = arith.addf %85, %84 : vector<8x128xf32>
      %87 = arith.divf %85, %86 : vector<8x128xf32>
      %88 = vector.extract_strided_slice %66 {offsets = [0, 256], sizes = [8, 128], strides = [1, 1]} : vector<8x384xf32> to vector<8x128xf32>
      %89 = arith.addf %88, %17 : vector<8x128xf32>
      %90 = vector.extract_strided_slice %69 {offsets = [0, 256], sizes = [8, 128], strides = [1, 1]} : vector<8x384xf32> to vector<8x128xf32>
      %91 = arith.addf %90, %20 : vector<8x128xf32>
      %92 = arith.mulf %78, %91 : vector<8x128xf32>
      %93 = arith.addf %89, %92 : vector<8x128xf32>
      %94 = math.tanh %93 : vector<8x128xf32>
      %cst_43 = arith.constant 1.000000e+00 : f32
      %95 = vector.broadcast %cst_43 : f32 to vector<8x128xf32>
      %96 = arith.subf %95, %87 : vector<8x128xf32>
      %97 = arith.mulf %96, %94 : vector<8x128xf32>
      %98 = arith.mulf %87, %64 : vector<8x128xf32>
      %99 = arith.addf %97, %98 : vector<8x128xf32>
      %c0_44 = arith.constant 0 : index
      %c0_45 = arith.constant 0 : index
      %100 = vector.load %arg18[%c0_44, %c0_45] : memref<8x128xf32, #tpu.memory_space<vmem>>, vector<8x128xf32>
      tpu.vector_store %arg18[%c0_44, %c0_45], %99 {strides = array<i32>} : memref<8x128xf32, #tpu.memory_space<vmem>>, vector<8x128xf32>,
      %101 = arith.truncf %99 : vector<8x128xf32> to vector<8x128xbf16>
      %c0_46 = arith.constant 0 : index
      %c0_47 = arith.constant 0 : index
      %102 = vector.load %arg17[%c0_46, %c0_47] : memref<128x128xbf16, #tpu.memory_space<vmem>>, vector<128x128xbf16>
      %cst_48 = arith.constant dense<0.000000e+00> : vector<8x128xf32>
      %103 = tpu.matmul %101, %102, %cst_48 {dimension_numbers = #tpu.dot_dimension_numbers<[1], [0], [0], [1], [0, 0, 1, 1], [], []>} : vector<8x128xbf16>, vector<128x128xbf16>, vector<8x128xf32> -> vector<8x128xf32>
      %104 = arith.truncf %103 : vector<8x128xf32> to vector<8x128xbf16>
      %105 = arith.index_cast %c3_i32 : i32 to index
      %c0_49 = arith.constant 0 : index
      %c0_50 = arith.constant 0 : index
      %106 = vector.load %arg9[%105, %c0_49, %c0_50] : memref<8x8x128xbf16, #tpu.memory_space<vmem>>, vector<1x8x128xbf16>
      %107 = vector.shape_cast %106 : vector<1x8x128xbf16> to vector<8x128xbf16>
      %108 = vector.shape_cast %104 : vector<8x128xbf16> to vector<1x8x128xbf16>
      tpu.vector_store %arg9[%105, %c0_49, %c0_50], %108 {strides = array<i32>} : memref<8x8x128xbf16, #tpu.memory_space<vmem>>, vector<1x8x128xbf16>,
      %109 = vector.broadcast %8 : vector<1x128xf32> to vector<8x128xf32>
      %110 = arith.addf %103, %109 : vector<8x128xf32>
      %cst_51 = arith.constant dense<0xFF800000> : vector<8xf32>
      %111 = vector.multi_reduction <maximumf>, %110, %cst_51 [1] : vector<8x128xf32> to vector<8xf32>
      %112 = vector.shape_cast %111 : vector<8xf32> to vector<8x1xf32>
      %113 = vector.broadcast %112 : vector<8x1xf32> to vector<8x128xf32>
      %114 = arith.cmpf oeq, %110, %113 : vector<8x128xf32>
      %c128_i32 = arith.constant 128 : i32
      %115 = vector.shape_cast %3 : vector<1x128xi32> to vector<1x128xi32>
      %116 = vector.broadcast %115 : vector<1x128xi32> to vector<8x128xi32>
      %117 = vector.broadcast %c128_i32 : i32 to vector<8x128xi32>
      %118 = arith.select %114, %116, %117 : vector<8x128xi1>, vector<8x128xi32>
      %cst_52 = arith.constant dense<2147483647> : vector<8xi32>
      %119 = vector.multi_reduction <minsi>, %118, %cst_52 [1] : vector<8x128xi32> to vector<8xi32>
      %120 = vector.shape_cast %119 : vector<8xi32> to vector<8x1xi32>
      %121 = arith.index_cast %37 : i32 to index
      %c0_53 = arith.constant 0 : index
      %c0_54 = arith.constant 0 : index
      %122 = vector.load %arg10[%121, %c0_53, %c0_54] : memref<8x8x1xi32, #tpu.memory_space<vmem>>, vector<1x8x1xi32>
      %123 = vector.shape_cast %122 : vector<1x8x1xi32> to vector<8x1xi32>
      %124 = vector.shape_cast %120 : vector<8x1xi32> to vector<1x8x1xi32>
      tpu.vector_store %arg10[%121, %c0_53, %c0_54], %124 {strides = array<i32>} : memref<8x8x1xi32, #tpu.memory_space<vmem>>, vector<1x8x1xi32>,
    } else {
    }
    %c4_i32 = arith.constant 4 : i32
    %c8_i32_18 = arith.constant 8 : i32
    %41 = arith.muli %arg0, %c8_i32_18 : i32
    %42 = arith.addi %41, %c4_i32 : i32
    %c8_i32_19 = arith.constant 8 : i32
    %43 = arith.cmpi slt, %42, %c8_i32_19 : i32
    %44 = arith.extui %43 : i1 to i32
    %c0_i32_20 = arith.constant 0 : i32
    %45 = arith.cmpi ne, %44, %c0_i32_20 : i32
    scf.if %45 {
      %61 = arith.index_cast %c4_i32 : i32 to index
      %c0_31 = arith.constant 0 : index
      %c0_32 = arith.constant 0 : index
      %62 = vector.load %arg8[%61, %c0_31, %c0_32] : memref<8x8x128xbf16, #tpu.memory_space<vmem>>, vector<1x8x128xbf16>
      %63 = vector.shape_cast %62 : vector<1x8x128xbf16> to vector<8x128xbf16>
      %c0_33 = arith.constant 0 : index
      %c0_34 = arith.constant 0 : index
      %64 = vector.load %arg18[%c0_33, %c0_34] : memref<8x128xf32, #tpu.memory_space<vmem>>, vector<8x128xf32>
      %c0_35 = arith.constant 0 : index
      %c0_36 = arith.constant 0 : index
      %65 = vector.load %arg15[%c0_35, %c0_36] : memref<128x384xbf16, #tpu.memory_space<vmem>>, vector<128x384xbf16>
      %cst_37 = arith.constant dense<0.000000e+00> : vector<8x384xf32>
      %66 = tpu.matmul %63, %65, %cst_37 {dimension_numbers = #tpu.dot_dimension_numbers<[1], [0], [0], [1], [0, 0, 1, 1], [], []>} : vector<8x128xbf16>, vector<128x384xbf16>, vector<8x384xf32> -> vector<8x384xf32>
      %67 = arith.truncf %64 : vector<8x128xf32> to vector<8x128xbf16>
      %c0_38 = arith.constant 0 : index
      %c0_39 = arith.constant 0 : index
      %68 = vector.load %arg16[%c0_38, %c0_39] : memref<128x384xbf16, #tpu.memory_space<vmem>>, vector<128x384xbf16>
      %cst_40 = arith.constant dense<0.000000e+00> : vector<8x384xf32>
      %69 = tpu.matmul %67, %68, %cst_40 {dimension_numbers = #tpu.dot_dimension_numbers<[1], [0], [0], [1], [0, 0, 1, 1], [], []>} : vector<8x128xbf16>, vector<128x384xbf16>, vector<8x384xf32> -> vector<8x384xf32>
      %70 = vector.extract_strided_slice %66 {offsets = [0, 0], sizes = [8, 128], strides = [1, 1]} : vector<8x384xf32> to vector<8x128xf32>
      %71 = vector.extract_strided_slice %69 {offsets = [0, 0], sizes = [8, 128], strides = [1, 1]} : vector<8x384xf32> to vector<8x128xf32>
      %72 = arith.addf %70, %71 : vector<8x128xf32>
      %73 = arith.addf %72, %11 : vector<8x128xf32>
      %74 = arith.negf %73 : vector<8x128xf32>
      %75 = math.exp %74 : vector<8x128xf32>
      %cst_41 = arith.constant 1.000000e+00 : f32
      %76 = vector.broadcast %cst_41 : f32 to vector<8x128xf32>
      %77 = arith.addf %76, %75 : vector<8x128xf32>
      %78 = arith.divf %76, %77 : vector<8x128xf32>
      %79 = vector.extract_strided_slice %66 {offsets = [0, 128], sizes = [8, 128], strides = [1, 1]} : vector<8x384xf32> to vector<8x128xf32>
      %80 = vector.extract_strided_slice %69 {offsets = [0, 128], sizes = [8, 128], strides = [1, 1]} : vector<8x384xf32> to vector<8x128xf32>
      %81 = arith.addf %79, %80 : vector<8x128xf32>
      %82 = arith.addf %81, %14 : vector<8x128xf32>
      %83 = arith.negf %82 : vector<8x128xf32>
      %84 = math.exp %83 : vector<8x128xf32>
      %cst_42 = arith.constant 1.000000e+00 : f32
      %85 = vector.broadcast %cst_42 : f32 to vector<8x128xf32>
      %86 = arith.addf %85, %84 : vector<8x128xf32>
      %87 = arith.divf %85, %86 : vector<8x128xf32>
      %88 = vector.extract_strided_slice %66 {offsets = [0, 256], sizes = [8, 128], strides = [1, 1]} : vector<8x384xf32> to vector<8x128xf32>
      %89 = arith.addf %88, %17 : vector<8x128xf32>
      %90 = vector.extract_strided_slice %69 {offsets = [0, 256], sizes = [8, 128], strides = [1, 1]} : vector<8x384xf32> to vector<8x128xf32>
      %91 = arith.addf %90, %20 : vector<8x128xf32>
      %92 = arith.mulf %78, %91 : vector<8x128xf32>
      %93 = arith.addf %89, %92 : vector<8x128xf32>
      %94 = math.tanh %93 : vector<8x128xf32>
      %cst_43 = arith.constant 1.000000e+00 : f32
      %95 = vector.broadcast %cst_43 : f32 to vector<8x128xf32>
      %96 = arith.subf %95, %87 : vector<8x128xf32>
      %97 = arith.mulf %96, %94 : vector<8x128xf32>
      %98 = arith.mulf %87, %64 : vector<8x128xf32>
      %99 = arith.addf %97, %98 : vector<8x128xf32>
      %c0_44 = arith.constant 0 : index
      %c0_45 = arith.constant 0 : index
      %100 = vector.load %arg18[%c0_44, %c0_45] : memref<8x128xf32, #tpu.memory_space<vmem>>, vector<8x128xf32>
      tpu.vector_store %arg18[%c0_44, %c0_45], %99 {strides = array<i32>} : memref<8x128xf32, #tpu.memory_space<vmem>>, vector<8x128xf32>,
      %101 = arith.truncf %99 : vector<8x128xf32> to vector<8x128xbf16>
      %c0_46 = arith.constant 0 : index
      %c0_47 = arith.constant 0 : index
      %102 = vector.load %arg17[%c0_46, %c0_47] : memref<128x128xbf16, #tpu.memory_space<vmem>>, vector<128x128xbf16>
      %cst_48 = arith.constant dense<0.000000e+00> : vector<8x128xf32>
      %103 = tpu.matmul %101, %102, %cst_48 {dimension_numbers = #tpu.dot_dimension_numbers<[1], [0], [0], [1], [0, 0, 1, 1], [], []>} : vector<8x128xbf16>, vector<128x128xbf16>, vector<8x128xf32> -> vector<8x128xf32>
      %104 = arith.truncf %103 : vector<8x128xf32> to vector<8x128xbf16>
      %105 = arith.index_cast %c4_i32 : i32 to index
      %c0_49 = arith.constant 0 : index
      %c0_50 = arith.constant 0 : index
      %106 = vector.load %arg9[%105, %c0_49, %c0_50] : memref<8x8x128xbf16, #tpu.memory_space<vmem>>, vector<1x8x128xbf16>
      %107 = vector.shape_cast %106 : vector<1x8x128xbf16> to vector<8x128xbf16>
      %108 = vector.shape_cast %104 : vector<8x128xbf16> to vector<1x8x128xbf16>
      tpu.vector_store %arg9[%105, %c0_49, %c0_50], %108 {strides = array<i32>} : memref<8x8x128xbf16, #tpu.memory_space<vmem>>, vector<1x8x128xbf16>,
      %109 = vector.broadcast %8 : vector<1x128xf32> to vector<8x128xf32>
      %110 = arith.addf %103, %109 : vector<8x128xf32>
      %cst_51 = arith.constant dense<0xFF800000> : vector<8xf32>
      %111 = vector.multi_reduction <maximumf>, %110, %cst_51 [1] : vector<8x128xf32> to vector<8xf32>
      %112 = vector.shape_cast %111 : vector<8xf32> to vector<8x1xf32>
      %113 = vector.broadcast %112 : vector<8x1xf32> to vector<8x128xf32>
      %114 = arith.cmpf oeq, %110, %113 : vector<8x128xf32>
      %c128_i32 = arith.constant 128 : i32
      %115 = vector.shape_cast %3 : vector<1x128xi32> to vector<1x128xi32>
      %116 = vector.broadcast %115 : vector<1x128xi32> to vector<8x128xi32>
      %117 = vector.broadcast %c128_i32 : i32 to vector<8x128xi32>
      %118 = arith.select %114, %116, %117 : vector<8x128xi1>, vector<8x128xi32>
      %cst_52 = arith.constant dense<2147483647> : vector<8xi32>
      %119 = vector.multi_reduction <minsi>, %118, %cst_52 [1] : vector<8x128xi32> to vector<8xi32>
      %120 = vector.shape_cast %119 : vector<8xi32> to vector<8x1xi32>
      %121 = arith.index_cast %42 : i32 to index
      %c0_53 = arith.constant 0 : index
      %c0_54 = arith.constant 0 : index
      %122 = vector.load %arg10[%121, %c0_53, %c0_54] : memref<8x8x1xi32, #tpu.memory_space<vmem>>, vector<1x8x1xi32>
      %123 = vector.shape_cast %122 : vector<1x8x1xi32> to vector<8x1xi32>
      %124 = vector.shape_cast %120 : vector<8x1xi32> to vector<1x8x1xi32>
      tpu.vector_store %arg10[%121, %c0_53, %c0_54], %124 {strides = array<i32>} : memref<8x8x1xi32, #tpu.memory_space<vmem>>, vector<1x8x1xi32>,
    } else {
    }
    %c5_i32 = arith.constant 5 : i32
    %c8_i32_21 = arith.constant 8 : i32
    %46 = arith.muli %arg0, %c8_i32_21 : i32
    %47 = arith.addi %46, %c5_i32 : i32
    %c8_i32_22 = arith.constant 8 : i32
    %48 = arith.cmpi slt, %47, %c8_i32_22 : i32
    %49 = arith.extui %48 : i1 to i32
    %c0_i32_23 = arith.constant 0 : i32
    %50 = arith.cmpi ne, %49, %c0_i32_23 : i32
    scf.if %50 {
      %61 = arith.index_cast %c5_i32 : i32 to index
      %c0_31 = arith.constant 0 : index
      %c0_32 = arith.constant 0 : index
      %62 = vector.load %arg8[%61, %c0_31, %c0_32] : memref<8x8x128xbf16, #tpu.memory_space<vmem>>, vector<1x8x128xbf16>
      %63 = vector.shape_cast %62 : vector<1x8x128xbf16> to vector<8x128xbf16>
      %c0_33 = arith.constant 0 : index
      %c0_34 = arith.constant 0 : index
      %64 = vector.load %arg18[%c0_33, %c0_34] : memref<8x128xf32, #tpu.memory_space<vmem>>, vector<8x128xf32>
      %c0_35 = arith.constant 0 : index
      %c0_36 = arith.constant 0 : index
      %65 = vector.load %arg15[%c0_35, %c0_36] : memref<128x384xbf16, #tpu.memory_space<vmem>>, vector<128x384xbf16>
      %cst_37 = arith.constant dense<0.000000e+00> : vector<8x384xf32>
      %66 = tpu.matmul %63, %65, %cst_37 {dimension_numbers = #tpu.dot_dimension_numbers<[1], [0], [0], [1], [0, 0, 1, 1], [], []>} : vector<8x128xbf16>, vector<128x384xbf16>, vector<8x384xf32> -> vector<8x384xf32>
      %67 = arith.truncf %64 : vector<8x128xf32> to vector<8x128xbf16>
      %c0_38 = arith.constant 0 : index
      %c0_39 = arith.constant 0 : index
      %68 = vector.load %arg16[%c0_38, %c0_39] : memref<128x384xbf16, #tpu.memory_space<vmem>>, vector<128x384xbf16>
      %cst_40 = arith.constant dense<0.000000e+00> : vector<8x384xf32>
      %69 = tpu.matmul %67, %68, %cst_40 {dimension_numbers = #tpu.dot_dimension_numbers<[1], [0], [0], [1], [0, 0, 1, 1], [], []>} : vector<8x128xbf16>, vector<128x384xbf16>, vector<8x384xf32> -> vector<8x384xf32>
      %70 = vector.extract_strided_slice %66 {offsets = [0, 0], sizes = [8, 128], strides = [1, 1]} : vector<8x384xf32> to vector<8x128xf32>
      %71 = vector.extract_strided_slice %69 {offsets = [0, 0], sizes = [8, 128], strides = [1, 1]} : vector<8x384xf32> to vector<8x128xf32>
      %72 = arith.addf %70, %71 : vector<8x128xf32>
      %73 = arith.addf %72, %11 : vector<8x128xf32>
      %74 = arith.negf %73 : vector<8x128xf32>
      %75 = math.exp %74 : vector<8x128xf32>
      %cst_41 = arith.constant 1.000000e+00 : f32
      %76 = vector.broadcast %cst_41 : f32 to vector<8x128xf32>
      %77 = arith.addf %76, %75 : vector<8x128xf32>
      %78 = arith.divf %76, %77 : vector<8x128xf32>
      %79 = vector.extract_strided_slice %66 {offsets = [0, 128], sizes = [8, 128], strides = [1, 1]} : vector<8x384xf32> to vector<8x128xf32>
      %80 = vector.extract_strided_slice %69 {offsets = [0, 128], sizes = [8, 128], strides = [1, 1]} : vector<8x384xf32> to vector<8x128xf32>
      %81 = arith.addf %79, %80 : vector<8x128xf32>
      %82 = arith.addf %81, %14 : vector<8x128xf32>
      %83 = arith.negf %82 : vector<8x128xf32>
      %84 = math.exp %83 : vector<8x128xf32>
      %cst_42 = arith.constant 1.000000e+00 : f32
      %85 = vector.broadcast %cst_42 : f32 to vector<8x128xf32>
      %86 = arith.addf %85, %84 : vector<8x128xf32>
      %87 = arith.divf %85, %86 : vector<8x128xf32>
      %88 = vector.extract_strided_slice %66 {offsets = [0, 256], sizes = [8, 128], strides = [1, 1]} : vector<8x384xf32> to vector<8x128xf32>
      %89 = arith.addf %88, %17 : vector<8x128xf32>
      %90 = vector.extract_strided_slice %69 {offsets = [0, 256], sizes = [8, 128], strides = [1, 1]} : vector<8x384xf32> to vector<8x128xf32>
      %91 = arith.addf %90, %20 : vector<8x128xf32>
      %92 = arith.mulf %78, %91 : vector<8x128xf32>
      %93 = arith.addf %89, %92 : vector<8x128xf32>
      %94 = math.tanh %93 : vector<8x128xf32>
      %cst_43 = arith.constant 1.000000e+00 : f32
      %95 = vector.broadcast %cst_43 : f32 to vector<8x128xf32>
      %96 = arith.subf %95, %87 : vector<8x128xf32>
      %97 = arith.mulf %96, %94 : vector<8x128xf32>
      %98 = arith.mulf %87, %64 : vector<8x128xf32>
      %99 = arith.addf %97, %98 : vector<8x128xf32>
      %c0_44 = arith.constant 0 : index
      %c0_45 = arith.constant 0 : index
      %100 = vector.load %arg18[%c0_44, %c0_45] : memref<8x128xf32, #tpu.memory_space<vmem>>, vector<8x128xf32>
      tpu.vector_store %arg18[%c0_44, %c0_45], %99 {strides = array<i32>} : memref<8x128xf32, #tpu.memory_space<vmem>>, vector<8x128xf32>,
      %101 = arith.truncf %99 : vector<8x128xf32> to vector<8x128xbf16>
      %c0_46 = arith.constant 0 : index
      %c0_47 = arith.constant 0 : index
      %102 = vector.load %arg17[%c0_46, %c0_47] : memref<128x128xbf16, #tpu.memory_space<vmem>>, vector<128x128xbf16>
      %cst_48 = arith.constant dense<0.000000e+00> : vector<8x128xf32>
      %103 = tpu.matmul %101, %102, %cst_48 {dimension_numbers = #tpu.dot_dimension_numbers<[1], [0], [0], [1], [0, 0, 1, 1], [], []>} : vector<8x128xbf16>, vector<128x128xbf16>, vector<8x128xf32> -> vector<8x128xf32>
      %104 = arith.truncf %103 : vector<8x128xf32> to vector<8x128xbf16>
      %105 = arith.index_cast %c5_i32 : i32 to index
      %c0_49 = arith.constant 0 : index
      %c0_50 = arith.constant 0 : index
      %106 = vector.load %arg9[%105, %c0_49, %c0_50] : memref<8x8x128xbf16, #tpu.memory_space<vmem>>, vector<1x8x128xbf16>
      %107 = vector.shape_cast %106 : vector<1x8x128xbf16> to vector<8x128xbf16>
      %108 = vector.shape_cast %104 : vector<8x128xbf16> to vector<1x8x128xbf16>
      tpu.vector_store %arg9[%105, %c0_49, %c0_50], %108 {strides = array<i32>} : memref<8x8x128xbf16, #tpu.memory_space<vmem>>, vector<1x8x128xbf16>,
      %109 = vector.broadcast %8 : vector<1x128xf32> to vector<8x128xf32>
      %110 = arith.addf %103, %109 : vector<8x128xf32>
      %cst_51 = arith.constant dense<0xFF800000> : vector<8xf32>
      %111 = vector.multi_reduction <maximumf>, %110, %cst_51 [1] : vector<8x128xf32> to vector<8xf32>
      %112 = vector.shape_cast %111 : vector<8xf32> to vector<8x1xf32>
      %113 = vector.broadcast %112 : vector<8x1xf32> to vector<8x128xf32>
      %114 = arith.cmpf oeq, %110, %113 : vector<8x128xf32>
      %c128_i32 = arith.constant 128 : i32
      %115 = vector.shape_cast %3 : vector<1x128xi32> to vector<1x128xi32>
      %116 = vector.broadcast %115 : vector<1x128xi32> to vector<8x128xi32>
      %117 = vector.broadcast %c128_i32 : i32 to vector<8x128xi32>
      %118 = arith.select %114, %116, %117 : vector<8x128xi1>, vector<8x128xi32>
      %cst_52 = arith.constant dense<2147483647> : vector<8xi32>
      %119 = vector.multi_reduction <minsi>, %118, %cst_52 [1] : vector<8x128xi32> to vector<8xi32>
      %120 = vector.shape_cast %119 : vector<8xi32> to vector<8x1xi32>
      %121 = arith.index_cast %47 : i32 to index
      %c0_53 = arith.constant 0 : index
      %c0_54 = arith.constant 0 : index
      %122 = vector.load %arg10[%121, %c0_53, %c0_54] : memref<8x8x1xi32, #tpu.memory_space<vmem>>, vector<1x8x1xi32>
      %123 = vector.shape_cast %122 : vector<1x8x1xi32> to vector<8x1xi32>
      %124 = vector.shape_cast %120 : vector<8x1xi32> to vector<1x8x1xi32>
      tpu.vector_store %arg10[%121, %c0_53, %c0_54], %124 {strides = array<i32>} : memref<8x8x1xi32, #tpu.memory_space<vmem>>, vector<1x8x1xi32>,
    } else {
    }
    %c6_i32 = arith.constant 6 : i32
    %c8_i32_24 = arith.constant 8 : i32
    %51 = arith.muli %arg0, %c8_i32_24 : i32
    %52 = arith.addi %51, %c6_i32 : i32
    %c8_i32_25 = arith.constant 8 : i32
    %53 = arith.cmpi slt, %52, %c8_i32_25 : i32
    %54 = arith.extui %53 : i1 to i32
    %c0_i32_26 = arith.constant 0 : i32
    %55 = arith.cmpi ne, %54, %c0_i32_26 : i32
    scf.if %55 {
      %61 = arith.index_cast %c6_i32 : i32 to index
      %c0_31 = arith.constant 0 : index
      %c0_32 = arith.constant 0 : index
      %62 = vector.load %arg8[%61, %c0_31, %c0_32] : memref<8x8x128xbf16, #tpu.memory_space<vmem>>, vector<1x8x128xbf16>
      %63 = vector.shape_cast %62 : vector<1x8x128xbf16> to vector<8x128xbf16>
      %c0_33 = arith.constant 0 : index
      %c0_34 = arith.constant 0 : index
      %64 = vector.load %arg18[%c0_33, %c0_34] : memref<8x128xf32, #tpu.memory_space<vmem>>, vector<8x128xf32>
      %c0_35 = arith.constant 0 : index
      %c0_36 = arith.constant 0 : index
      %65 = vector.load %arg15[%c0_35, %c0_36] : memref<128x384xbf16, #tpu.memory_space<vmem>>, vector<128x384xbf16>
      %cst_37 = arith.constant dense<0.000000e+00> : vector<8x384xf32>
      %66 = tpu.matmul %63, %65, %cst_37 {dimension_numbers = #tpu.dot_dimension_numbers<[1], [0], [0], [1], [0, 0, 1, 1], [], []>} : vector<8x128xbf16>, vector<128x384xbf16>, vector<8x384xf32> -> vector<8x384xf32>
      %67 = arith.truncf %64 : vector<8x128xf32> to vector<8x128xbf16>
      %c0_38 = arith.constant 0 : index
      %c0_39 = arith.constant 0 : index
      %68 = vector.load %arg16[%c0_38, %c0_39] : memref<128x384xbf16, #tpu.memory_space<vmem>>, vector<128x384xbf16>
      %cst_40 = arith.constant dense<0.000000e+00> : vector<8x384xf32>
      %69 = tpu.matmul %67, %68, %cst_40 {dimension_numbers = #tpu.dot_dimension_numbers<[1], [0], [0], [1], [0, 0, 1, 1], [], []>} : vector<8x128xbf16>, vector<128x384xbf16>, vector<8x384xf32> -> vector<8x384xf32>
      %70 = vector.extract_strided_slice %66 {offsets = [0, 0], sizes = [8, 128], strides = [1, 1]} : vector<8x384xf32> to vector<8x128xf32>
      %71 = vector.extract_strided_slice %69 {offsets = [0, 0], sizes = [8, 128], strides = [1, 1]} : vector<8x384xf32> to vector<8x128xf32>
      %72 = arith.addf %70, %71 : vector<8x128xf32>
      %73 = arith.addf %72, %11 : vector<8x128xf32>
      %74 = arith.negf %73 : vector<8x128xf32>
      %75 = math.exp %74 : vector<8x128xf32>
      %cst_41 = arith.constant 1.000000e+00 : f32
      %76 = vector.broadcast %cst_41 : f32 to vector<8x128xf32>
      %77 = arith.addf %76, %75 : vector<8x128xf32>
      %78 = arith.divf %76, %77 : vector<8x128xf32>
      %79 = vector.extract_strided_slice %66 {offsets = [0, 128], sizes = [8, 128], strides = [1, 1]} : vector<8x384xf32> to vector<8x128xf32>
      %80 = vector.extract_strided_slice %69 {offsets = [0, 128], sizes = [8, 128], strides = [1, 1]} : vector<8x384xf32> to vector<8x128xf32>
      %81 = arith.addf %79, %80 : vector<8x128xf32>
      %82 = arith.addf %81, %14 : vector<8x128xf32>
      %83 = arith.negf %82 : vector<8x128xf32>
      %84 = math.exp %83 : vector<8x128xf32>
      %cst_42 = arith.constant 1.000000e+00 : f32
      %85 = vector.broadcast %cst_42 : f32 to vector<8x128xf32>
      %86 = arith.addf %85, %84 : vector<8x128xf32>
      %87 = arith.divf %85, %86 : vector<8x128xf32>
      %88 = vector.extract_strided_slice %66 {offsets = [0, 256], sizes = [8, 128], strides = [1, 1]} : vector<8x384xf32> to vector<8x128xf32>
      %89 = arith.addf %88, %17 : vector<8x128xf32>
      %90 = vector.extract_strided_slice %69 {offsets = [0, 256], sizes = [8, 128], strides = [1, 1]} : vector<8x384xf32> to vector<8x128xf32>
      %91 = arith.addf %90, %20 : vector<8x128xf32>
      %92 = arith.mulf %78, %91 : vector<8x128xf32>
      %93 = arith.addf %89, %92 : vector<8x128xf32>
      %94 = math.tanh %93 : vector<8x128xf32>
      %cst_43 = arith.constant 1.000000e+00 : f32
      %95 = vector.broadcast %cst_43 : f32 to vector<8x128xf32>
      %96 = arith.subf %95, %87 : vector<8x128xf32>
      %97 = arith.mulf %96, %94 : vector<8x128xf32>
      %98 = arith.mulf %87, %64 : vector<8x128xf32>
      %99 = arith.addf %97, %98 : vector<8x128xf32>
      %c0_44 = arith.constant 0 : index
      %c0_45 = arith.constant 0 : index
      %100 = vector.load %arg18[%c0_44, %c0_45] : memref<8x128xf32, #tpu.memory_space<vmem>>, vector<8x128xf32>
      tpu.vector_store %arg18[%c0_44, %c0_45], %99 {strides = array<i32>} : memref<8x128xf32, #tpu.memory_space<vmem>>, vector<8x128xf32>,
      %101 = arith.truncf %99 : vector<8x128xf32> to vector<8x128xbf16>
      %c0_46 = arith.constant 0 : index
      %c0_47 = arith.constant 0 : index
      %102 = vector.load %arg17[%c0_46, %c0_47] : memref<128x128xbf16, #tpu.memory_space<vmem>>, vector<128x128xbf16>
      %cst_48 = arith.constant dense<0.000000e+00> : vector<8x128xf32>
      %103 = tpu.matmul %101, %102, %cst_48 {dimension_numbers = #tpu.dot_dimension_numbers<[1], [0], [0], [1], [0, 0, 1, 1], [], []>} : vector<8x128xbf16>, vector<128x128xbf16>, vector<8x128xf32> -> vector<8x128xf32>
      %104 = arith.truncf %103 : vector<8x128xf32> to vector<8x128xbf16>
      %105 = arith.index_cast %c6_i32 : i32 to index
      %c0_49 = arith.constant 0 : index
      %c0_50 = arith.constant 0 : index
      %106 = vector.load %arg9[%105, %c0_49, %c0_50] : memref<8x8x128xbf16, #tpu.memory_space<vmem>>, vector<1x8x128xbf16>
      %107 = vector.shape_cast %106 : vector<1x8x128xbf16> to vector<8x128xbf16>
      %108 = vector.shape_cast %104 : vector<8x128xbf16> to vector<1x8x128xbf16>
      tpu.vector_store %arg9[%105, %c0_49, %c0_50], %108 {strides = array<i32>} : memref<8x8x128xbf16, #tpu.memory_space<vmem>>, vector<1x8x128xbf16>,
      %109 = vector.broadcast %8 : vector<1x128xf32> to vector<8x128xf32>
      %110 = arith.addf %103, %109 : vector<8x128xf32>
      %cst_51 = arith.constant dense<0xFF800000> : vector<8xf32>
      %111 = vector.multi_reduction <maximumf>, %110, %cst_51 [1] : vector<8x128xf32> to vector<8xf32>
      %112 = vector.shape_cast %111 : vector<8xf32> to vector<8x1xf32>
      %113 = vector.broadcast %112 : vector<8x1xf32> to vector<8x128xf32>
      %114 = arith.cmpf oeq, %110, %113 : vector<8x128xf32>
      %c128_i32 = arith.constant 128 : i32
      %115 = vector.shape_cast %3 : vector<1x128xi32> to vector<1x128xi32>
      %116 = vector.broadcast %115 : vector<1x128xi32> to vector<8x128xi32>
      %117 = vector.broadcast %c128_i32 : i32 to vector<8x128xi32>
      %118 = arith.select %114, %116, %117 : vector<8x128xi1>, vector<8x128xi32>
      %cst_52 = arith.constant dense<2147483647> : vector<8xi32>
      %119 = vector.multi_reduction <minsi>, %118, %cst_52 [1] : vector<8x128xi32> to vector<8xi32>
      %120 = vector.shape_cast %119 : vector<8xi32> to vector<8x1xi32>
      %121 = arith.index_cast %52 : i32 to index
      %c0_53 = arith.constant 0 : index
      %c0_54 = arith.constant 0 : index
      %122 = vector.load %arg10[%121, %c0_53, %c0_54] : memref<8x8x1xi32, #tpu.memory_space<vmem>>, vector<1x8x1xi32>
      %123 = vector.shape_cast %122 : vector<1x8x1xi32> to vector<8x1xi32>
      %124 = vector.shape_cast %120 : vector<8x1xi32> to vector<1x8x1xi32>
      tpu.vector_store %arg10[%121, %c0_53, %c0_54], %124 {strides = array<i32>} : memref<8x8x1xi32, #tpu.memory_space<vmem>>, vector<1x8x1xi32>,
    } else {
    }
    %c7_i32 = arith.constant 7 : i32
    %c8_i32_27 = arith.constant 8 : i32
    %56 = arith.muli %arg0, %c8_i32_27 : i32
    %57 = arith.addi %56, %c7_i32 : i32
    %c8_i32_28 = arith.constant 8 : i32
    %58 = arith.cmpi slt, %57, %c8_i32_28 : i32
    %59 = arith.extui %58 : i1 to i32
    %c0_i32_29 = arith.constant 0 : i32
    %60 = arith.cmpi ne, %59, %c0_i32_29 : i32
    scf.if %60 {
      %61 = arith.index_cast %c7_i32 : i32 to index
      %c0_31 = arith.constant 0 : index
      %c0_32 = arith.constant 0 : index
      %62 = vector.load %arg8[%61, %c0_31, %c0_32] : memref<8x8x128xbf16, #tpu.memory_space<vmem>>, vector<1x8x128xbf16>
      %63 = vector.shape_cast %62 : vector<1x8x128xbf16> to vector<8x128xbf16>
      %c0_33 = arith.constant 0 : index
      %c0_34 = arith.constant 0 : index
      %64 = vector.load %arg18[%c0_33, %c0_34] : memref<8x128xf32, #tpu.memory_space<vmem>>, vector<8x128xf32>
      %c0_35 = arith.constant 0 : index
      %c0_36 = arith.constant 0 : index
      %65 = vector.load %arg15[%c0_35, %c0_36] : memref<128x384xbf16, #tpu.memory_space<vmem>>, vector<128x384xbf16>
      %cst_37 = arith.constant dense<0.000000e+00> : vector<8x384xf32>
      %66 = tpu.matmul %63, %65, %cst_37 {dimension_numbers = #tpu.dot_dimension_numbers<[1], [0], [0], [1], [0, 0, 1, 1], [], []>} : vector<8x128xbf16>, vector<128x384xbf16>, vector<8x384xf32> -> vector<8x384xf32>
      %67 = arith.truncf %64 : vector<8x128xf32> to vector<8x128xbf16>
      %c0_38 = arith.constant 0 : index
      %c0_39 = arith.constant 0 : index
      %68 = vector.load %arg16[%c0_38, %c0_39] : memref<128x384xbf16, #tpu.memory_space<vmem>>, vector<128x384xbf16>
      %cst_40 = arith.constant dense<0.000000e+00> : vector<8x384xf32>
      %69 = tpu.matmul %67, %68, %cst_40 {dimension_numbers = #tpu.dot_dimension_numbers<[1], [0], [0], [1], [0, 0, 1, 1], [], []>} : vector<8x128xbf16>, vector<128x384xbf16>, vector<8x384xf32> -> vector<8x384xf32>
      %70 = vector.extract_strided_slice %66 {offsets = [0, 0], sizes = [8, 128], strides = [1, 1]} : vector<8x384xf32> to vector<8x128xf32>
      %71 = vector.extract_strided_slice %69 {offsets = [0, 0], sizes = [8, 128], strides = [1, 1]} : vector<8x384xf32> to vector<8x128xf32>
      %72 = arith.addf %70, %71 : vector<8x128xf32>
      %73 = arith.addf %72, %11 : vector<8x128xf32>
      %74 = arith.negf %73 : vector<8x128xf32>
      %75 = math.exp %74 : vector<8x128xf32>
      %cst_41 = arith.constant 1.000000e+00 : f32
      %76 = vector.broadcast %cst_41 : f32 to vector<8x128xf32>
      %77 = arith.addf %76, %75 : vector<8x128xf32>
      %78 = arith.divf %76, %77 : vector<8x128xf32>
      %79 = vector.extract_strided_slice %66 {offsets = [0, 128], sizes = [8, 128], strides = [1, 1]} : vector<8x384xf32> to vector<8x128xf32>
      %80 = vector.extract_strided_slice %69 {offsets = [0, 128], sizes = [8, 128], strides = [1, 1]} : vector<8x384xf32> to vector<8x128xf32>
      %81 = arith.addf %79, %80 : vector<8x128xf32>
      %82 = arith.addf %81, %14 : vector<8x128xf32>
      %83 = arith.negf %82 : vector<8x128xf32>
      %84 = math.exp %83 : vector<8x128xf32>
      %cst_42 = arith.constant 1.000000e+00 : f32
      %85 = vector.broadcast %cst_42 : f32 to vector<8x128xf32>
      %86 = arith.addf %85, %84 : vector<8x128xf32>
      %87 = arith.divf %85, %86 : vector<8x128xf32>
      %88 = vector.extract_strided_slice %66 {offsets = [0, 256], sizes = [8, 128], strides = [1, 1]} : vector<8x384xf32> to vector<8x128xf32>
      %89 = arith.addf %88, %17 : vector<8x128xf32>
      %90 = vector.extract_strided_slice %69 {offsets = [0, 256], sizes = [8, 128], strides = [1, 1]} : vector<8x384xf32> to vector<8x128xf32>
      %91 = arith.addf %90, %20 : vector<8x128xf32>
      %92 = arith.mulf %78, %91 : vector<8x128xf32>
      %93 = arith.addf %89, %92 : vector<8x128xf32>
      %94 = math.tanh %93 : vector<8x128xf32>
      %cst_43 = arith.constant 1.000000e+00 : f32
      %95 = vector.broadcast %cst_43 : f32 to vector<8x128xf32>
      %96 = arith.subf %95, %87 : vector<8x128xf32>
      %97 = arith.mulf %96, %94 : vector<8x128xf32>
      %98 = arith.mulf %87, %64 : vector<8x128xf32>
      %99 = arith.addf %97, %98 : vector<8x128xf32>
      %c0_44 = arith.constant 0 : index
      %c0_45 = arith.constant 0 : index
      %100 = vector.load %arg18[%c0_44, %c0_45] : memref<8x128xf32, #tpu.memory_space<vmem>>, vector<8x128xf32>
      tpu.vector_store %arg18[%c0_44, %c0_45], %99 {strides = array<i32>} : memref<8x128xf32, #tpu.memory_space<vmem>>, vector<8x128xf32>,
      %101 = arith.truncf %99 : vector<8x128xf32> to vector<8x128xbf16>
      %c0_46 = arith.constant 0 : index
      %c0_47 = arith.constant 0 : index
      %102 = vector.load %arg17[%c0_46, %c0_47] : memref<128x128xbf16, #tpu.memory_space<vmem>>, vector<128x128xbf16>
      %cst_48 = arith.constant dense<0.000000e+00> : vector<8x128xf32>
      %103 = tpu.matmul %101, %102, %cst_48 {dimension_numbers = #tpu.dot_dimension_numbers<[1], [0], [0], [1], [0, 0, 1, 1], [], []>} : vector<8x128xbf16>, vector<128x128xbf16>, vector<8x128xf32> -> vector<8x128xf32>
      %104 = arith.truncf %103 : vector<8x128xf32> to vector<8x128xbf16>
      %105 = arith.index_cast %c7_i32 : i32 to index
      %c0_49 = arith.constant 0 : index
      %c0_50 = arith.constant 0 : index
      %106 = vector.load %arg9[%105, %c0_49, %c0_50] : memref<8x8x128xbf16, #tpu.memory_space<vmem>>, vector<1x8x128xbf16>
      %107 = vector.shape_cast %106 : vector<1x8x128xbf16> to vector<8x128xbf16>
      %108 = vector.shape_cast %104 : vector<8x128xbf16> to vector<1x8x128xbf16>
      tpu.vector_store %arg9[%105, %c0_49, %c0_50], %108 {strides = array<i32>} : memref<8x8x128xbf16, #tpu.memory_space<vmem>>, vector<1x8x128xbf16>,
      %109 = vector.broadcast %8 : vector<1x128xf32> to vector<8x128xf32>
      %110 = arith.addf %103, %109 : vector<8x128xf32>
      %cst_51 = arith.constant dense<0xFF800000> : vector<8xf32>
      %111 = vector.multi_reduction <maximumf>, %110, %cst_51 [1] : vector<8x128xf32> to vector<8xf32>
      %112 = vector.shape_cast %111 : vector<8xf32> to vector<8x1xf32>
      %113 = vector.broadcast %112 : vector<8x1xf32> to vector<8x128xf32>
      %114 = arith.cmpf oeq, %110, %113 : vector<8x128xf32>
      %c128_i32 = arith.constant 128 : i32
      %115 = vector.shape_cast %3 : vector<1x128xi32> to vector<1x128xi32>
      %116 = vector.broadcast %115 : vector<1x128xi32> to vector<8x128xi32>
      %117 = vector.broadcast %c128_i32 : i32 to vector<8x128xi32>
      %118 = arith.select %114, %116, %117 : vector<8x128xi1>, vector<8x128xi32>
      %cst_52 = arith.constant dense<2147483647> : vector<8xi32>
      %119 = vector.multi_reduction <minsi>, %118, %cst_52 [1] : vector<8x128xi32> to vector<8xi32>
      %120 = vector.shape_cast %119 : vector<8xi32> to vector<8x1xi32>
      %121 = arith.index_cast %57 : i32 to index
      %c0_53 = arith.constant 0 : index
      %c0_54 = arith.constant 0 : index
      %122 = vector.load %arg10[%121, %c0_53, %c0_54] : memref<8x8x1xi32, #tpu.memory_space<vmem>>, vector<1x8x1xi32>
      %123 = vector.shape_cast %122 : vector<1x8x1xi32> to vector<8x1xi32>
      %124 = vector.shape_cast %120 : vector<8x1xi32> to vector<1x8x1xi32>
      tpu.vector_store %arg10[%121, %c0_53, %c0_54], %124 {strides = array<i32>} : memref<8x8x1xi32, #tpu.memory_space<vmem>>, vector<1x8x1xi32>,
    } else {
    }
    %c8_i32_30 = arith.constant 8 : i32
    return
  }
  func.func @transform_7(%arg0: i32) -> (i32, i32, i32) {
    %c0_i32 = arith.constant 0 : i32
    %c0_i32_0 = arith.constant 0 : i32
    %c0_i32_1 = arith.constant 0 : i32
    return %arg0, %c0_i32, %c0_i32_0 : i32, i32, i32
  }
  func.func @transform_8(%arg0: i32) -> (i32, i32, i32) {
    %c0_i32 = arith.constant 0 : i32
    %c0_i32_0 = arith.constant 0 : i32
    %c0_i32_1 = arith.constant 0 : i32
    return %arg0, %c0_i32, %c0_i32_0 : i32, i32, i32
  }
  func.func @transform_9(%arg0: i32) -> (i32, i32, i32) {
    %c0_i32 = arith.constant 0 : i32
    %c0_i32_0 = arith.constant 0 : i32
    %c0_i32_1 = arith.constant 0 : i32
    %c0_i32_2 = arith.constant 0 : i32
    return %c0_i32, %c0_i32_0, %c0_i32_1 : i32, i32, i32
  }
}

</mosaic_0001>

<bundles_post_ra>
// kernel: tpu_custom_call.1
= control target key start
LH: loop header
LB: loop body
LE: loop exit
PB: predicated region body
PF: predicated region fallthrough
CT: control target
= control target key end

     0   :  { %15 = vsyncpa [#allocation12], 0  ;;  %s5426_s0 = inlined_call_operand.hbm [shape: bf16[8,128], index: 0, kind: input, shape index: {}]   ;;  %s5427_s1 = inlined_call_operand.hbm [shape: bf16[128,128], index: 1, kind: input, shape index: {}]   ;;  %s5428_s2 = inlined_call_operand.vmem [shape: f32[1,128], index: 2, kind: input, shape index: {}]   ;;  %s5429_s3 = inlined_call_operand.vmem [shape: f32[4,128], index: 3, kind: input, shape index: {}]   ;;  %s5430_s4 = inlined_call_operand.hbm [shape: bf16[128,384], index: 4, kind: input, shape index: {}]   ;;  %s5431_s5 = inlined_call_operand.hbm [shape: bf16[128,384], index: 5, kind: input, shape index: {}]   ;;  %s5432_s6 = inlined_call_operand.hbm [shape: bf16[128,128], index: 6, kind: input, shape index: {}]   ;;  %s5433_s7 = inlined_call_operand.hbm [shape: bf16[8,8,128], index: 7, kind: input, shape index: {}]   ;;  %s5434_s8 = inlined_call_operand.hbm [shape: bf16[8,8,128], index: 8, kind: output, shape index: {0}]   ;;  %s5435_s9 = inlined_call_operand.vmem [shape: s32[8,8,1], index: 9, kind: output, shape index: {1}]  }
   0x1   :  { %16 = vsyncpa [#allocation13], 0  ;;  %s3991_s30 = smov [#allocation11]   ;;  %s3863_s13 = scalar_lea.hbm %s5433_s7, 512 }
   0x2   :  { %s22_s10 = sshll.u32 %s3991_s30, 4  ;;  %p3864_p0 = scmp.ne.s32.totalorder %s5433_s7, %s3863_s13  ;;  %s23_s10 = int_to_ptr.vmem [resolvable:$true] %s22_s10 }
   0x3   :  { %p3867_p1 = scmp.lt.u32.totalorder %s3863_s13, %s5433_s7 }
   0x5   :  { %p3869_p2 = pnand %p3867_p1, %p3864_p0 }
   0x7   :  { %3872 = shalt.err (!%p3869_p2)
}
   0x8   :  { %s3873_s18 = scalar_lea.vmem %s23_s10, 512  ;;  %p3878_p4 = scmp.lt.s32.totalorder %s23_s10, %s23_s10 }
   0x9   :  { %p3874_p3 = scmp.ne.s32.totalorder %s23_s10, %s3873_s18  ;;  %p3879_p5 = scmp.lt.s32.totalorder %s3873_s18, %s3873_s18 }
   0xb   :  { %p3880_p6 = por %p3879_p5, %p3878_p4 }
   0xd   :  { %p3881_p7 = pnand %p3880_p6, %p3874_p3 }
   0xf   :  { %3884 = shalt.err (!%p3881_p7)
}
  0x10   :  { %s3992_s19 = smov 64   ;;  %s3993_s20 = smov 4  }
  0x11   :  { %28 = dma.hbm_to_vmem [thread:$0]  %s5433_s7, 512, %s23_s10, [#allocation12], %s3992_s19, %s3992_s19, %s3993_s20  }
  0x12   :  { %3973 = dma.done.wait [#allocation12], 512  }
  0x13   :  { %3974 = vsyncadd [#allocation12], 4294966784 }
  0x14   :  { %s53_s23 = sld [smem:[#allocation0]]   ;;  %s3994_s24 = smov [#allocation8]  }
  0x15   :  { %s44_s25 = sshll.u32 %s3994_s24, 4  ;;  %s3995_s26 = smov [#allocation6]   ;;  %s45_s25 = int_to_ptr.vmem [resolvable:$true] %s44_s25 }
  0x16   :  { %s4082_s27 = sshll.u32 %s3995_s26, 4  ;;  %s3885_s30 = scalar_lea.hbm %s5432_s6, 1024  ;;  %s62_s27 = int_to_ptr.vmem [resolvable:$true] %s4082_s27 }
  0x17   :  { %p3886_p8 = scmp.ne.s32.totalorder %s5432_s6, %s3885_s30  ;;  %p3889_p9 = scmp.lt.u32.totalorder %s3885_s30, %s5432_s6 }
  0x19   :  { %p3891_p10 = pnand %p3889_p9, %p3886_p8 }
  0x1b   :  { %3894 = shalt.err (!%p3891_p10)  }
  0x1c   :  { %s3895_s7 = scalar_lea.vmem %s45_s25, 1024  ;;  %p3900_p12 = scmp.lt.s32.totalorder %s45_s25, %s45_s25 }
  0x1d   :  { %p3896_p11 = scmp.ne.s32.totalorder %s45_s25, %s3895_s7  ;;  %p3901_p13 = scmp.lt.s32.totalorder %s3895_s7, %s3895_s7 }
  0x1f   :  { %p3902_p0 = por %p3901_p13, %p3900_p12 }
  0x21   :  { %p3903_p1 = pnand %p3902_p0, %p3896_p11 }
  0x23   :  { %3906 = shalt.err (!%p3903_p1)  }
  0x24   :  { %47 = dma.hbm_to_vmem [thread:$0]  %s5432_s6, 1024, %s45_s25, [#allocation10] }
  0x25   :  { %s3996_s16 = smov 384   ;;  %s2989_s17 = sshll.u32 %s53_s23, 26 }
  0x26   :  { %65 = sst [smem:[#allocation20]] %s3996_s16  ;;  %s4097_s18 = sadd.s32 134217728, %s2989_s17 }
  0x27   :  { %67 = sst [smem:[#allocation20 + $0x1]] %s3996_s16  ;;  %s3997_s21 = smov 3  }
  0x28   :  { %69 = sst [smem:[#allocation20 + $0x2]] %s3997_s21  ;;  %s3998_s22 = smov 64  }
  0x29   :  { %71 = sst [smem:[#allocation20 + $0x3]] %s3998_s22  ;;  %s3999_s24 = smov 128  }
  0x2a   :  { %73 = sst [smem:[#allocation20 + $0x4]] %s3999_s24  ;;  %s4000_s26 = smov 2  }
  0x2b   :  { %75 = sst [smem:[#allocation20 + $0x5]] %s4000_s26  ;;  %s4001_s28 = smov 192  }
  0x2c   :  { %77 = sst [smem:[#allocation20 + $0x6]] %s4001_s28  ;;  %s4002_s6 = smov 4  }
  0x2d   :  { %79 = sst [smem:[#allocation20 + $0x7]] %s3998_s22  ;;  %s4003_s25 = smov [#allocation10 + $0x1]  }
  0x2e   :  { %81 = sst [smem:[#allocation20 + $0x8]] %s4002_s6  ;;  %s4004_s29 = smov [#allocation19]  }
  0x2f   :  { %83 = dma.general %s5430_s4, 3072, %s62_s27, %s4003_s25, %s4004_s29, [#allocation20], %s4097_s18, 0  }
  0x30   :  { %100 = sst [smem:[#allocation22]] %s3996_s16  ;;  %s4005_s11 = smov [#allocation7]  }
  0x31   :  { %102 = sst [smem:[#allocation22 + $0x1]] %s3996_s16  ;;  %s96_s12 = sshll.u32 %s4005_s11, 4  ;;  %s97_s12 = int_to_ptr.vmem [resolvable:$true] %s96_s12 }
  0x32   :  { %104 = sst [smem:[#allocation22 + $0x2]] %s3997_s21  ;;  %s4006_s13 = smov [#allocation10 + $0x2]  }
  0x33   :  { %106 = sst [smem:[#allocation22 + $0x3]] %s3998_s22  ;;  %s4007_s14 = smov [#allocation21]  }
  0x34   :  { %108 = sst [smem:[#allocation22 + $0x4]] %s3999_s24 }
  0x35   :  { %110 = sst [smem:[#allocation22 + $0x5]] %s4000_s26 }
  0x36   :  { %112 = sst [smem:[#allocation22 + $0x6]] %s4001_s28 }
  0x37   :  { %114 = sst [smem:[#allocation22 + $0x7]] %s3998_s22 }
  0x38   :  { %116 = sst [smem:[#allocation22 + $0x8]] %s4002_s6 }
  0x39   :  { %118 = dma.general %s5431_s5, 3072, %s97_s12, %s4006_s13, %s4007_s14, [#allocation22], %s4097_s18, 0  }
  0x3a   :  { %v137_v0 = vld [vmem:[%s5429_s3] sm:$0xf] }
  0x3b   :  { %138 = vst [vmem:[#allocation5] sm:$0xf] %v137_v0 }
  0x3c   :  { %163 = vsyncadd [#allocation10 + $0x3], 64  ;;  %v206_v1 = vld [vmem:[%s5428_s2] sm:$0x1]  ;;  %s4008_s17 = smov [#allocation2]   ;;  %s4009_s22 = smov [#allocation3]  }
  0x3d   :  { %s172_s21 = sshll.u32 %s4008_s17, 4  ;;  %s184_s24 = sshll.u32 %s4009_s22, 4  ;;  %207 = vst [vmem:[#allocation4] sm:$0x1] %v206_v1  ;;  %s173_s21 = int_to_ptr.vmem [resolvable:$true] %s172_s21  ;;  %s185_s24 = int_to_ptr.vmem [resolvable:$true] %s184_s24 }
  0x3e   :  { %s3907_s5 = scalar_lea.hbm %s5426_s0, 64 }
  0x3f   :  { %p3908_p2 = scmp.ne.s32.totalorder %s5426_s0, %s3907_s5  ;;  %p3911_p3 = scmp.lt.u32.totalorder %s3907_s5, %s5426_s0 }
  0x41   :  { %p3913_p4 = pnand %p3911_p3, %p3908_p2 }
  0x43   :  { %3916 = shalt.err (!%p3913_p4)  }
  0x44   :  { %s3917_s2 = scalar_lea.vmem %s173_s21, 64  ;;  %p3922_p6 = scmp.lt.s32.totalorder %s173_s21, %s173_s21 }
  0x45   :  { %p3918_p5 = scmp.ne.s32.totalorder %s173_s21, %s3917_s2  ;;  %p3923_p7 = scmp.lt.s32.totalorder %s3917_s2, %s3917_s2 }
  0x47   :  { %p3924_p8 = por %p3923_p7, %p3922_p6 }
  0x49   :  { %p3925_p9 = pnand %p3924_p8, %p3918_p5 }
  0x4b   :  { %3928 = shalt.err (!%p3925_p9)  }
  0x4c   :  { %175 = dma.hbm_to_vmem [thread:$0]  %s5426_s0, 64, %s173_s21, [#allocation10 + $0x4] }
  0x4d   :  { %s3929_s12 = scalar_lea.hbm %s5427_s1, 1024 }
  0x4e   :  { %p3930_p10 = scmp.ne.s32.totalorder %s5427_s1, %s3929_s12  ;;  %p3933_p11 = scmp.lt.u32.totalorder %s3929_s12, %s5427_s1 }
  0x50   :  { %p3935_p12 = pnand %p3933_p11, %p3930_p10 }
  0x52   :  { %3938 = shalt.err (!%p3935_p12)  }
  0x53   :  { %s3939_s15 = scalar_lea.vmem %s185_s24, 1024  ;;  %p3944_p0 = scmp.lt.s32.totalorder %s185_s24, %s185_s24 }
  0x54   :  { %p3940_p13 = scmp.ne.s32.totalorder %s185_s24, %s3939_s15  ;;  %p3945_p1 = scmp.lt.s32.totalorder %s3939_s15, %s3939_s15 }
  0x56   :  { %p3946_p2 = por %p3945_p1, %p3944_p0 }
  0x58   :  { %p3947_p3 = pnand %p3946_p2, %p3940_p13 }
  0x5a   :  { %3950 = shalt.err (!%p3947_p3)  }
  0x5b   :  { %187 = dma.hbm_to_vmem [thread:$0]  %s5427_s1, 1024, %s185_s24, [#allocation10 + $0x5] }
  0x5c   :  { %232 = vsyncadd [#allocation10 + $0x6], 16 }
  0x5d   :  { %3975 = dma.done.wait [#allocation10 + $0x4], 64 }
  0x5e   :  { %3976 = vsyncadd [#allocation10 + $0x4], 4294967232 }
  0x5f   :  { %3977 = dma.done.wait [#allocation10 + $0x5], 1024 }
  0x60   :  { %3978 = vsyncadd [#allocation10 + $0x5], 4294966272 }
  0x61   :  { %3979 = dma.done.wait [#allocation10 + $0x6], 16 }
  0x62   :  { %3980 = vsyncadd [#allocation10 + $0x6], 4294967280  ;;  %v4010_v2 = vmov 0.0   ;;  %vm4011_vm0 = vmmov 0   ;;  %v245_v3 = vld [vmem:[#allocation3] sm:$0xff]  ;;  %v246_v4 = vld [vmem:[#allocation3 + $0x8] sm:$0xff] }
  0x63   :  { %3253 = vmatprep.subr.bf16.mxu0 %v4010_v2  ;;  %3269 = vmatprep.mubr.msk.bf16.mxu0 %vm4011_vm0, %v4010_v2  ;;  %v247_v5 = vld [vmem:[#allocation3 + $0x10] sm:$0xff]  ;;  %v248_v6 = vld [vmem:[#allocation3 + $0x18] sm:$0xff]  ;;  %v249_v7 = vld [vmem:[#allocation3 + $0x20] sm:$0xff] }
  0x64   :  { %3254 = vmatpush3.bf16.msra.mxu0 %v245_v3  ;;  %v250_v8 = vld [vmem:[#allocation3 + $0x28] sm:$0xff]  ;;  %v251_v9 = vld [vmem:[#allocation3 + $0x30] sm:$0xff]  ;;  %v252_v10 = vld [vmem:[#allocation3 + $0x38] sm:$0xff] }
  0x65   :  { %3255 = vmatprep.subr.bf16.mxu0 %v4010_v2  ;;  %v244_v11 = vld [vmem:[#allocation2] sm:$0xf]  ;;  %v2993_v12 = vld [vmem:[#allocation4] ss:$0 sm:$0xff] }
  0x68   :  { %3256 = vmatpush3.bf16.msra.mxu0 %v246_v4 }
  0x69   :  { %3257 = vmatprep.subr.bf16.mxu0 %v4010_v2 }
  0x6c   :  { %3258 = vmatpush3.bf16.msra.mxu0 %v247_v5 }
  0x6d   :  { %3259 = vmatprep.subr.bf16.mxu0 %v4010_v2 }
  0x70   :  { %3260 = vmatpush3.bf16.msra.mxu0 %v248_v6 }
  0x71   :  { %3261 = vmatprep.subr.bf16.mxu0 %v4010_v2 }
  0x74   :  { %3262 = vmatpush3.bf16.msra.mxu0 %v249_v7 }
  0x75   :  { %3263 = vmatprep.subr.bf16.mxu0 %v4010_v2 }
  0x78   :  { %3264 = vmatpush3.bf16.msra.mxu0 %v250_v8 }
  0x79   :  { %3265 = vmatprep.subr.bf16.mxu0 %v4010_v2 }
  0x7c   :  { %3266 = vmatpush3.bf16.msra.mxu0 %v251_v9 }
  0x7d   :  { %3267 = vmatprep.subr.bf16.mxu0 %v4010_v2 }
  0x80   :  { %3268 = vmatpush3.bf16.msra.mxu0 %v252_v10 }
  0x83   :  { %3270 = vmatmul.mubr.bf16.vlgmr.msra.gmra.mrb[0].mxu0 %v244_v11 }
 0x156   :  { %v294_v13 = vpop.f32.mrb[0].mxu0 }
 0x157   :  { %v295_v14 = vadd.f32 %v2993_v12, %v294_v13  ;;  %v3271_v15 = vpop.f32.mrb[1].mxu0 }
 0x158   :  { %v297_v16 = vpop.f32.mrb[2].mxu0 }
 0x159   :  { %v4137_v17 = vmax.f32 %v295_v14, 0.0  ;;  %v3272_v18 = vpop.f32.mrb[3].mxu0 }
 0x15a   :  { %3981 = dma.done.wait [#allocation10], 1024 }
 0x15b   :  { %3982 = vsyncadd [#allocation10], 4294966272 }
 0x15c   :  { %3983 = dma.done.wait [#allocation10 + $0x1], 3072 }
 0x15d   :  { %3984 = vsyncadd [#allocation10 + $0x1], 4294964224 }
 0x15e   :  { %3985 = dma.done.wait [#allocation10 + $0x2], 3072 }
 0x15f   :  { %3986 = vsyncadd [#allocation10 + $0x2], 4294964224 }
 0x160   :  { %3987 = dma.done.wait [#allocation10 + $0x3], 64 }
 0x161   :  { %3988 = vsyncadd [#allocation10 + $0x3], 4294967232  ;;  %v4139_v19 = vld [vmem:[#allocation6 + $0x8] sm:$0xff]  ;;  %v4141_v20 = vld [vmem:[#allocation6] sm:$0xff]  ;;  %v5449_v22 = vmov 0.0   ;;  %v5436_v23 = vmov 0   ;;  %v447_v5 = vpack.c.bf16 %v4137_v17, %v4137_v17 }
 0x162   :  { %v4143_v21 = vld [vmem:[#allocation6 + $0x20] sm:$0xff]  ;;  %366 = vmatprep.subr.bf16.mxu1 %v4139_v19  ;;  %3273 = vmatprep.subr.bf16.mxu0 %v5449_v22  ;;  %v4150_v24 = vld [vmem:[#allocation6 + $0x18] sm:$0xff]  ;;  %vm4014_vm1 = vmmov 0   ;;  %v4156_v26 = vld [vmem:[#allocation6 + $0x10] sm:$0xff]  ;;  %vm651_vm13 = vcmask 7168   ;;  %s4016_s2 = smov [#allocation14]  }
 0x163   :  { %367 = vmatpush1.bf16.msra.mxu1 %v4141_v20  ;;  %398 = vmatprep.mubr.bf16.mxu1 %v5436_v23  ;;  %v4154_v25 = vld [vmem:[#allocation6 + $0x38] sm:$0xff]  ;;  %v4161_v27 = vld [vmem:[#allocation6 + $0x28] sm:$0xff]  ;;  %v4164_v28 = vld [vmem:[#allocation6 + $0x30] sm:$0xff]  ;;  %s2898_s29 = sshll.u32 %s4016_s2, 4  ;;  %s2899_s29 = int_to_ptr.vmem [resolvable:$true] %s2898_s29 }
 0x164   :  { %368 = vmatprep.subr.bf16.mxu1 %v4143_v21  ;;  %3289 = vmatprep.mubr.msk.bf16.mxu0 %vm4014_vm1, %v5449_v22  ;;  %v4166_v29 = vld [vmem:[#allocation6 + $0x50] sm:$0xff]  ;;  %v4171_v30 = vld [vmem:[#allocation6 + $0x40] sm:$0xff]  ;;  %v4174_v31 = vld [vmem:[#allocation6 + $0x48] sm:$0xff]  ;;  %s3951_s23 = scalar_lea.vmem %s2899_s29, 512  ;;  %p3956_p5 = scmp.lt.s32.totalorder %s2899_s29, %s2899_s29 }
 0x165   :  { %3274 = vmatpush3.bf16.msra.mxu0 %v4156_v26  ;;  %v4176_v32 = vld [vmem:[#allocation6 + $0x68] sm:$0xff]  ;;  %v4181_v33 = vld [vmem:[#allocation6 + $0x58] sm:$0xff]  ;;  %v4184_v34 = vld [vmem:[#allocation6 + $0x60] sm:$0xff]  ;;  %p3952_p4 = scmp.ne.s32.totalorder %s2899_s29, %s3951_s23  ;;  %p3957_p6 = scmp.lt.s32.totalorder %s3951_s23, %s3951_s23 }
 0x166   :  { %3275 = vmatprep.subr.bf16.mxu0 %v5449_v22  ;;  %v4186_v35 = vld [vmem:[#allocation6 + $0x80] sm:$0xff]  ;;  %v4191_v36 = vld [vmem:[#allocation6 + $0x70] sm:$0xff]  ;;  %v4194_v37 = vld [vmem:[#allocation6 + $0x78] sm:$0xff] }
 0x167   :  { %369 = vmatpush1.bf16.msra.mxu1 %v4150_v24  ;;  %v4196_v38 = vld [vmem:[#allocation6 + $0x98] sm:$0xff]  ;;  %v4201_v39 = vld [vmem:[#allocation6 + $0x88] sm:$0xff]  ;;  %v4204_v40 = vld [vmem:[#allocation6 + $0x90] sm:$0xff]  ;;  %p3958_p7 = por %p3957_p6, %p3956_p5 }
 0x168   :  { %370 = vmatprep.subr.bf16.mxu1 %v4154_v25  ;;  %v4206_v41 = vld [vmem:[#allocation6 + $0xb0] sm:$0xff]  ;;  %v4211_v42 = vld [vmem:[#allocation6 + $0xa0] sm:$0xff]  ;;  %v4214_v43 = vld [vmem:[#allocation6 + $0xa8] sm:$0xff] }
 0x169   :  { %3276 = vmatpush3.bf16.msra.mxu0 %v4161_v27  ;;  %v4216_v44 = vld [vmem:[#allocation7 + $0x8] sm:$0xff]  ;;  %v340_v45 = vld [vmem:[#allocation11] sm:$0xf]  ;;  %v4221_v46 = vld [vmem:[#allocation6 + $0xb8] sm:$0xff]  ;;  %p3959_p8 = pnand %p3958_p7, %p3952_p4 }
 0x16a   :  { %3277 = vmatprep.subr.bf16.mxu0 %v5449_v22  ;;  %v4224_v47 = vld [vmem:[#allocation7] sm:$0xff]  ;;  %v4231_v49 = vld [vmem:[#allocation7 + $0x10] sm:$0xff]  ;;  %v4234_v50 = vld [vmem:[#allocation7 + $0x18] sm:$0xff] }
 0x16b   :  { %371 = vmatpush1.bf16.msra.mxu1 %v4164_v28  ;;  %v4226_v48 = vld [vmem:[#allocation7 + $0x20] sm:$0xff]  ;;  %5480 = vst [vmem:[#allocation39_spill] sm:$0xff] %v4234_v50  ;;  %v4237_v51 = vld [vmem:[#allocation7 + $0x38] sm:$0xff]  ;;  %v4244_v52 = vld [vmem:[#allocation7 + $0x28] sm:$0xff] }
 0x16c   :  { %372 = vmatprep.subr.bf16.mxu1 %v4166_v29  ;;  %5479 = vst [vmem:[#allocation38_spill] sm:$0xff] %v4226_v48  ;;  %5481 = vst [vmem:[#allocation40_spill] sm:$0xff] %v4237_v51  ;;  %v4247_v53 = vld [vmem:[#allocation7 + $0x30] sm:$0xff]  ;;  %v4254_v55 = vld [vmem:[#allocation7 + $0x40] sm:$0xff] }
 0x16d   :  { %3278 = vmatpush3.bf16.msra.mxu0 %v4171_v30  ;;  %5482 = vst [vmem:[#allocation41_spill] sm:$0xff] %v4247_v53  ;;  %v4249_v54 = vld [vmem:[#allocation7 + $0x50] sm:$0xff]  ;;  %v4257_v56 = vld [vmem:[#allocation7 + $0x48] sm:$0xff]  ;;  %v4264_v58 = vld [vmem:[#allocation7 + $0x58] sm:$0xff] }
 0x16e   :  { %3279 = vmatprep.subr.bf16.mxu0 %v5449_v22  ;;  %5483 = vst [vmem:[#allocation42_spill] sm:$0xff] %v4249_v54  ;;  %5484 = vst [vmem:[#allocation43_spill] sm:$0xff] %v4257_v56  ;;  %v4259_v57 = vld [vmem:[#allocation7 + $0x68] sm:$0xff]  ;;  %v4267_v59 = vld [vmem:[#allocation7 + $0x60] sm:$0xff] }
 0x16f   :  { %373 = vmatpush1.bf16.msra.mxu1 %v4174_v31  ;;  %5485 = vst [vmem:[#allocation44_spill] sm:$0xff] %v4259_v57  ;;  %5486 = vst [vmem:[#allocation45_spill] sm:$0xff] %v4267_v59  ;;  %v4269_v60 = vld [vmem:[#allocation7 + $0x80] sm:$0xff]  ;;  %v4274_v61 = vld [vmem:[#allocation7 + $0x70] sm:$0xff] }
 0x170   :  { %374 = vmatprep.subr.bf16.mxu1 %v4176_v32  ;;  %5487 = vst [vmem:[#allocation46_spill] sm:$0xff] %v4269_v60  ;;  %v4277_v62 = vld [vmem:[#allocation7 + $0x78] sm:$0xff]  ;;  %v4284_v0 = vld [vmem:[#allocation7 + $0x88] sm:$0xff]  ;;  %v4287_v1 = vld [vmem:[#allocation7 + $0x90] sm:$0xff] }
 0x171   :  { %3280 = vmatpush3.bf16.msra.mxu0 %v4181_v33  ;;  %5488 = vst [vmem:[#allocation47_spill] sm:$0xff] %v4277_v62  ;;  %v4279_v63 = vld [vmem:[#allocation7 + $0x98] sm:$0xff]  ;;  %5490 = vst [vmem:[#allocation49_spill] sm:$0xff] %v4287_v1  ;;  %v4289_v2 = vld [vmem:[#allocation7 + $0xb0] sm:$0xff] }
 0x172   :  { %3281 = vmatprep.subr.bf16.mxu0 %v5449_v22  ;;  %5489 = vst [vmem:[#allocation48_spill] sm:$0xff] %v4279_v63  ;;  %5491 = vst [vmem:[#allocation50_spill] sm:$0xff] %v4289_v2  ;;  %v4294_v3 = vld [vmem:[#allocation7 + $0xa0] sm:$0xff]  ;;  %v4297_v4 = vld [vmem:[#allocation7 + $0xa8] sm:$0xff] }
 0x173   :  { %375 = vmatpush1.bf16.msra.mxu1 %v4184_v34  ;;  %5492 = vst [vmem:[#allocation51_spill] sm:$0xff] %v4297_v4  ;;  %v4304_v6 = vld [vmem:[#allocation7 + $0xb8] sm:$0xff]  ;;  %v4328_v7 = vld [vmem:[#allocation8] sm:$0xff]  ;;  %v4335_v9 = vld [vmem:[#allocation8 + $0x8] sm:$0xff] }
 0x174   :  { %376 = vmatprep.subr.bf16.mxu1 %v4186_v35  ;;  %v4331_v8 = vld [vmem:[#allocation11 + $0x4] sm:$0xf]  ;;  %v4343_v10 = vld [vmem:[#allocation8 + $0x10] sm:$0xff]  ;;  %v4349_v11 = vld [vmem:[#allocation8 + $0x18] sm:$0xff] }
 0x175   :  { %3282 = vmatpush3.bf16.msra.mxu0 %v4191_v36  ;;  %v4355_v12 = vld [vmem:[#allocation8 + $0x20] sm:$0xff]  ;;  %v4360_v13 = vld [vmem:[#allocation8 + $0x28] sm:$0xff]  ;;  %v4366_v14 = vld [vmem:[#allocation8 + $0x30] sm:$0xff] }
 0x176   :  { %3283 = vmatprep.subr.bf16.mxu0 %v5449_v22  ;;  %v4372_v15 = vld [vmem:[#allocation8 + $0x38] sm:$0xff] }
 0x177   :  { %377 = vmatpush1.bf16.msra.mxu1 %v4194_v37 }
 0x178   :  { %378 = vmatprep.subr.bf16.mxu1 %v4196_v38 }
 0x179   :  { %3284 = vmatpush3.bf16.msra.mxu0 %v4201_v39 }
 0x17a   :  { %3285 = vmatprep.subr.bf16.mxu0 %v5449_v22 }
 0x17b   :  { %379 = vmatpush1.bf16.msra.mxu1 %v4204_v40 }
 0x17c   :  { %380 = vmatprep.subr.bf16.mxu1 %v4206_v41 }
 0x17d   :  { %3286 = vmatpush3.bf16.msra.mxu0 %v4211_v42 }
 0x17e   :  { %3287 = vmatprep.subr.bf16.mxu0 %v5449_v22 }
 0x17f   :  { %381 = vmatpush1.bf16.msra.mxu1 %v4214_v43 }
 0x180   :  { %472 = vmatprep.subr.bf16.mxu1 %v4216_v44 }
 0x181   :  { %3288 = vmatpush3.bf16.msra.mxu0 %v4221_v46 }
 0x182   :  { %399 = vmatmul.mubr.bf16.vlgmr.msra.gmra.mrb[0].mxu1 %v340_v45  ;;  %3293 = vmatprep.subr.bf16.mxu0 %v5449_v22 }
 0x183   :  { %473 = vmatpush1.bf16.msra.mxu1 %v4224_v47  ;;  %504 = vmatprep.mubr.bf16.mxu1 %v5436_v23 }
 0x184   :  { %474 = vmatprep.subr.bf16.mxu1 %v4226_v48  ;;  %3290 = vmatmul.mubr.bf16.vlgmr.msra.gmra.mrb[4].mxu0 %v340_v45 }
 0x185   :  { %3294 = vmatpush3.bf16.msra.mxu0 %v4231_v49  ;;  %3309 = vmatprep.mubr.msk.bf16.mxu0 %vm4014_vm1, %v5449_v22 }
 0x186   :  { %3295 = vmatprep.subr.bf16.mxu0 %v5449_v22 }
 0x187   :  { %475 = vmatpush1.bf16.msra.mxu1 %v4234_v50 }
 0x188   :  { %476 = vmatprep.subr.bf16.mxu1 %v4237_v51 }
 0x189   :  { %3296 = vmatpush3.bf16.msra.mxu0 %v4244_v52 }
 0x18a   :  { %3297 = vmatprep.subr.bf16.mxu0 %v5449_v22 }
 0x18b   :  { %477 = vmatpush1.bf16.msra.mxu1 %v4247_v53 }
 0x18c   :  { %478 = vmatprep.subr.bf16.mxu1 %v4249_v54 }
 0x18d   :  { %3298 = vmatpush3.bf16.msra.mxu0 %v4254_v55 }
 0x18e   :  { %3299 = vmatprep.subr.bf16.mxu0 %v5449_v22 }
 0x18f   :  { %479 = vmatpush1.bf16.msra.mxu1 %v4257_v56 }
 0x190   :  { %480 = vmatprep.subr.bf16.mxu1 %v4259_v57 }
 0x191   :  { %3300 = vmatpush3.bf16.msra.mxu0 %v4264_v58 }
 0x192   :  { %3301 = vmatprep.subr.bf16.mxu0 %v5449_v22 }
 0x193   :  { %481 = vmatpush1.bf16.msra.mxu1 %v4267_v59 }
 0x194   :  { %482 = vmatprep.subr.bf16.mxu1 %v4269_v60 }
 0x195   :  { %3302 = vmatpush3.bf16.msra.mxu0 %v4274_v61 }
 0x196   :  { %3303 = vmatprep.subr.bf16.mxu0 %v5449_v22 }
 0x197   :  { %483 = vmatpush1.bf16.msra.mxu1 %v4277_v62 }
 0x198   :  { %484 = vmatprep.subr.bf16.mxu1 %v4279_v63 }
 0x199   :  { %3304 = vmatpush3.bf16.msra.mxu0 %v4284_v0 }
 0x19a   :  { %3305 = vmatprep.subr.bf16.mxu0 %v5449_v22 }
 0x19b   :  { %485 = vmatpush1.bf16.msra.mxu1 %v4287_v1 }
 0x19c   :  { %486 = vmatprep.subr.bf16.mxu1 %v4289_v2 }
 0x19d   :  { %3306 = vmatpush3.bf16.msra.mxu0 %v4294_v3 }
 0x19e   :  { %3307 = vmatprep.subr.bf16.mxu0 %v5449_v22 }
 0x19f   :  { %487 = vmatpush1.bf16.msra.mxu1 %v4297_v4 }
 0x1a0   :  { %3313 = vmatprep.subr.bf16.mxu1 %v5449_v22 }
 0x1a1   :  { %3308 = vmatpush3.bf16.msra.mxu0 %v4304_v6 }
 0x1a2   :  { %505 = vmatmul.mubr.bf16.vlgmr.msra.gmra.mrb[4].mxu1 %v447_v5  ;;  %685 = vmatprep.subr.bf16.mxu0 %v4139_v19 }
 0x1a3   :  { %3329 = vmatprep.mubr.msk.bf16.mxu1 %vm4014_vm1, %v5449_v22  ;;  %3314 = vmatpush3.bf16.msra.mxu1 %v4328_v7 }
 0x1a4   :  { %3310 = vmatmul.mubr.bf16.vlgmr.msra.gmra.mrb[8].mxu0 %v447_v5  ;;  %3315 = vmatprep.subr.bf16.mxu1 %v5449_v22 }
 0x1a5   :  { %686 = vmatpush1.bf16.msra.mxu0 %v4141_v20  ;;  %717 = vmatprep.mubr.bf16.mxu0 %v5436_v23 }
 0x1a6   :  { %687 = vmatprep.subr.bf16.mxu0 %v4143_v21 }
 0x1a7   :  { %3316 = vmatpush3.bf16.msra.mxu1 %v4335_v9 }
 0x1a8   :  { %3317 = vmatprep.subr.bf16.mxu1 %v5449_v22 }
 0x1a9   :  { %688 = vmatpush1.bf16.msra.mxu0 %v4150_v24 }
 0x1aa   :  { %689 = vmatprep.subr.bf16.mxu0 %v4154_v25 }
 0x1ab   :  { %3318 = vmatpush3.bf16.msra.mxu1 %v4343_v10 }
 0x1ac   :  { %3319 = vmatprep.subr.bf16.mxu1 %v5449_v22 }
 0x1ad   :  { %690 = vmatpush1.bf16.msra.mxu0 %v4164_v28 }
 0x1ae   :  { %691 = vmatprep.subr.bf16.mxu0 %v4166_v29 }
 0x1af   :  { %3320 = vmatpush3.bf16.msra.mxu1 %v4349_v11 }
 0x1b0   :  { %3321 = vmatprep.subr.bf16.mxu1 %v5449_v22 }
 0x1b1   :  { %692 = vmatpush1.bf16.msra.mxu0 %v4174_v31 }
 0x1b2   :  { %693 = vmatprep.subr.bf16.mxu0 %v4176_v32 }
 0x1b3   :  { %3322 = vmatpush3.bf16.msra.mxu1 %v4355_v12 }
 0x1b4   :  { %3323 = vmatprep.subr.bf16.mxu1 %v5449_v22 }
 0x1b5   :  { %694 = vmatpush1.bf16.msra.mxu0 %v4184_v34 }
 0x1b6   :  { %695 = vmatprep.subr.bf16.mxu0 %v4186_v35 }
 0x1b7   :  { %3324 = vmatpush3.bf16.msra.mxu1 %v4360_v13 }
 0x1b8   :  { %3325 = vmatprep.subr.bf16.mxu1 %v5449_v22 }
 0x1b9   :  { %696 = vmatpush1.bf16.msra.mxu0 %v4194_v37 }
 0x1ba   :  { %697 = vmatprep.subr.bf16.mxu0 %v4196_v38 }
 0x1bb   :  { %3326 = vmatpush3.bf16.msra.mxu1 %v4366_v14 }
 0x1bc   :  { %3327 = vmatprep.subr.bf16.mxu1 %v5449_v22 }
 0x1bd   :  { %698 = vmatpush1.bf16.msra.mxu0 %v4204_v40 }
 0x1be   :  { %699 = vmatprep.subr.bf16.mxu0 %v4206_v41 }
 0x1bf   :  { %3328 = vmatpush3.bf16.msra.mxu1 %v4372_v15 }
 0x1c0   :  { %3333 = vmatprep.subr.bf16.mxu1 %v5449_v22 }
 0x1c1   :  { %700 = vmatpush1.bf16.msra.mxu0 %v4214_v43 }
 0x1c2   :  { %791 = vmatprep.subr.bf16.mxu0 %v4216_v44 }
 0x1c4   :  { %718 = vmatmul.mubr.bf16.vlgmr.msra.gmra.mrb[12].mxu0 %v4331_v8 }
 0x1c5   :  { %792 = vmatpush1.bf16.msra.mxu0 %v4224_v47  ;;  %823 = vmatprep.mubr.bf16.mxu0 %v5436_v23 }
 0x1c6   :  { %793 = vmatprep.subr.bf16.mxu0 %v4226_v48 }
 0x1c9   :  { %794 = vmatpush1.bf16.msra.mxu0 %v4234_v50 }
 0x1ca   :  { %795 = vmatprep.subr.bf16.mxu0 %v4237_v51 }
 0x1cd   :  { %796 = vmatpush1.bf16.msra.mxu0 %v4247_v53 }
 0x1ce   :  { %797 = vmatprep.subr.bf16.mxu0 %v4249_v54 }
 0x1d1   :  { %798 = vmatpush1.bf16.msra.mxu0 %v4257_v56 }
 0x1d2   :  { %799 = vmatprep.subr.bf16.mxu0 %v4259_v57 }
 0x1d5   :  { %800 = vmatpush1.bf16.msra.mxu0 %v4267_v59  ;;  %v4380_v59 = vld [vmem:[#allocation5] ss:$0 sm:$0xff] }
 0x1d6   :  { %801 = vmatprep.subr.bf16.mxu0 %v4269_v60 }
 0x1d9   :  { %802 = vmatpush1.bf16.msra.mxu0 %v4277_v62 }
 0x1da   :  { %803 = vmatprep.subr.bf16.mxu0 %v4279_v63 }
 0x1dd   :  { %804 = vmatpush1.bf16.msra.mxu0 %v4287_v1 }
 0x1de   :  { %805 = vmatprep.subr.bf16.mxu0 %v4289_v2 }
 0x1e1   :  { %806 = vmatpush1.bf16.msra.mxu0 %v4297_v4  ;;  %v4383_v4 = vld [vmem:[#allocation5 + $0x1] ss:$0 sm:$0xff] }
 0x1e2   :  { %3373 = vmatprep.subr.bf16.mxu0 %v5449_v22 }
 0x255   :  { %v400_v16 = vpop.f32.mrb[0].mxu1 }
 0x256   :  { %v402_v18 = vpop.f32.mrb[1].mxu1 }
 0x257   :  { %v404_v45 = vpop.f32.mrb[2].mxu1  ;;  %v441_v23 = vpop.f32.mrb[4].mxu0 }
 0x258   :  { %v405_v5 = vpop.f32.mrb[3].mxu1  ;;  %v3291_v63 = vpop.f32.mrb[5].mxu0 }
 0x259   :  { %v444_v62 = vpop.f32.mrb[6].mxu0 }
 0x25a   :  { %v3292_v60 = vpop.f32.mrb[7].mxu0 }
 0x275   :  { %v506_v1 = vpop.f32.mrb[4].mxu1 }
 0x276   :  { %v553_v2 = vadd.f32 %v506_v1, %v400_v16  ;;  %v508_v57 = vpop.f32.mrb[5].mxu1 }
 0x277   :  { %v561_v56 = vadd.f32 %v508_v57, %v402_v18  ;;  %v510_v54 = vpop.f32.mrb[6].mxu1  ;;  %v547_v51 = vpop.f32.mrb[8].mxu0 }
 0x278   :  { %v554_v53 = vadd.f32 %v4380_v59, %v553_v2  ;;  %v511_v22 = vpop.f32.mrb[7].mxu1  ;;  %v3311_v50 = vpop.f32.mrb[9].mxu0  ;;  %v4386_v54 = vld [vmem:[#allocation5 + $0x3] ss:$0 sm:$0xff] }
 0x279   :  { %v550_v5 = vpop.f32.mrb[10].mxu0  ;;  %v562_v63 = vadd.f32 %v4383_v4, %v561_v56  ;;  %v570_v16 = vadd.f32 %v4386_v54, %v547_v51  ;;  %v4389_v22 = vld [vmem:[#allocation5 + $0x2] ss:$0 sm:$0xff] }
 0x27a   :  { %v2998_v45 = vmul.f32 -1.442695, %v554_v53  ;;  %v3312_v62 = vpop.f32.mrb[11].mxu0  ;;  %v569_v53 = vadd.f32 %v4389_v22, %v441_v23  ;;  %v5493_v23 = vmov 0.0  }
 0x27b   :  { %v2999_v60 = vmul.f32 -1.442695, %v562_v63 }
 0x27c   :  { %3779 = vpow2.f32 %v2998_v45 }
 0x27d   :  { %3781 = vpow2.f32 %v2999_v60 }
 0x286   :  { %v3780_v48 = vpop.eup %3779 }
 0x287   :  { %v558_v1 = vadd.f32 1.0, %v3780_v48  ;;  %v3782_v57 = vpop.eup %3781 }
 0x288   :  { %v566_v2 = vadd.f32 1.0, %v3782_v57 }
 0x289   :  { %3783 = vrcp.f32 %v558_v1 }
 0x28a   :  { %3785 = vrcp.f32 %v566_v2  ;;  %v5494_v2 = vmov 0  }
 0x293   :  { %v3784_v50 = vpop.eup %3783 }
 0x294   :  { %v571_v56 = vmul.f32 %v3784_v50, %v570_v16  ;;  %v3786_v45 = vpop.eup %3785 }
 0x295   :  { %v574_v5 = vsub.f32 1.0, %v3786_v45  ;;  %v576_v62 = vmul.f32 %v3786_v45, %v4137_v17 }
 0x296   :  { %v572_v18 = vadd.f32 %v571_v56, %v569_v53 }
 0x297   :  { %v719_v17 = vpop.f32.mrb[12].mxu0 }
 0x298   :  { %3787 = vtanh.f32 %v572_v18 }
 0x2a2   :  { %v3788_v63 = vpop.eup %3787 }
 0x2a3   :  { %v575_v48 = vmul.f32 %v3788_v63, %v574_v5 }
 0x2a5   :  { %v4393_v60 = vadd.f32 %v576_v62, %v575_v48 }
 0x2a7   :  { %v579_v51 = vpack.c.bf16 %v4393_v60, %v4393_v60 }
 0x2a9   :  { %3330 = vmatmul.mubr.bf16.vlgmr.msra.gmra.mrb[8].mxu1 %v579_v51  ;;  %824 = vmatmul.mubr.bf16.vlgmr.msra.gmra.mrb[16].mxu0 %v579_v51 }
 0x2aa   :  { %3334 = vmatpush3.bf16.msra.mxu1 %v4156_v26  ;;  %3349 = vmatprep.mubr.msk.bf16.mxu1 %vm4014_vm1, %v5493_v23 }
 0x2ab   :  { %3335 = vmatprep.subr.bf16.mxu1 %v5493_v23  ;;  %3374 = vmatpush3.bf16.msra.mxu0 %v4328_v7 }
 0x2ac   :  { %3375 = vmatprep.subr.bf16.mxu0 %v5493_v23  ;;  %3389 = vmatprep.mubr.msk.bf16.mxu0 %vm4014_vm1, %v5493_v23 }
 0x2ae   :  { %3336 = vmatpush3.bf16.msra.mxu1 %v4161_v27 }
 0x2af   :  { %3337 = vmatprep.subr.bf16.mxu1 %v5493_v23  ;;  %3376 = vmatpush3.bf16.msra.mxu0 %v4335_v9 }
 0x2b0   :  { %3377 = vmatprep.subr.bf16.mxu0 %v5493_v23 }
 0x2b2   :  { %3338 = vmatpush3.bf16.msra.mxu1 %v4171_v30 }
 0x2b3   :  { %3339 = vmatprep.subr.bf16.mxu1 %v5493_v23  ;;  %3378 = vmatpush3.bf16.msra.mxu0 %v4343_v10 }
 0x2b4   :  { %3379 = vmatprep.subr.bf16.mxu0 %v5493_v23 }
 0x2b6   :  { %3340 = vmatpush3.bf16.msra.mxu1 %v4181_v33 }
 0x2b7   :  { %3341 = vmatprep.subr.bf16.mxu1 %v5493_v23  ;;  %3380 = vmatpush3.bf16.msra.mxu0 %v4349_v11 }
 0x2b8   :  { %3381 = vmatprep.subr.bf16.mxu0 %v5493_v23 }
 0x2ba   :  { %3342 = vmatpush3.bf16.msra.mxu1 %v4191_v36 }
 0x2bb   :  { %3343 = vmatprep.subr.bf16.mxu1 %v5493_v23  ;;  %3382 = vmatpush3.bf16.msra.mxu0 %v4355_v12 }
 0x2bc   :  { %3383 = vmatprep.subr.bf16.mxu0 %v5493_v23 }
 0x2be   :  { %3344 = vmatpush3.bf16.msra.mxu1 %v4201_v39 }
 0x2bf   :  { %3345 = vmatprep.subr.bf16.mxu1 %v5493_v23  ;;  %3384 = vmatpush3.bf16.msra.mxu0 %v4360_v13 }
 0x2c0   :  { %3385 = vmatprep.subr.bf16.mxu0 %v5493_v23 }
 0x2c2   :  { %3346 = vmatpush3.bf16.msra.mxu1 %v4211_v42 }
 0x2c3   :  { %3347 = vmatprep.subr.bf16.mxu1 %v5493_v23  ;;  %3386 = vmatpush3.bf16.msra.mxu0 %v4366_v14 }
 0x2c4   :  { %3387 = vmatprep.subr.bf16.mxu0 %v5493_v23 }
 0x2c6   :  { %3348 = vmatpush3.bf16.msra.mxu1 %v4221_v46 }
 0x2c7   :  { %3353 = vmatprep.subr.bf16.mxu1 %v5493_v23  ;;  %3388 = vmatpush3.bf16.msra.mxu0 %v4372_v15 }
 0x2c8   :  { %3393 = vmatprep.subr.bf16.mxu0 %v5493_v23 }
 0x2c9   :  { %3350 = vmatmul.mubr.bf16.vlgmr.msra.gmra.mrb[12].mxu1 %v4331_v8  ;;  %v721_v8 = vpop.f32.mrb[13].mxu0 }
 0x2ca   :  { %3354 = vmatpush3.bf16.msra.mxu1 %v4231_v49  ;;  %3369 = vmatprep.mubr.msk.bf16.mxu1 %vm4014_vm1, %v5493_v23  ;;  %v723_v1 = vpop.f32.mrb[14].mxu0 }
 0x2cb   :  { %3355 = vmatprep.subr.bf16.mxu1 %v5493_v23  ;;  %v724_v57 = vpop.f32.mrb[15].mxu0 }
 0x2ce   :  { %3356 = vmatpush3.bf16.msra.mxu1 %v4244_v52 }
 0x2cf   :  { %3357 = vmatprep.subr.bf16.mxu1 %v5493_v23 }
 0x2d2   :  { %3358 = vmatpush3.bf16.msra.mxu1 %v4254_v55 }
 0x2d3   :  { %3359 = vmatprep.subr.bf16.mxu1 %v5493_v23 }
 0x2d6   :  { %3360 = vmatpush3.bf16.msra.mxu1 %v4264_v58 }
 0x2d7   :  { %3361 = vmatprep.subr.bf16.mxu1 %v5493_v23 }
 0x2da   :  { %3362 = vmatpush3.bf16.msra.mxu1 %v4274_v61 }
 0x2db   :  { %3363 = vmatprep.subr.bf16.mxu1 %v5493_v23 }
 0x2de   :  { %3364 = vmatpush3.bf16.msra.mxu1 %v4284_v0 }
 0x2df   :  { %3365 = vmatprep.subr.bf16.mxu1 %v5493_v23 }
 0x2e2   :  { %3366 = vmatpush3.bf16.msra.mxu1 %v4294_v3 }
 0x2e3   :  { %3367 = vmatprep.subr.bf16.mxu1 %v5493_v23 }
 0x2e6   :  { %3368 = vmatpush3.bf16.msra.mxu1 %v4304_v6 }
 0x2e7   :  { %1005 = vmatprep.subr.bf16.mxu1 %v4139_v19  ;;  %v4469_v19 = vld [vmem:[#allocation11 + $0x8] sm:$0xf] }
 0x2e9   :  { %3370 = vmatmul.mubr.bf16.vlgmr.msra.gmra.mrb[16].mxu1 %v579_v51 }
 0x2ea   :  { %1006 = vmatpush1.bf16.msra.mxu1 %v4141_v20  ;;  %1037 = vmatprep.mubr.bf16.mxu1 %v5494_v2  ;;  %v5495_v20 = vld [vmem:[#allocation38_spill] sm:$0xff] }
 0x2eb   :  { %1007 = vmatprep.subr.bf16.mxu1 %v4143_v21  ;;  %v5496_v21 = vld [vmem:[#allocation39_spill] sm:$0xff] }
 0x2ee   :  { %1008 = vmatpush1.bf16.msra.mxu1 %v4150_v24  ;;  %v5497_v24 = vld [vmem:[#allocation40_spill] sm:$0xff] }
 0x2ef   :  { %1009 = vmatprep.subr.bf16.mxu1 %v4154_v25  ;;  %v5498_v25 = vld [vmem:[#allocation41_spill] sm:$0xff] }
 0x2f2   :  { %1010 = vmatpush1.bf16.msra.mxu1 %v4164_v28  ;;  %v5499_v28 = vld [vmem:[#allocation42_spill] sm:$0xff] }
 0x2f3   :  { %1011 = vmatprep.subr.bf16.mxu1 %v4166_v29  ;;  %v5500_v29 = vld [vmem:[#allocation43_spill] sm:$0xff] }
 0x2f6   :  { %1012 = vmatpush1.bf16.msra.mxu1 %v4174_v31  ;;  %v5501_v31 = vld [vmem:[#allocation44_spill] sm:$0xff] }
 0x2f7   :  { %1013 = vmatprep.subr.bf16.mxu1 %v4176_v32  ;;  %v5502_v32 = vld [vmem:[#allocation45_spill] sm:$0xff] }
 0x2fa   :  { %1014 = vmatpush1.bf16.msra.mxu1 %v4184_v34  ;;  %v5503_v34 = vld [vmem:[#allocation46_spill] sm:$0xff] }
 0x2fb   :  { %1015 = vmatprep.subr.bf16.mxu1 %v4186_v35  ;;  %v5504_v35 = vld [vmem:[#allocation47_spill] sm:$0xff] }
 0x2fe   :  { %1016 = vmatpush1.bf16.msra.mxu1 %v4194_v37  ;;  %v5505_v37 = vld [vmem:[#allocation48_spill] sm:$0xff] }
 0x2ff   :  { %1017 = vmatprep.subr.bf16.mxu1 %v4196_v38  ;;  %v5506_v38 = vld [vmem:[#allocation49_spill] sm:$0xff] }
 0x302   :  { %1018 = vmatpush1.bf16.msra.mxu1 %v4204_v40  ;;  %v5507_v40 = vld [vmem:[#allocation50_spill] sm:$0xff] }
 0x303   :  { %1019 = vmatprep.subr.bf16.mxu1 %v4206_v41  ;;  %v5508_v41 = vld [vmem:[#allocation51_spill] sm:$0xff] }
 0x306   :  { %1020 = vmatpush1.bf16.msra.mxu1 %v4214_v43  ;;  %v311_v43 = vlaneseq }
 0x307   :  { %1111 = vmatprep.subr.bf16.mxu1 %v4216_v44 }
 0x308   :  { %v4489_v44 = vand.u32 127, %v311_v43 }
 0x309   :  { %1038 = vmatmul.mubr.bf16.vlgmr.msra.gmra.mrb[20].mxu1 %v4469_v19 }
 0x30a   :  { %1112 = vmatpush1.bf16.msra.mxu1 %v4224_v47  ;;  %1143 = vmatprep.mubr.bf16.mxu1 %v5494_v2  ;;  %5509 = vst [vmem:[#allocation38_spill] sm:$0xff] %v4489_v44  ;;  %vm313_vm2 = vcmp.lt.s32.totalorder %v4489_v44, 48  ;;  %v4015_v47 = vmov -1e+30   ;;  %v4806_v44 = vld [vmem:[#allocation8 + $0x18] sm:$0xff] }
 0x30b   :  { %1113 = vmatprep.subr.bf16.mxu1 %v5495_v20  ;;  %v4492_v16 = vsel %vm313_vm2, 0.0, %v4015_v47 }
 0x30c   :  { %5510 = vst [vmem:[#allocation39_spill] sm:$0xff] %v4492_v16 }
 0x30e   :  { %1114 = vmatpush1.bf16.msra.mxu1 %v5496_v21 }
 0x30f   :  { %1115 = vmatprep.subr.bf16.mxu1 %v5497_v24 }
 0x312   :  { %1116 = vmatpush1.bf16.msra.mxu1 %v5498_v25 }
 0x313   :  { %1117 = vmatprep.subr.bf16.mxu1 %v5499_v28 }
 0x316   :  { %1118 = vmatpush1.bf16.msra.mxu1 %v5500_v29 }
 0x317   :  { %1119 = vmatprep.subr.bf16.mxu1 %v5501_v31 }
 0x31a   :  { %1120 = vmatpush1.bf16.msra.mxu1 %v5502_v32 }
 0x31b   :  { %1121 = vmatprep.subr.bf16.mxu1 %v5503_v34 }
 0x31e   :  { %1122 = vmatpush1.bf16.msra.mxu1 %v5504_v35 }
 0x31f   :  { %1123 = vmatprep.subr.bf16.mxu1 %v5505_v37 }
 0x322   :  { %1124 = vmatpush1.bf16.msra.mxu1 %v5506_v38 }
 0x323   :  { %1125 = vmatprep.subr.bf16.mxu1 %v5507_v40 }
 0x326   :  { %1126 = vmatpush1.bf16.msra.mxu1 %v5508_v41 }
 0x327   :  { %3433 = vmatprep.subr.bf16.mxu1 %v5493_v23 }
 0x37c   :  { %v622_v50 = vpop.f32.mrb[8].mxu1  ;;  %v825_v53 = vpop.f32.mrb[16].mxu0 }
 0x37d   :  { %v628_v56 = vpack.c.bf16 %v622_v50, %v622_v50  ;;  %v872_v18 = vadd.f32 %v825_v53, %v719_v17  ;;  %v3331_v45 = vpop.f32.mrb[9].mxu1  ;;  %v827_v5 = vpop.f32.mrb[17].mxu0  ;;  %v4495_v63 = vadd.f32 %v622_v50, %v4492_v16 }
 0x37e   :  { %v880_v48 = vadd.f32 %v827_v5, %v721_v8  ;;  %v625_v62 = vpop.f32.mrb[10].mxu1  ;;  %v829_v51 = vpop.f32.mrb[18].mxu0 }
 0x37f   :  { %5511 = vst [vmem:[#allocation40_spill] sm:$0xff] %v4495_v63  ;;  %629 = vst [vmem:[#allocation14] sm:$0xf] %v628_v56  ;;  %v3332_v1 = vpop.f32.mrb[11].mxu1  ;;  %v830_v57 = vpop.f32.mrb[19].mxu0  ;;  %631 = vmax.xlane.f32.xlu0 %v4495_v63  ;;  %v873_v20 = vadd.f32 %v4380_v59, %v872_v18  ;;  %v4810_v63 = vld [vmem:[#allocation8 + $0x20] sm:$0xff] }
 0x380   :  { %v881_v29 = vadd.f32 %v4383_v4, %v880_v48  ;;  %v4633_v57 = vld [vmem:[#allocation7 + $0x30] sm:$0xff] }
 0x381   :  { %v3000_v28 = vmul.f32 -1.442695, %v873_v20  ;;  %5520 = vst [vmem:[#allocation49_spill] sm:$0xff] %v4633_v57  ;;  %v4636_v20 = vld [vmem:[#allocation7 + $0x50] sm:$0xff] }
 0x382   :  { %v3001_v31 = vmul.f32 -1.442695, %v881_v29  ;;  %5521 = vst [vmem:[#allocation50_spill] sm:$0xff] %v4636_v20  ;;  %v4653_v29 = vld [vmem:[#allocation7 + $0x98] sm:$0xff] }
 0x383   :  { %3789 = vpow2.f32 %v3000_v28  ;;  %v4646_v28 = vld [vmem:[#allocation7 + $0x80] sm:$0xff]  ;;  %5527 = vst [vmem:[#allocation56_spill] sm:$0xff] %v4653_v29 }
 0x384   :  { %3791 = vpow2.f32 %v3001_v31  ;;  %5525 = vst [vmem:[#allocation54_spill] sm:$0xff] %v4646_v28  ;;  %v4657_v31 = vld [vmem:[#allocation7 + $0x90] sm:$0xff] }
 0x385   :  { %5528 = vst [vmem:[#allocation57_spill] sm:$0xff] %v4657_v31 }
 0x38d   :  { %v3790_v32 = vpop.eup %3789 }
 0x38e   :  { %v877_v8 = vadd.f32 1.0, %v3790_v32  ;;  %v3792_v34 = vpop.eup %3791  ;;  %v4659_v32 = vld [vmem:[#allocation7 + $0xb0] sm:$0xff] }
 0x38f   :  { %v885_v35 = vadd.f32 1.0, %v3792_v34  ;;  %5529 = vst [vmem:[#allocation58_spill] sm:$0xff] %v4659_v32 }
 0x390   :  { %3793 = vrcp.f32 %v877_v8  ;;  %v4663_v8 = vld [vmem:[#allocation7 + $0xa8] sm:$0xff] }
 0x391   :  { %3795 = vrcp.f32 %v885_v35  ;;  %5530 = vst [vmem:[#allocation59_spill] sm:$0xff] %v4663_v8 }
 0x39a   :  { %v3794_v41 = vpop.eup %3793 }
 0x39b   :  { %v3796_v18 = vpop.eup %3795 }
 0x39c   :  { %v760_v21 = vpop.f32.mrb[12].mxu1  ;;  %v893_v45 = vsub.f32 1.0, %v3796_v18  ;;  %v895_v62 = vmul.f32 %v3796_v18, %v4393_v60  ;;  %v4627_v60 = vld [vmem:[#allocation7 + $0x18] sm:$0xff] }
 0x39d   :  { %v3351_v24 = vpop.f32.mrb[13].mxu1  ;;  %v888_v47 = vadd.f32 %v4389_v22, %v760_v21  ;;  %5518 = vst [vmem:[#allocation47_spill] sm:$0xff] %v4627_v60  ;;  %v4639_v21 = vld [vmem:[#allocation7 + $0x48] sm:$0xff] }
 0x39e   :  { %v763_v25 = vpop.f32.mrb[14].mxu1  ;;  %5522 = vst [vmem:[#allocation51_spill] sm:$0xff] %v4639_v21  ;;  %v4642_v24 = vld [vmem:[#allocation7 + $0x68] sm:$0xff] }
 0x39f   :  { %v3352_v17 = vpop.f32.mrb[15].mxu1  ;;  %5523 = vst [vmem:[#allocation52_spill] sm:$0xff] %v4642_v24  ;;  %v4644_v25 = vld [vmem:[#allocation7 + $0x60] sm:$0xff] }
 0x3a0   :  { %5524 = vst [vmem:[#allocation53_spill] sm:$0xff] %v4644_v25  ;;  %v4651_v17 = vld [vmem:[#allocation7 + $0x78] sm:$0xff] }
 0x3a1   :  { %5526 = vst [vmem:[#allocation55_spill] sm:$0xff] %v4651_v17 }
 0x3bc   :  { %v866_v37 = vpop.f32.mrb[16].mxu1 }
 0x3bd   :  { %v889_v38 = vadd.f32 %v4386_v54, %v866_v37  ;;  %v3371_v40 = vpop.f32.mrb[17].mxu1 }
 0x3be   :  { %v869_v43 = vpop.f32.mrb[18].mxu1 }
 0x3bf   :  { %v890_v50 = vmul.f32 %v3794_v41, %v889_v38  ;;  %v3372_v53 = vpop.f32.mrb[19].mxu1 }
 0x3c1   :  { %v891_v56 = vadd.f32 %v890_v50, %v888_v47 }
 0x3c3   :  { %3797 = vtanh.f32 %v891_v56 }
 0x3cd   :  { %v3798_v5 = vpop.eup %3797 }
 0x3ce   :  { %v894_v48 = vmul.f32 %v3798_v5, %v893_v45 }
 0x3d0   :  { %v4503_v51 = vadd.f32 %v895_v62, %v894_v48 }
 0x3d2   :  { %v898_v1 = vpack.c.bf16 %v4503_v51, %v4503_v51 }
 0x3d4   :  { %3390 = vmatmul.mubr.bf16.vlgmr.msra.gmra.mrb[20].mxu0 %v898_v1  ;;  %1144 = vmatmul.mubr.bf16.vlgmr.msra.gmra.mrb[24].mxu1 %v898_v1 }
 0x3d5   :  { %3394 = vmatpush3.bf16.msra.mxu0 %v4156_v26  ;;  %3409 = vmatprep.mubr.msk.bf16.mxu0 %vm4014_vm1, %v5493_v23 }
 0x3d6   :  { %3395 = vmatprep.subr.bf16.mxu0 %v5493_v23  ;;  %3434 = vmatpush3.bf16.msra.mxu1 %v4328_v7  ;;  %v4601_v7 = vld [vmem:[#allocation6 + $0x98] sm:$0xff] }
 0x3d7   :  { %3435 = vmatprep.subr.bf16.mxu1 %v5493_v23  ;;  %3449 = vmatprep.mubr.msk.bf16.mxu1 %vm4014_vm1, %v5493_v23 }
 0x3d9   :  { %3396 = vmatpush3.bf16.msra.mxu0 %v4161_v27 }
 0x3da   :  { %3397 = vmatprep.subr.bf16.mxu0 %v5493_v23  ;;  %3436 = vmatpush3.bf16.msra.mxu1 %v4335_v9  ;;  %v4605_v9 = vld [vmem:[#allocation6 + $0x90] sm:$0xff] }
 0x3db   :  { %3437 = vmatprep.subr.bf16.mxu1 %v5493_v23  ;;  %5512 = vst [vmem:[#allocation41_spill] sm:$0xff] %v4605_v9 }
 0x3dc   :  { %v4542_v26 = vpop.f32.mrb[20].mxu1 }
 0x3dd   :  { %3398 = vmatpush3.bf16.msra.mxu0 %v4171_v30  ;;  %v4546_v27 = vpop.f32.mrb[21].mxu1 }
 0x3de   :  { %3399 = vmatprep.subr.bf16.mxu0 %v5493_v23  ;;  %3438 = vmatpush3.bf16.msra.mxu1 %v4343_v10  ;;  %v1043_v30 = vpop.f32.mrb[22].mxu1  ;;  %v4607_v10 = vld [vmem:[#allocation6 + $0xb0] sm:$0xff] }
 0x3df   :  { %3439 = vmatprep.subr.bf16.mxu1 %v5493_v23  ;;  %5513 = vst [vmem:[#allocation42_spill] sm:$0xff] %v4607_v10 }
 0x3e1   :  { %3400 = vmatpush3.bf16.msra.mxu0 %v4181_v33  ;;  %v1044_v33 = vpop.f32.mrb[23].mxu1 }
 0x3e2   :  { %3401 = vmatprep.subr.bf16.mxu0 %v5493_v23  ;;  %3440 = vmatpush3.bf16.msra.mxu1 %v4349_v11  ;;  %v4611_v11 = vld [vmem:[#allocation6 + $0xa8] sm:$0xff] }
 0x3e3   :  { %3441 = vmatprep.subr.bf16.mxu1 %v5493_v23  ;;  %5514 = vst [vmem:[#allocation43_spill] sm:$0xff] %v4611_v11 }
 0x3e5   :  { %3402 = vmatpush3.bf16.msra.mxu0 %v4191_v36  ;;  %v4566_v36 = vld [vmem:[#allocation6 + $0x8] sm:$0xff] }
 0x3e6   :  { %3403 = vmatprep.subr.bf16.mxu0 %v5493_v23  ;;  %3442 = vmatpush3.bf16.msra.mxu1 %v4355_v12  ;;  %v4613_v12 = vld [vmem:[#allocation7 + $0x8] sm:$0xff] }
 0x3e7   :  { %3443 = vmatprep.subr.bf16.mxu1 %v5493_v23  ;;  %5515 = vst [vmem:[#allocation44_spill] sm:$0xff] %v4613_v12 }
 0x3e9   :  { %3404 = vmatpush3.bf16.msra.mxu0 %v4201_v39  ;;  %v4568_v39 = vld [vmem:[#allocation6] sm:$0xff] }
 0x3ea   :  { %3405 = vmatprep.subr.bf16.mxu0 %v5493_v23  ;;  %3444 = vmatpush3.bf16.msra.mxu1 %v4360_v13  ;;  %v4616_v13 = vld [vmem:[#allocation11 + $0xc] sm:$0xf] }
 0x3eb   :  { %3445 = vmatprep.subr.bf16.mxu1 %v5493_v23 }
 0x3ed   :  { %3406 = vmatpush3.bf16.msra.mxu0 %v4211_v42  ;;  %v4570_v42 = vld [vmem:[#allocation6 + $0x20] sm:$0xff] }
 0x3ee   :  { %3407 = vmatprep.subr.bf16.mxu0 %v5493_v23  ;;  %3446 = vmatpush3.bf16.msra.mxu1 %v4366_v14  ;;  %v4619_v14 = vld [vmem:[#allocation7] sm:$0xff] }
 0x3ef   :  { %3447 = vmatprep.subr.bf16.mxu1 %v5493_v23  ;;  %5516 = vst [vmem:[#allocation45_spill] sm:$0xff] %v4619_v14 }
 0x3f1   :  { %3408 = vmatpush3.bf16.msra.mxu0 %v4221_v46  ;;  %v4575_v46 = vld [vmem:[#allocation6 + $0x18] sm:$0xff] }
 0x3f2   :  { %3413 = vmatprep.subr.bf16.mxu0 %v5493_v23  ;;  %3448 = vmatpush3.bf16.msra.mxu1 %v4372_v15  ;;  %v4621_v15 = vld [vmem:[#allocation7 + $0x20] sm:$0xff] }
 0x3f3   :  { %3453 = vmatprep.subr.bf16.mxu1 %v5493_v23  ;;  %5517 = vst [vmem:[#allocation46_spill] sm:$0xff] %v4621_v15 }
 0x3f4   :  { %3410 = vmatmul.mubr.bf16.vlgmr.msra.gmra.mrb[24].mxu0 %v4469_v19  ;;  %v4630_v19 = vld [vmem:[#allocation7 + $0x38] sm:$0xff] }
 0x3f5   :  { %3414 = vmatpush3.bf16.msra.mxu0 %v4231_v49  ;;  %3429 = vmatprep.mubr.msk.bf16.mxu0 %vm4014_vm1, %v5493_v23  ;;  %v4578_v49 = vld [vmem:[#allocation6 + $0x38] sm:$0xff]  ;;  %5519 = vst [vmem:[#allocation48_spill] sm:$0xff] %v4630_v19 }
 0x3f6   :  { %3415 = vmatprep.subr.bf16.mxu0 %v5493_v23 }
 0x3f9   :  { %3416 = vmatpush3.bf16.msra.mxu0 %v4244_v52  ;;  %v4581_v52 = vld [vmem:[#allocation6 + $0x30] sm:$0xff] }
 0x3fa   :  { %3417 = vmatprep.subr.bf16.mxu0 %v5493_v23 }
 0x3fd   :  { %3418 = vmatpush3.bf16.msra.mxu0 %v4254_v55  ;;  %v4584_v55 = vld [vmem:[#allocation6 + $0x50] sm:$0xff] }
 0x3fe   :  { %3419 = vmatprep.subr.bf16.mxu0 %v5493_v23 }
 0x401   :  { %3420 = vmatpush3.bf16.msra.mxu0 %v4264_v58  ;;  %v4586_v58 = vld [vmem:[#allocation6 + $0x48] sm:$0xff] }
 0x402   :  { %3421 = vmatprep.subr.bf16.mxu0 %v5493_v23 }
 0x405   :  { %3422 = vmatpush3.bf16.msra.mxu0 %v4274_v61  ;;  %v4588_v61 = vld [vmem:[#allocation6 + $0x68] sm:$0xff] }
 0x406   :  { %3423 = vmatprep.subr.bf16.mxu0 %v5493_v23 }
 0x409   :  { %3424 = vmatpush3.bf16.msra.mxu0 %v4284_v0  ;;  %v4593_v0 = vld [vmem:[#allocation6 + $0x60] sm:$0xff] }
 0x40a   :  { %3425 = vmatprep.subr.bf16.mxu0 %v5493_v23 }
 0x40d   :  { %3426 = vmatpush3.bf16.msra.mxu0 %v4294_v3  ;;  %v4595_v3 = vld [vmem:[#allocation6 + $0x80] sm:$0xff] }
 0x40e   :  { %3427 = vmatprep.subr.bf16.mxu0 %v5493_v23 }
 0x411   :  { %3428 = vmatpush3.bf16.msra.mxu0 %v4304_v6  ;;  %v4599_v6 = vld [vmem:[#allocation6 + $0x78] sm:$0xff] }
 0x412   :  { %1325 = vmatprep.subr.bf16.mxu0 %v4566_v36 }
 0x414   :  { %3430 = vmatmul.mubr.bf16.vlgmr.msra.gmra.mrb[28].mxu0 %v898_v1 }
 0x415   :  { %1357 = vmatprep.mubr.bf16.mxu0 %v5494_v2  ;;  %1326 = vmatpush1.bf16.msra.mxu0 %v4568_v39 }
 0x416   :  { %1327 = vmatprep.subr.bf16.mxu0 %v4570_v42 }
 0x419   :  { %1328 = vmatpush1.bf16.msra.mxu0 %v4575_v46 }
 0x41a   :  { %1329 = vmatprep.subr.bf16.mxu0 %v4578_v49 }
 0x41d   :  { %1330 = vmatpush1.bf16.msra.mxu0 %v4581_v52 }
 0x41e   :  { %1331 = vmatprep.subr.bf16.mxu0 %v4584_v55 }
 0x421   :  { %1332 = vmatpush1.bf16.msra.mxu0 %v4586_v58 }
 0x422   :  { %1333 = vmatprep.subr.bf16.mxu0 %v4588_v61 }
 0x425   :  { %1334 = vmatpush1.bf16.msra.mxu0 %v4593_v0 }
 0x426   :  { %1335 = vmatprep.subr.bf16.mxu0 %v4595_v3 }
 0x429   :  { %1336 = vmatpush1.bf16.msra.mxu0 %v4599_v6 }
 0x42a   :  { %1337 = vmatprep.subr.bf16.mxu0 %v4601_v7 }
 0x42d   :  { %1338 = vmatpush1.bf16.msra.mxu0 %v4605_v9 }
 0x42e   :  { %1339 = vmatprep.subr.bf16.mxu0 %v4607_v10 }
 0x431   :  { %1340 = vmatpush1.bf16.msra.mxu0 %v4611_v11 }
 0x432   :  { %1431 = vmatprep.subr.bf16.mxu0 %v4613_v12 }
 0x434   :  { %1358 = vmatmul.mubr.bf16.vlgmr.msra.gmra.mrb[32].mxu0 %v4616_v13 }
 0x435   :  { %1432 = vmatpush1.bf16.msra.mxu0 %v4619_v14  ;;  %1463 = vmatprep.mubr.bf16.mxu0 %v5494_v2 }
 0x436   :  { %1433 = vmatprep.subr.bf16.mxu0 %v4621_v15 }
 0x439   :  { %1434 = vmatpush1.bf16.msra.mxu0 %v4627_v60 }
 0x43a   :  { %1435 = vmatprep.subr.bf16.mxu0 %v4630_v19 }
 0x43d   :  { %1436 = vmatpush1.bf16.msra.mxu0 %v4633_v57 }
 0x43e   :  { %1437 = vmatprep.subr.bf16.mxu0 %v4636_v20 }
 0x441   :  { %1438 = vmatpush1.bf16.msra.mxu0 %v4639_v21 }
 0x442   :  { %1439 = vmatprep.subr.bf16.mxu0 %v4642_v24 }
 0x445   :  { %1440 = vmatpush1.bf16.msra.mxu0 %v4644_v25 }
 0x446   :  { %1441 = vmatprep.subr.bf16.mxu0 %v4646_v28 }
 0x449   :  { %1442 = vmatpush1.bf16.msra.mxu0 %v4651_v17 }
 0x44a   :  { %1443 = vmatprep.subr.bf16.mxu0 %v4653_v29 }
 0x44d   :  { %1444 = vmatpush1.bf16.msra.mxu0 %v4657_v31 }
 0x44e   :  { %1445 = vmatprep.subr.bf16.mxu0 %v4659_v32 }
 0x451   :  { %1446 = vmatpush1.bf16.msra.mxu0 %v4663_v8 }
 0x452   :  { %3493 = vmatprep.subr.bf16.mxu0 %v5493_v23 }
 0x4a7   :  { %v941_v34 = vpop.f32.mrb[20].mxu0  ;;  %v1145_v35 = vpop.f32.mrb[24].mxu1 }
 0x4a8   :  { %v947_v37 = vpack.c.bf16 %v941_v34, %v941_v34  ;;  %v1192_v38 = vadd.f32 %v1145_v35, %v4542_v26  ;;  %v3391_v40 = vpop.f32.mrb[21].mxu0  ;;  %v1147_v41 = vpop.f32.mrb[25].mxu1  ;;  %v4669_v43 = vadd.f32 %v941_v34, %v4492_v16 }
 0x4a9   :  { %v1200_v47 = vadd.f32 %v1147_v41, %v4546_v27  ;;  %v944_v50 = vpop.f32.mrb[22].mxu0  ;;  %v1149_v53 = vpop.f32.mrb[26].mxu1 }
 0x4aa   :  { %5531 = vst [vmem:[#allocation60_spill] sm:$0xff] %v4669_v43  ;;  %949 = vst [vmem:[#allocation14 + $0x4] sm:$0xf] %v947_v37  ;;  %v3392_v56 = vpop.f32.mrb[23].mxu0  ;;  %v1150_v18 = vpop.f32.mrb[27].mxu1  ;;  %951 = vmax.xlane.f32.xlu0 %v4669_v43  ;;  %v1193_v45 = vadd.f32 %v4380_v59, %v1192_v38  ;;  %v4800_v43 = vld [vmem:[#allocation8 + $0x10] sm:$0xff] }
 0x4ab   :  { %v1201_v30 = vadd.f32 %v4383_v4, %v1200_v47 }
 0x4ac   :  { %v3003_v1 = vmul.f32 -1.442695, %v1193_v45 }
 0x4ad   :  { %v3004_v33 = vmul.f32 -1.442695, %v1201_v30 }
 0x4ae   :  { %3799 = vpow2.f32 %v3003_v1 }
 0x4af   :  { %3801 = vpow2.f32 %v3004_v33 }
 0x4b8   :  { %v3800_v34 = vpop.eup %3799 }
 0x4b9   :  { %v1197_v27 = vadd.f32 1.0, %v3800_v34  ;;  %v3802_v35 = vpop.eup %3801 }
 0x4ba   :  { %v1205_v37 = vadd.f32 1.0, %v3802_v35  ;;  %v4698_v35 = vld [vmem:[#allocation6 + $0x58] sm:$0xff] }
 0x4bb   :  { %3803 = vrcp.f32 %v1197_v27  ;;  %v4682_v27 = vld [vmem:[#allocation6 + $0x10] sm:$0xff] }
 0x4bc   :  { %3805 = vrcp.f32 %v1205_v37  ;;  %v4702_v37 = vld [vmem:[#allocation6 + $0x70] sm:$0xff] }
 0x4c5   :  { %v3804_v38 = vpop.eup %3803 }
 0x4c6   :  { %v3806_v47 = vpop.eup %3805 }
 0x4c7   :  { %v1080_v5 = vpop.f32.mrb[24].mxu0  ;;  %v1215_v30 = vmul.f32 %v3806_v47, %v4503_v51  ;;  %v4694_v51 = vld [vmem:[#allocation6 + $0x40] sm:$0xff] }
 0x4c8   :  { %v3411_v48 = vpop.f32.mrb[25].mxu0  ;;  %v1208_v56 = vadd.f32 %v4389_v22, %v1080_v5  ;;  %v4688_v5 = vld [vmem:[#allocation6 + $0x28] sm:$0xff] }
 0x4c9   :  { %v1083_v62 = vpop.f32.mrb[26].mxu0 }
 0x4ca   :  { %v3412_v26 = vpop.f32.mrb[27].mxu0  ;;  %v1213_v62 = vsub.f32 1.0, %v3806_v47 }
 0x4e7   :  { %v1186_v40 = vpop.f32.mrb[28].mxu0 }
 0x4e8   :  { %v1209_v41 = vadd.f32 %v4386_v54, %v1186_v40  ;;  %v3431_v50 = vpop.f32.mrb[29].mxu0  ;;  %v4706_v40 = vld [vmem:[#allocation6 + $0x88] sm:$0xff] }
 0x4e9   :  { %v1189_v53 = vpop.f32.mrb[30].mxu0  ;;  %v4714_v50 = vld [vmem:[#allocation6 + $0xb8] sm:$0xff] }
 0x4ea   :  { %v1210_v18 = vmul.f32 %v3804_v38, %v1209_v41  ;;  %v3432_v45 = vpop.f32.mrb[31].mxu0  ;;  %v4710_v41 = vld [vmem:[#allocation6 + $0xa0] sm:$0xff]  ;;  %v4718_v38 = vld [vmem:[#allocation7 + $0x10] sm:$0xff]  ;;  %v4725_v53 = vld [vmem:[#allocation7 + $0x28] sm:$0xff] }
 0x4eb   :  { %v4741_v45 = vld [vmem:[#allocation7 + $0x88] sm:$0xff] }
 0x4ec   :  { %v1211_v48 = vadd.f32 %v1210_v18, %v1208_v56  ;;  %v4729_v56 = vld [vmem:[#allocation7 + $0x40] sm:$0xff]  ;;  %v4737_v18 = vld [vmem:[#allocation7 + $0x70] sm:$0xff] }
 0x4ee   :  { %3807 = vtanh.f32 %v1211_v48 }
 0x4f8   :  { %v3808_v1 = vpop.eup %3807 }
 0x4f9   :  { %v1214_v26 = vmul.f32 %v3808_v1, %v1213_v62  ;;  %v4749_v1 = vld [vmem:[#allocation7 + $0xa0] sm:$0xff] }
 0x4fb   :  { %v4678_v33 = vadd.f32 %v1215_v30, %v1214_v26  ;;  %v4753_v30 = vld [vmem:[#allocation7 + $0xb8] sm:$0xff] }
 0x4fd   :  { %v1218_v34 = vpack.c.bf16 %v4678_v33, %v4678_v33 }
 0x4ff   :  { %3450 = vmatmul.mubr.bf16.vlgmr.msra.gmra.mrb[28].mxu1 %v1218_v34  ;;  %1464 = vmatmul.mubr.bf16.vlgmr.msra.gmra.mrb[36].mxu0 %v1218_v34 }
 0x500   :  { %3454 = vmatpush3.bf16.msra.mxu1 %v4682_v27  ;;  %3469 = vmatprep.mubr.msk.bf16.mxu1 %vm4014_vm1, %v5493_v23 }
 0x501   :  { %3455 = vmatprep.subr.bf16.mxu1 %v5493_v23  ;;  %3509 = vmatprep.mubr.msk.bf16.mxu0 %vm4014_vm1, %v5493_v23 }
 0x504   :  { %3456 = vmatpush3.bf16.msra.mxu1 %v4688_v5 }
 0x505   :  { %3457 = vmatprep.subr.bf16.mxu1 %v5493_v23 }
 0x507   :  { %v4743_v48 = vpop.f32.mrb[32].mxu0 }
 0x508   :  { %3458 = vmatpush3.bf16.msra.mxu1 %v4694_v51  ;;  %v4745_v47 = vpop.f32.mrb[33].mxu0 }
 0x509   :  { %3459 = vmatprep.subr.bf16.mxu1 %v5493_v23  ;;  %v1363_v62 = vpop.f32.mrb[34].mxu0 }
 0x50a   :  { %v1364_v26 = vpop.f32.mrb[35].mxu0  ;;  %v4776_v62 = vld [vmem:[#allocation11 + $0x10] sm:$0xf] }
 0x50b   :  { %v4782_v26 = vld [vmem:[#allocation8 + $0x8] sm:$0xff] }
 0x50c   :  { %3460 = vmatpush3.bf16.msra.mxu1 %v4698_v35 }
 0x50d   :  { %3461 = vmatprep.subr.bf16.mxu1 %v5493_v23 }
 0x510   :  { %3462 = vmatpush3.bf16.msra.mxu1 %v4702_v37 }
 0x511   :  { %3463 = vmatprep.subr.bf16.mxu1 %v5493_v23 }
 0x514   :  { %3464 = vmatpush3.bf16.msra.mxu1 %v4706_v40 }
 0x515   :  { %3465 = vmatprep.subr.bf16.mxu1 %v5493_v23 }
 0x518   :  { %3466 = vmatpush3.bf16.msra.mxu1 %v4710_v41 }
 0x519   :  { %3467 = vmatprep.subr.bf16.mxu1 %v5493_v23 }
 0x51c   :  { %3468 = vmatpush3.bf16.msra.mxu1 %v4714_v50 }
 0x51d   :  { %3473 = vmatprep.subr.bf16.mxu1 %v5493_v23 }
 0x51f   :  { %3470 = vmatmul.mubr.bf16.vlgmr.msra.gmra.mrb[32].mxu1 %v4616_v13  ;;  %v4733_v13 = vld [vmem:[#allocation7 + $0x58] sm:$0xff] }
 0x520   :  { %3474 = vmatpush3.bf16.msra.mxu1 %v4718_v38  ;;  %3489 = vmatprep.mubr.msk.bf16.mxu1 %vm4014_vm1, %v5493_v23 }
 0x521   :  { %3475 = vmatprep.subr.bf16.mxu1 %v5493_v23 }
 0x524   :  { %3476 = vmatpush3.bf16.msra.mxu1 %v4725_v53 }
 0x525   :  { %3477 = vmatprep.subr.bf16.mxu1 %v5493_v23 }
 0x528   :  { %3478 = vmatpush3.bf16.msra.mxu1 %v4729_v56 }
 0x529   :  { %3479 = vmatprep.subr.bf16.mxu1 %v5493_v23 }
 0x52c   :  { %3480 = vmatpush3.bf16.msra.mxu1 %v4733_v13 }
 0x52d   :  { %3481 = vmatprep.subr.bf16.mxu1 %v5493_v23 }
 0x530   :  { %3482 = vmatpush3.bf16.msra.mxu1 %v4737_v18 }
 0x531   :  { %3483 = vmatprep.subr.bf16.mxu1 %v5493_v23 }
 0x534   :  { %3484 = vmatpush3.bf16.msra.mxu1 %v4741_v45 }
 0x535   :  { %3485 = vmatprep.subr.bf16.mxu1 %v5493_v23 }
 0x538   :  { %3486 = vmatpush3.bf16.msra.mxu1 %v4749_v1 }
 0x539   :  { %3487 = vmatprep.subr.bf16.mxu1 %v5493_v23 }
 0x53c   :  { %3488 = vmatpush3.bf16.msra.mxu1 %v4753_v30 }
 0x53d   :  { %1645 = vmatprep.subr.bf16.mxu1 %v4566_v36 }
 0x53f   :  { %3490 = vmatmul.mubr.bf16.vlgmr.msra.gmra.mrb[36].mxu1 %v1218_v34  ;;  %v4774_v34 = vld [vmem:[#allocation8] sm:$0xff] }
 0x540   :  { %1646 = vmatpush1.bf16.msra.mxu1 %v4568_v39  ;;  %1677 = vmatprep.mubr.bf16.mxu1 %v5494_v2 }
 0x541   :  { %1647 = vmatprep.subr.bf16.mxu1 %v4570_v42  ;;  %3494 = vmatpush3.bf16.msra.mxu0 %v4774_v34 }
 0x542   :  { %3495 = vmatprep.subr.bf16.mxu0 %v5493_v23 }
 0x544   :  { %1648 = vmatpush1.bf16.msra.mxu1 %v4575_v46 }
 0x545   :  { %1649 = vmatprep.subr.bf16.mxu1 %v4578_v49  ;;  %3496 = vmatpush3.bf16.msra.mxu0 %v4782_v26 }
 0x546   :  { %3497 = vmatprep.subr.bf16.mxu0 %v5493_v23 }
 0x548   :  { %1650 = vmatpush1.bf16.msra.mxu1 %v4581_v52 }
 0x549   :  { %1651 = vmatprep.subr.bf16.mxu1 %v4584_v55  ;;  %3498 = vmatpush3.bf16.msra.mxu0 %v4800_v43 }
 0x54a   :  { %3499 = vmatprep.subr.bf16.mxu0 %v5493_v23 }
 0x54c   :  { %1652 = vmatpush1.bf16.msra.mxu1 %v4586_v58 }
 0x54d   :  { %1653 = vmatprep.subr.bf16.mxu1 %v4588_v61  ;;  %3500 = vmatpush3.bf16.msra.mxu0 %v4806_v44 }
 0x54e   :  { %3501 = vmatprep.subr.bf16.mxu0 %v5493_v23 }
 0x550   :  { %1654 = vmatpush1.bf16.msra.mxu1 %v4593_v0 }
 0x551   :  { %1655 = vmatprep.subr.bf16.mxu1 %v4595_v3  ;;  %3502 = vmatpush3.bf16.msra.mxu0 %v4810_v63 }
 0x552   :  { %3503 = vmatprep.subr.bf16.mxu0 %v5493_v23 }
 0x554   :  { %1656 = vmatpush1.bf16.msra.mxu1 %v4599_v6 }
 0x555   :  { %1657 = vmatprep.subr.bf16.mxu1 %v4601_v7 }
 0x558   :  { %1658 = vmatpush1.bf16.msra.mxu1 %v4605_v9 }
 0x559   :  { %1659 = vmatprep.subr.bf16.mxu1 %v4607_v10 }
 0x55c   :  { %1660 = vmatpush1.bf16.msra.mxu1 %v4611_v11 }
 0x55d   :  { %1751 = vmatprep.subr.bf16.mxu1 %v4613_v12 }
 0x55f   :  { %1678 = vmatmul.mubr.bf16.vlgmr.msra.gmra.mrb[40].mxu1 %v4776_v62 }
 0x560   :  { %1752 = vmatpush1.bf16.msra.mxu1 %v4619_v14  ;;  %1783 = vmatprep.mubr.bf16.mxu1 %v5494_v2 }
 0x561   :  { %1753 = vmatprep.subr.bf16.mxu1 %v4621_v15 }
 0x564   :  { %1754 = vmatpush1.bf16.msra.mxu1 %v4627_v60 }
 0x565   :  { %1755 = vmatprep.subr.bf16.mxu1 %v4630_v19 }
 0x568   :  { %1756 = vmatpush1.bf16.msra.mxu1 %v4633_v57 }
 0x569   :  { %1757 = vmatprep.subr.bf16.mxu1 %v4636_v20 }
 0x56c   :  { %1758 = vmatpush1.bf16.msra.mxu1 %v4639_v21 }
 0x56d   :  { %1759 = vmatprep.subr.bf16.mxu1 %v4642_v24 }
 0x570   :  { %1760 = vmatpush1.bf16.msra.mxu1 %v4644_v25 }
 0x571   :  { %1761 = vmatprep.subr.bf16.mxu1 %v4646_v28 }
 0x574   :  { %1762 = vmatpush1.bf16.msra.mxu1 %v4651_v17 }
 0x575   :  { %1763 = vmatprep.subr.bf16.mxu1 %v4653_v29 }
 0x578   :  { %1764 = vmatpush1.bf16.msra.mxu1 %v4657_v31  ;;  %v4822_v31 = vld [vmem:[#allocation8 + $0x38] sm:$0xff] }
 0x579   :  { %1765 = vmatprep.subr.bf16.mxu1 %v4659_v32  ;;  %v4814_v32 = vld [vmem:[#allocation8 + $0x28] sm:$0xff] }
 0x57a   :  { %3504 = vmatpush3.bf16.msra.mxu0 %v4814_v32 }
 0x57b   :  { %3505 = vmatprep.subr.bf16.mxu0 %v5493_v23 }
 0x57c   :  { %1766 = vmatpush1.bf16.msra.mxu1 %v4663_v8  ;;  %v4818_v8 = vld [vmem:[#allocation8 + $0x30] sm:$0xff] }
 0x57d   :  { %3553 = vmatprep.subr.bf16.mxu1 %v5493_v23 }
 0x57e   :  { %3506 = vmatpush3.bf16.msra.mxu0 %v4818_v8 }
 0x57f   :  { %3507 = vmatprep.subr.bf16.mxu0 %v5493_v23 }
 0x582   :  { %3508 = vmatpush3.bf16.msra.mxu0 %v4822_v31 }
 0x583   :  { %3513 = vmatprep.subr.bf16.mxu0 %v5493_v23 }
 0x5d2   :  { %v1261_v29 = vpop.f32.mrb[28].mxu1  ;;  %v1465_v17 = vpop.f32.mrb[36].mxu0 }
 0x5d3   :  { %v1267_v28 = vpack.c.bf16 %v1261_v29, %v1261_v29  ;;  %v1512_v25 = vadd.f32 %v1465_v17, %v4743_v48  ;;  %v3451_v24 = vpop.f32.mrb[29].mxu1  ;;  %v1467_v21 = vpop.f32.mrb[37].mxu0  ;;  %v4828_v20 = vadd.f32 %v1261_v29, %v4492_v16 }
 0x5d4   :  { %v1520_v57 = vadd.f32 %v1467_v21, %v4745_v47  ;;  %v1264_v19 = vpop.f32.mrb[30].mxu1  ;;  %v1469_v60 = vpop.f32.mrb[38].mxu0 }
 0x5d5   :  { %1269 = vst [vmem:[#allocation14 + $0x8] sm:$0xf] %v1267_v28  ;;  %v3452_v15 = vpop.f32.mrb[31].mxu1  ;;  %v1470_v14 = vpop.f32.mrb[39].mxu0  ;;  %1271 = vmax.xlane.f32.xlu1 %v4828_v20  ;;  %v1513_v12 = vadd.f32 %v4380_v59, %v1512_v25 }
 0x5d6   :  { %v1521_v29 = vadd.f32 %v4383_v4, %v1520_v57 }
 0x5d7   :  { %v3006_v17 = vmul.f32 -1.442695, %v1513_v12 }
 0x5d8   :  { %v3007_v48 = vmul.f32 -1.442695, %v1521_v29 }
 0x5d9   :  { %3809 = vpow2.f32 %v3006_v17 }
 0x5da   :  { %3811 = vpow2.f32 %v3007_v48 }
 0x5e3   :  { %v3810_v16 = vpop.eup %3809 }
 0x5e4   :  { %v1517_v19 = vadd.f32 1.0, %v3810_v16  ;;  %v3812_v60 = vpop.eup %3811 }
 0x5e5   :  { %v1525_v15 = vadd.f32 1.0, %v3812_v60  ;;  %v5546_v60 = vld [vmem:[#allocation55_spill] sm:$0xff] }
 0x5e6   :  { %3813 = vrcp.f32 %v1517_v19  ;;  %v5545_v19 = vld [vmem:[#allocation54_spill] sm:$0xff] }
 0x5e7   :  { %3815 = vrcp.f32 %v1525_v15  ;;  %v5547_v15 = vld [vmem:[#allocation56_spill] sm:$0xff] }
 0x5f0   :  { %v3814_v59 = vpop.eup %3813 }
 0x5f1   :  { %v3816_v4 = vpop.eup %3815 }
 0x5f2   :  { %v1400_v11 = vpop.f32.mrb[32].mxu1  ;;  %v1533_v57 = vsub.f32 1.0, %v3816_v4 }
 0x5f3   :  { %v3471_v10 = vpop.f32.mrb[33].mxu1 }
 0x5f4   :  { %v1403_v9 = vpop.f32.mrb[34].mxu1 }
 0x5f5   :  { %v3472_v24 = vpop.f32.mrb[35].mxu1  ;;  %v1528_v9 = vadd.f32 %v4389_v22, %v1400_v11 }
 0x5f6   :  { %v1535_v24 = vmul.f32 %v3816_v4, %v4678_v33  ;;  %v5551_v4 = vld [vmem:[#allocation39_spill] sm:$0xff] }
 0x612   :  { %v1506_v14 = vpop.f32.mrb[36].mxu1 }
 0x613   :  { %v1529_v21 = vadd.f32 %v4386_v54, %v1506_v14  ;;  %v3491_v28 = vpop.f32.mrb[37].mxu1  ;;  %v5548_v14 = vld [vmem:[#allocation57_spill] sm:$0xff] }
 0x614   :  { %v1509_v25 = vpop.f32.mrb[38].mxu1  ;;  %v5550_v28 = vld [vmem:[#allocation59_spill] sm:$0xff] }
 0x615   :  { %v1530_v10 = vmul.f32 %v3814_v59, %v1529_v21  ;;  %v3492_v12 = vpop.f32.mrb[39].mxu1  ;;  %v5549_v21 = vld [vmem:[#allocation58_spill] sm:$0xff] }
 0x617   :  { %v1531_v47 = vadd.f32 %v1530_v10, %v1528_v9 }
 0x619   :  { %3817 = vtanh.f32 %v1531_v47 }
 0x623   :  { %v3818_v17 = vpop.eup %3817 }
 0x624   :  { %v1534_v16 = vmul.f32 %v3818_v17, %v1533_v57 }
 0x626   :  { %v4837_v29 = vadd.f32 %v1535_v24, %v1534_v16 }
 0x628   :  { %v1538_v54 = vpack.c.bf16 %v4837_v29, %v4837_v29 }
 0x62a   :  { %3510 = vmatmul.mubr.bf16.vlgmr.msra.gmra.mrb[40].mxu0 %v1538_v54  ;;  %1784 = vmatmul.mubr.bf16.vlgmr.msra.gmra.mrb[44].mxu1 %v1538_v54 }
 0x62b   :  { %3514 = vmatpush3.bf16.msra.mxu0 %v4682_v27  ;;  %3529 = vmatprep.mubr.msk.bf16.mxu0 %vm4014_vm1, %v5493_v23 }
 0x62c   :  { %3515 = vmatprep.subr.bf16.mxu0 %v5493_v23  ;;  %3554 = vmatpush3.bf16.msra.mxu1 %v4774_v34 }
 0x62d   :  { %3555 = vmatprep.subr.bf16.mxu1 %v5493_v23  ;;  %3569 = vmatprep.mubr.msk.bf16.mxu1 %vm4014_vm1, %v5493_v23 }
 0x62f   :  { %3516 = vmatpush3.bf16.msra.mxu0 %v4688_v5 }
 0x630   :  { %3517 = vmatprep.subr.bf16.mxu0 %v5493_v23  ;;  %3556 = vmatpush3.bf16.msra.mxu1 %v4782_v26 }
 0x631   :  { %3557 = vmatprep.subr.bf16.mxu1 %v5493_v23 }
 0x632   :  { %v4876_v22 = vpop.f32.mrb[40].mxu1 }
 0x633   :  { %3518 = vmatpush3.bf16.msra.mxu0 %v4694_v51  ;;  %v4880_v11 = vpop.f32.mrb[41].mxu1 }
 0x634   :  { %3519 = vmatprep.subr.bf16.mxu0 %v5493_v23  ;;  %3558 = vmatpush3.bf16.msra.mxu1 %v4800_v43  ;;  %v1683_v33 = vpop.f32.mrb[42].mxu1 }
 0x635   :  { %3559 = vmatprep.subr.bf16.mxu1 %v5493_v23  ;;  %v1684_v48 = vpop.f32.mrb[43].mxu1 }
 0x636   :  { %v4943_v48 = vld [vmem:[#allocation5] ss:$0 sm:$0xff] }
 0x637   :  { %3520 = vmatpush3.bf16.msra.mxu0 %v4698_v35 }
 0x638   :  { %3521 = vmatprep.subr.bf16.mxu0 %v5493_v23  ;;  %3560 = vmatpush3.bf16.msra.mxu1 %v4806_v44 }
 0x639   :  { %3561 = vmatprep.subr.bf16.mxu1 %v5493_v23 }
 0x63b   :  { %3522 = vmatpush3.bf16.msra.mxu0 %v4702_v37 }
 0x63c   :  { %3523 = vmatprep.subr.bf16.mxu0 %v5493_v23  ;;  %3562 = vmatpush3.bf16.msra.mxu1 %v4810_v63 }
 0x63d   :  { %3563 = vmatprep.subr.bf16.mxu1 %v5493_v23 }
 0x63f   :  { %3524 = vmatpush3.bf16.msra.mxu0 %v4706_v40 }
 0x640   :  { %3525 = vmatprep.subr.bf16.mxu0 %v5493_v23  ;;  %3564 = vmatpush3.bf16.msra.mxu1 %v4814_v32 }
 0x641   :  { %3565 = vmatprep.subr.bf16.mxu1 %v5493_v23 }
 0x643   :  { %3526 = vmatpush3.bf16.msra.mxu0 %v4710_v41 }
 0x644   :  { %3527 = vmatprep.subr.bf16.mxu0 %v5493_v23  ;;  %3566 = vmatpush3.bf16.msra.mxu1 %v4818_v8 }
 0x645   :  { %3567 = vmatprep.subr.bf16.mxu1 %v5493_v23 }
 0x647   :  { %3528 = vmatpush3.bf16.msra.mxu0 %v4714_v50 }
 0x648   :  { %3533 = vmatprep.subr.bf16.mxu0 %v5493_v23  ;;  %3568 = vmatpush3.bf16.msra.mxu1 %v4822_v31 }
 0x649   :  { %3573 = vmatprep.subr.bf16.mxu1 %v5493_v23 }
 0x64a   :  { %3530 = vmatmul.mubr.bf16.vlgmr.msra.gmra.mrb[44].mxu0 %v4776_v62  ;;  %v5544_v62 = vld [vmem:[#allocation53_spill] sm:$0xff] }
 0x64b   :  { %3534 = vmatpush3.bf16.msra.mxu0 %v4718_v38  ;;  %3549 = vmatprep.mubr.msk.bf16.mxu0 %vm4014_vm1, %v5493_v23 }
 0x64c   :  { %3535 = vmatprep.subr.bf16.mxu0 %v5493_v23 }
 0x64f   :  { %3536 = vmatpush3.bf16.msra.mxu0 %v4725_v53 }
 0x650   :  { %3537 = vmatprep.subr.bf16.mxu0 %v5493_v23 }
 0x653   :  { %3538 = vmatpush3.bf16.msra.mxu0 %v4729_v56 }
 0x654   :  { %3539 = vmatprep.subr.bf16.mxu0 %v5493_v23 }
 0x657   :  { %3540 = vmatpush3.bf16.msra.mxu0 %v4733_v13 }
 0x658   :  { %3541 = vmatprep.subr.bf16.mxu0 %v5493_v23 }
 0x65b   :  { %3542 = vmatpush3.bf16.msra.mxu0 %v4737_v18 }
 0x65c   :  { %3543 = vmatprep.subr.bf16.mxu0 %v5493_v23 }
 0x65f   :  { %3544 = vmatpush3.bf16.msra.mxu0 %v4741_v45 }
 0x660   :  { %3545 = vmatprep.subr.bf16.mxu0 %v5493_v23 }
 0x663   :  { %3546 = vmatpush3.bf16.msra.mxu0 %v4749_v1 }
 0x664   :  { %3547 = vmatprep.subr.bf16.mxu0 %v5493_v23 }
 0x667   :  { %3548 = vmatpush3.bf16.msra.mxu0 %v4753_v30 }
 0x668   :  { %1965 = vmatprep.subr.bf16.mxu0 %v4566_v36  ;;  %v5532_v36 = vld [vmem:[#allocation41_spill] sm:$0xff] }
 0x66a   :  { %3550 = vmatmul.mubr.bf16.vlgmr.msra.gmra.mrb[48].mxu0 %v1538_v54 }
 0x66b   :  { %1966 = vmatpush1.bf16.msra.mxu0 %v4568_v39  ;;  %1997 = vmatprep.mubr.bf16.mxu0 %v5494_v2  ;;  %v5533_v39 = vld [vmem:[#allocation42_spill] sm:$0xff] }
 0x66c   :  { %1967 = vmatprep.subr.bf16.mxu0 %v4570_v42  ;;  %v5534_v42 = vld [vmem:[#allocation43_spill] sm:$0xff] }
 0x66f   :  { %1968 = vmatpush1.bf16.msra.mxu0 %v4575_v46  ;;  %v5535_v46 = vld [vmem:[#allocation44_spill] sm:$0xff] }
 0x670   :  { %1969 = vmatprep.subr.bf16.mxu0 %v4578_v49  ;;  %v4917_v49 = vld [vmem:[#allocation11 + $0x14] sm:$0xf] }
 0x673   :  { %1970 = vmatpush1.bf16.msra.mxu0 %v4581_v52  ;;  %v5536_v52 = vld [vmem:[#allocation45_spill] sm:$0xff] }
 0x674   :  { %1971 = vmatprep.subr.bf16.mxu0 %v4584_v55  ;;  %v5537_v55 = vld [vmem:[#allocation46_spill] sm:$0xff] }
 0x677   :  { %1972 = vmatpush1.bf16.msra.mxu0 %v4586_v58  ;;  %v5538_v58 = vld [vmem:[#allocation47_spill] sm:$0xff] }
 0x678   :  { %1973 = vmatprep.subr.bf16.mxu0 %v4588_v61  ;;  %v5539_v61 = vld [vmem:[#allocation48_spill] sm:$0xff] }
 0x67b   :  { %1974 = vmatpush1.bf16.msra.mxu0 %v4593_v0  ;;  %v5540_v0 = vld [vmem:[#allocation49_spill] sm:$0xff] }
 0x67c   :  { %1975 = vmatprep.subr.bf16.mxu0 %v4595_v3  ;;  %v5541_v3 = vld [vmem:[#allocation50_spill] sm:$0xff] }
 0x67f   :  { %1976 = vmatpush1.bf16.msra.mxu0 %v4599_v6  ;;  %v5542_v6 = vld [vmem:[#allocation51_spill] sm:$0xff] }
 0x680   :  { %1977 = vmatprep.subr.bf16.mxu0 %v4601_v7  ;;  %v5543_v7 = vld [vmem:[#allocation52_spill] sm:$0xff] }
 0x683   :  { %1978 = vmatpush1.bf16.msra.mxu0 %v5532_v36 }
 0x684   :  { %1979 = vmatprep.subr.bf16.mxu0 %v5533_v39 }
 0x687   :  { %1980 = vmatpush1.bf16.msra.mxu0 %v5534_v42 }
 0x688   :  { %2071 = vmatprep.subr.bf16.mxu0 %v5535_v46 }
 0x68a   :  { %1998 = vmatmul.mubr.bf16.vlgmr.msra.gmra.mrb[52].mxu0 %v4917_v49 }
 0x68b   :  { %2072 = vmatpush1.bf16.msra.mxu0 %v5536_v52  ;;  %2103 = vmatprep.mubr.bf16.mxu0 %v5494_v2 }
 0x68c   :  { %2073 = vmatprep.subr.bf16.mxu0 %v5537_v55  ;;  %v4946_v55 = vld [vmem:[#allocation5 + $0x1] ss:$0 sm:$0xff] }
 0x68f   :  { %2074 = vmatpush1.bf16.msra.mxu0 %v5538_v58 }
 0x690   :  { %2075 = vmatprep.subr.bf16.mxu0 %v5539_v61 }
 0x693   :  { %2076 = vmatpush1.bf16.msra.mxu0 %v5540_v0 }
 0x694   :  { %2077 = vmatprep.subr.bf16.mxu0 %v5541_v3 }
 0x697   :  { %2078 = vmatpush1.bf16.msra.mxu0 %v5542_v6 }
 0x698   :  { %2079 = vmatprep.subr.bf16.mxu0 %v5543_v7 }
 0x69b   :  { %2080 = vmatpush1.bf16.msra.mxu0 %v5544_v62  ;;  %v4949_v62 = vld [vmem:[#allocation5 + $0x3] ss:$0 sm:$0xff] }
 0x69c   :  { %2081 = vmatprep.subr.bf16.mxu0 %v5545_v19 }
 0x69f   :  { %2082 = vmatpush1.bf16.msra.mxu0 %v5546_v60 }
 0x6a0   :  { %2083 = vmatprep.subr.bf16.mxu0 %v5547_v15 }
 0x6a3   :  { %2084 = vmatpush1.bf16.msra.mxu0 %v5548_v14 }
 0x6a4   :  { %2085 = vmatprep.subr.bf16.mxu0 %v5549_v21  ;;  %v4952_v21 = vld [vmem:[#allocation5 + $0x2] ss:$0 sm:$0xff] }
 0x6a7   :  { %2086 = vmatpush1.bf16.msra.mxu0 %v5550_v28 }
 0x6a8   :  { %3613 = vmatprep.subr.bf16.mxu0 %v5493_v23 }
 0x6fd   :  { %v1581_v59 = vpop.f32.mrb[40].mxu0  ;;  %v1785_v25 = vpop.f32.mrb[44].mxu1 }
 0x6fe   :  { %v1587_v9 = vpack.c.bf16 %v1581_v59, %v1581_v59  ;;  %v1832_v10 = vadd.f32 %v1785_v25, %v4876_v22  ;;  %v3511_v12 = vpop.f32.mrb[41].mxu0  ;;  %v1787_v47 = vpop.f32.mrb[45].mxu1  ;;  %v4939_v57 = vadd.f32 %v1581_v59, %v5551_v4 }
 0x6ff   :  { %v1840_v17 = vadd.f32 %v1787_v47, %v4880_v11  ;;  %v1584_v16 = vpop.f32.mrb[42].mxu0  ;;  %v1789_v24 = vpop.f32.mrb[46].mxu1 }
 0x700   :  { %1589 = vst [vmem:[#allocation14 + $0xc] sm:$0xf] %v1587_v9  ;;  %v3512_v54 = vpop.f32.mrb[43].mxu0  ;;  %v1790_v33 = vpop.f32.mrb[47].mxu1  ;;  %1591 = vmax.xlane.f32.xlu1 %v4939_v57  ;;  %v1833_v36 = vadd.f32 %v4943_v48, %v1832_v10 }
 0x701   :  { %v1841_v11 = vadd.f32 %v4946_v55, %v1840_v17  ;;  %v5086_v33 = vld [vmem:[#allocation7 + $0x30] sm:$0xff] }
 0x702   :  { %v3009_v46 = vmul.f32 -1.442695, %v1833_v36  ;;  %v5089_v36 = vld [vmem:[#allocation7 + $0x50] sm:$0xff] }
 0x703   :  { %v3010_v58 = vmul.f32 -1.442695, %v1841_v11  ;;  %v5106_v11 = vld [vmem:[#allocation7 + $0x98] sm:$0xff] }
 0x704   :  { %3819 = vpow2.f32 %v3009_v46  ;;  %v5099_v46 = vld [vmem:[#allocation7 + $0x80] sm:$0xff] }
 0x705   :  { %3821 = vpow2.f32 %v3010_v58  ;;  %v5110_v58 = vld [vmem:[#allocation7 + $0x90] sm:$0xff] }
 0x70e   :  { %v3820_v61 = vpop.eup %3819 }
 0x70f   :  { %v1837_v0 = vadd.f32 1.0, %v3820_v61  ;;  %v3822_v3 = vpop.eup %3821  ;;  %v5112_v61 = vld [vmem:[#allocation7 + $0xb0] sm:$0xff] }
 0x710   :  { %v1845_v6 = vadd.f32 1.0, %v3822_v3 }
 0x711   :  { %3823 = vrcp.f32 %v1837_v0  ;;  %v5116_v0 = vld [vmem:[#allocation7 + $0xa8] sm:$0xff] }
 0x712   :  { %3825 = vrcp.f32 %v1845_v6 }
 0x71b   :  { %v3824_v15 = vpop.eup %3823 }
 0x71c   :  { %v3826_v10 = vpop.eup %3825 }
 0x71d   :  { %v1720_v39 = vpop.f32.mrb[44].mxu0  ;;  %v1853_v12 = vsub.f32 1.0, %v3826_v10  ;;  %v1855_v16 = vmul.f32 %v3826_v10, %v4837_v29  ;;  %v5080_v29 = vld [vmem:[#allocation7 + $0x18] sm:$0xff] }
 0x71e   :  { %v3531_v22 = vpop.f32.mrb[45].mxu0  ;;  %v1848_v28 = vadd.f32 %v4952_v21, %v1720_v39  ;;  %v5092_v39 = vld [vmem:[#allocation7 + $0x48] sm:$0xff] }
 0x71f   :  { %v1723_v42 = vpop.f32.mrb[46].mxu0  ;;  %v5095_v22 = vld [vmem:[#allocation7 + $0x68] sm:$0xff] }
 0x720   :  { %v3532_v52 = vpop.f32.mrb[47].mxu0  ;;  %v5097_v42 = vld [vmem:[#allocation7 + $0x60] sm:$0xff] }
 0x721   :  { %v5104_v52 = vld [vmem:[#allocation7 + $0x78] sm:$0xff] }
 0x73d   :  { %v1826_v7 = vpop.f32.mrb[48].mxu0 }
 0x73e   :  { %v1849_v19 = vadd.f32 %v4949_v62, %v1826_v7  ;;  %v3551_v60 = vpop.f32.mrb[49].mxu0 }
 0x73f   :  { %v1829_v14 = vpop.f32.mrb[50].mxu0 }
 0x740   :  { %v1850_v59 = vmul.f32 %v3824_v15, %v1849_v19  ;;  %v3552_v25 = vpop.f32.mrb[51].mxu0 }
 0x742   :  { %v1851_v9 = vadd.f32 %v1850_v59, %v1848_v28 }
 0x744   :  { %3827 = vtanh.f32 %v1851_v9 }
 0x74e   :  { %v3828_v47 = vpop.eup %3827 }
 0x74f   :  { %v1854_v17 = vmul.f32 %v3828_v47, %v1853_v12 }
 0x751   :  { %v4956_v24 = vadd.f32 %v1855_v16, %v1854_v17 }
 0x753   :  { %v1858_v54 = vpack.c.bf16 %v4956_v24, %v4956_v24 }
 0x755   :  { %3570 = vmatmul.mubr.bf16.vlgmr.msra.gmra.mrb[48].mxu1 %v1858_v54  ;;  %2104 = vmatmul.mubr.bf16.vlgmr.msra.gmra.mrb[56].mxu0 %v1858_v54 }
 0x756   :  { %3574 = vmatpush3.bf16.msra.mxu1 %v4682_v27  ;;  %3589 = vmatprep.mubr.msk.bf16.mxu1 %vm4014_vm1, %v5493_v23  ;;  %v5023_v27 = vld [vmem:[#allocation6 + $0x20] sm:$0xff] }
 0x757   :  { %3575 = vmatprep.subr.bf16.mxu1 %v5493_v23  ;;  %3614 = vmatpush3.bf16.msra.mxu0 %v4774_v34  ;;  %v5072_v34 = vld [vmem:[#allocation7] sm:$0xff] }
 0x758   :  { %3615 = vmatprep.subr.bf16.mxu0 %v5493_v23  ;;  %3629 = vmatprep.mubr.msk.bf16.mxu0 %vm4014_vm1, %v5493_v23 }
 0x75a   :  { %3576 = vmatpush3.bf16.msra.mxu1 %v4688_v5  ;;  %v5028_v5 = vld [vmem:[#allocation6 + $0x18] sm:$0xff] }
 0x75b   :  { %3577 = vmatprep.subr.bf16.mxu1 %v5493_v23  ;;  %3616 = vmatpush3.bf16.msra.mxu0 %v4782_v26  ;;  %v5074_v26 = vld [vmem:[#allocation7 + $0x20] sm:$0xff] }
 0x75c   :  { %3617 = vmatprep.subr.bf16.mxu0 %v5493_v23 }
 0x75e   :  { %3578 = vmatpush3.bf16.msra.mxu1 %v4694_v51  ;;  %v5031_v51 = vld [vmem:[#allocation6 + $0x38] sm:$0xff] }
 0x75f   :  { %3579 = vmatprep.subr.bf16.mxu1 %v5493_v23  ;;  %3618 = vmatpush3.bf16.msra.mxu0 %v4800_v43  ;;  %v5021_v43 = vld [vmem:[#allocation6] sm:$0xff] }
 0x760   :  { %3619 = vmatprep.subr.bf16.mxu0 %v5493_v23 }
 0x762   :  { %3580 = vmatpush3.bf16.msra.mxu1 %v4698_v35  ;;  %v5034_v35 = vld [vmem:[#allocation6 + $0x30] sm:$0xff] }
 0x763   :  { %3581 = vmatprep.subr.bf16.mxu1 %v5493_v23  ;;  %3620 = vmatpush3.bf16.msra.mxu0 %v4806_v44  ;;  %v4995_v44 = vpop.f32.mrb[52].mxu0 }
 0x764   :  { %3621 = vmatprep.subr.bf16.mxu0 %v5493_v23 }
 0x766   :  { %3582 = vmatpush3.bf16.msra.mxu1 %v4702_v37  ;;  %v5037_v37 = vld [vmem:[#allocation6 + $0x50] sm:$0xff] }
 0x767   :  { %3583 = vmatprep.subr.bf16.mxu1 %v5493_v23  ;;  %3622 = vmatpush3.bf16.msra.mxu0 %v4810_v63  ;;  %v4999_v63 = vpop.f32.mrb[53].mxu0 }
 0x768   :  { %3623 = vmatprep.subr.bf16.mxu0 %v5493_v23 }
 0x76a   :  { %3584 = vmatpush3.bf16.msra.mxu1 %v4706_v40  ;;  %v5039_v40 = vld [vmem:[#allocation6 + $0x48] sm:$0xff] }
 0x76b   :  { %3585 = vmatprep.subr.bf16.mxu1 %v5493_v23  ;;  %3624 = vmatpush3.bf16.msra.mxu0 %v4814_v32  ;;  %v2003_v32 = vpop.f32.mrb[54].mxu0 }
 0x76c   :  { %3625 = vmatprep.subr.bf16.mxu0 %v5493_v23 }
 0x76e   :  { %3586 = vmatpush3.bf16.msra.mxu1 %v4710_v41  ;;  %v5041_v41 = vld [vmem:[#allocation6 + $0x68] sm:$0xff] }
 0x76f   :  { %3587 = vmatprep.subr.bf16.mxu1 %v5493_v23  ;;  %3626 = vmatpush3.bf16.msra.mxu0 %v4818_v8  ;;  %v2004_v8 = vpop.f32.mrb[55].mxu0 }
 0x770   :  { %3627 = vmatprep.subr.bf16.mxu0 %v5493_v23 }
 0x772   :  { %3588 = vmatpush3.bf16.msra.mxu1 %v4714_v50  ;;  %v5046_v50 = vld [vmem:[#allocation6 + $0x60] sm:$0xff] }
 0x773   :  { %3593 = vmatprep.subr.bf16.mxu1 %v5493_v23  ;;  %3628 = vmatpush3.bf16.msra.mxu0 %v4822_v31  ;;  %v5019_v31 = vld [vmem:[#allocation6 + $0x8] sm:$0xff] }
 0x774   :  { %3633 = vmatprep.subr.bf16.mxu0 %v5493_v23 }
 0x775   :  { %3590 = vmatmul.mubr.bf16.vlgmr.msra.gmra.mrb[52].mxu1 %v4917_v49  ;;  %v5083_v49 = vld [vmem:[#allocation7 + $0x38] sm:$0xff] }
 0x776   :  { %3594 = vmatpush3.bf16.msra.mxu1 %v4718_v38  ;;  %3609 = vmatprep.mubr.msk.bf16.mxu1 %vm4014_vm1, %v5493_v23  ;;  %v5048_v38 = vld [vmem:[#allocation6 + $0x80] sm:$0xff] }
 0x777   :  { %3595 = vmatprep.subr.bf16.mxu1 %v5493_v23 }
 0x77a   :  { %3596 = vmatpush3.bf16.msra.mxu1 %v4725_v53  ;;  %v5052_v53 = vld [vmem:[#allocation6 + $0x78] sm:$0xff] }
 0x77b   :  { %3597 = vmatprep.subr.bf16.mxu1 %v5493_v23 }
 0x77e   :  { %3598 = vmatpush3.bf16.msra.mxu1 %v4729_v56  ;;  %v5054_v56 = vld [vmem:[#allocation6 + $0x98] sm:$0xff] }
 0x77f   :  { %3599 = vmatprep.subr.bf16.mxu1 %v5493_v23 }
 0x782   :  { %3600 = vmatpush3.bf16.msra.mxu1 %v4733_v13  ;;  %v5058_v13 = vld [vmem:[#allocation6 + $0x90] sm:$0xff] }
 0x783   :  { %3601 = vmatprep.subr.bf16.mxu1 %v5493_v23 }
 0x786   :  { %3602 = vmatpush3.bf16.msra.mxu1 %v4737_v18  ;;  %v5060_v18 = vld [vmem:[#allocation6 + $0xb0] sm:$0xff] }
 0x787   :  { %3603 = vmatprep.subr.bf16.mxu1 %v5493_v23 }
 0x78a   :  { %3604 = vmatpush3.bf16.msra.mxu1 %v4741_v45  ;;  %v5064_v45 = vld [vmem:[#allocation6 + $0xa8] sm:$0xff] }
 0x78b   :  { %3605 = vmatprep.subr.bf16.mxu1 %v5493_v23 }
 0x78e   :  { %3606 = vmatpush3.bf16.msra.mxu1 %v4749_v1  ;;  %v5066_v1 = vld [vmem:[#allocation7 + $0x8] sm:$0xff] }
 0x78f   :  { %3607 = vmatprep.subr.bf16.mxu1 %v5493_v23 }
 0x792   :  { %3608 = vmatpush3.bf16.msra.mxu1 %v4753_v30  ;;  %v5069_v30 = vld [vmem:[#allocation11 + $0x18] sm:$0xf] }
 0x793   :  { %2285 = vmatprep.subr.bf16.mxu1 %v5019_v31 }
 0x795   :  { %3610 = vmatmul.mubr.bf16.vlgmr.msra.gmra.mrb[56].mxu1 %v1858_v54 }
 0x796   :  { %2317 = vmatprep.mubr.bf16.mxu1 %v5494_v2  ;;  %2286 = vmatpush1.bf16.msra.mxu1 %v5021_v43 }
 0x797   :  { %2287 = vmatprep.subr.bf16.mxu1 %v5023_v27 }
 0x79a   :  { %2288 = vmatpush1.bf16.msra.mxu1 %v5028_v5 }
 0x79b   :  { %2289 = vmatprep.subr.bf16.mxu1 %v5031_v51 }
 0x79e   :  { %2290 = vmatpush1.bf16.msra.mxu1 %v5034_v35 }
 0x79f   :  { %2291 = vmatprep.subr.bf16.mxu1 %v5037_v37 }
 0x7a2   :  { %2292 = vmatpush1.bf16.msra.mxu1 %v5039_v40 }
 0x7a3   :  { %2293 = vmatprep.subr.bf16.mxu1 %v5041_v41 }
 0x7a6   :  { %2294 = vmatpush1.bf16.msra.mxu1 %v5046_v50 }
 0x7a7   :  { %2295 = vmatprep.subr.bf16.mxu1 %v5048_v38 }
 0x7aa   :  { %2296 = vmatpush1.bf16.msra.mxu1 %v5052_v53 }
 0x7ab   :  { %2297 = vmatprep.subr.bf16.mxu1 %v5054_v56 }
 0x7ae   :  { %2298 = vmatpush1.bf16.msra.mxu1 %v5058_v13 }
 0x7af   :  { %2299 = vmatprep.subr.bf16.mxu1 %v5060_v18 }
 0x7b2   :  { %2300 = vmatpush1.bf16.msra.mxu1 %v5064_v45 }
 0x7b3   :  { %2391 = vmatprep.subr.bf16.mxu1 %v5066_v1 }
 0x7b5   :  { %2318 = vmatmul.mubr.bf16.vlgmr.msra.gmra.mrb[60].mxu1 %v5069_v30 }
 0x7b6   :  { %2392 = vmatpush1.bf16.msra.mxu1 %v5072_v34  ;;  %2423 = vmatprep.mubr.bf16.mxu1 %v5494_v2 }
 0x7b7   :  { %2393 = vmatprep.subr.bf16.mxu1 %v5074_v26 }
 0x7ba   :  { %2394 = vmatpush1.bf16.msra.mxu1 %v5080_v29 }
 0x7bb   :  { %2395 = vmatprep.subr.bf16.mxu1 %v5083_v49 }
 0x7be   :  { %2396 = vmatpush1.bf16.msra.mxu1 %v5086_v33 }
 0x7bf   :  { %2397 = vmatprep.subr.bf16.mxu1 %v5089_v36 }
 0x7c2   :  { %2398 = vmatpush1.bf16.msra.mxu1 %v5092_v39 }
 0x7c3   :  { %2399 = vmatprep.subr.bf16.mxu1 %v5095_v22 }
 0x7c6   :  { %2400 = vmatpush1.bf16.msra.mxu1 %v5097_v42 }
 0x7c7   :  { %2401 = vmatprep.subr.bf16.mxu1 %v5099_v46 }
 0x7ca   :  { %2402 = vmatpush1.bf16.msra.mxu1 %v5104_v52 }
 0x7cb   :  { %2403 = vmatprep.subr.bf16.mxu1 %v5106_v11 }
 0x7ce   :  { %2404 = vmatpush1.bf16.msra.mxu1 %v5110_v58 }
 0x7cf   :  { %2405 = vmatprep.subr.bf16.mxu1 %v5112_v61 }
 0x7d2   :  { %2406 = vmatpush1.bf16.msra.mxu1 %v5116_v0 }
 0x7d3   :  { %3673 = vmatprep.subr.bf16.mxu1 %v5493_v23 }
 0x828   :  { %v1901_v3 = vpop.f32.mrb[48].mxu1  ;;  %v2105_v6 = vpop.f32.mrb[56].mxu0 }
 0x829   :  { %v1907_v7 = vpack.c.bf16 %v1901_v3, %v1901_v3  ;;  %v2152_v19 = vadd.f32 %v2105_v6, %v4995_v44  ;;  %v3571_v60 = vpop.f32.mrb[49].mxu1  ;;  %v2107_v15 = vpop.f32.mrb[57].mxu0  ;;  %v5122_v14 = vadd.f32 %v1901_v3, %v5551_v4 }
 0x82a   :  { %v2160_v28 = vadd.f32 %v2107_v15, %v4999_v63  ;;  %v1904_v59 = vpop.f32.mrb[50].mxu1  ;;  %v2109_v25 = vpop.f32.mrb[58].mxu0 }
 0x82b   :  { %1909 = vst [vmem:[#allocation14 + $0x10] sm:$0xf] %v1907_v7  ;;  %v3572_v9 = vpop.f32.mrb[51].mxu1  ;;  %v2110_v10 = vpop.f32.mrb[59].mxu0  ;;  %1911 = vmax.xlane.f32.xlu0 %v5122_v14  ;;  %v2153_v12 = vadd.f32 %v4943_v48, %v2152_v19 }
 0x82c   :  { %v2161_v32 = vadd.f32 %v4946_v55, %v2160_v28 }
 0x82d   :  { %v3012_v54 = vmul.f32 -1.442695, %v2153_v12 }
 0x82e   :  { %v3013_v8 = vmul.f32 -1.442695, %v2161_v32 }
 0x82f   :  { %3829 = vpow2.f32 %v3012_v54 }
 0x830   :  { %3831 = vpow2.f32 %v3013_v8 }
 0x839   :  { %v3830_v3 = vpop.eup %3829 }
 0x83a   :  { %v2157_v63 = vadd.f32 1.0, %v3830_v3  ;;  %v3832_v6 = vpop.eup %3831 }
 0x83b   :  { %v2165_v7 = vadd.f32 1.0, %v3832_v6  ;;  %v5151_v6 = vld [vmem:[#allocation6 + $0x58] sm:$0xff] }
 0x83c   :  { %3833 = vrcp.f32 %v2157_v63  ;;  %v5135_v63 = vld [vmem:[#allocation6 + $0x10] sm:$0xff] }
 0x83d   :  { %3835 = vrcp.f32 %v2165_v7  ;;  %v5155_v7 = vld [vmem:[#allocation6 + $0x70] sm:$0xff] }
 0x846   :  { %v3834_v19 = vpop.eup %3833 }
 0x847   :  { %v3836_v28 = vpop.eup %3835 }
 0x848   :  { %v2040_v47 = vpop.f32.mrb[52].mxu1  ;;  %v2175_v32 = vmul.f32 %v3836_v28, %v4956_v24  ;;  %v5147_v24 = vld [vmem:[#allocation6 + $0x40] sm:$0xff] }
 0x849   :  { %v3591_v17 = vpop.f32.mrb[53].mxu1  ;;  %v2168_v9 = vadd.f32 %v4952_v21, %v2040_v47  ;;  %v5141_v47 = vld [vmem:[#allocation6 + $0x28] sm:$0xff] }
 0x84a   :  { %v2043_v16 = vpop.f32.mrb[54].mxu1 }
 0x84b   :  { %v3592_v44 = vpop.f32.mrb[55].mxu1  ;;  %v2173_v16 = vsub.f32 1.0, %v3836_v28 }
 0x868   :  { %v2146_v60 = vpop.f32.mrb[56].mxu1 }
 0x869   :  { %v2169_v15 = vadd.f32 %v4949_v62, %v2146_v60  ;;  %v3611_v59 = vpop.f32.mrb[57].mxu1  ;;  %v5159_v60 = vld [vmem:[#allocation6 + $0x88] sm:$0xff] }
 0x86a   :  { %v2149_v25 = vpop.f32.mrb[58].mxu1  ;;  %v5167_v59 = vld [vmem:[#allocation6 + $0xb8] sm:$0xff] }
 0x86b   :  { %v2170_v10 = vmul.f32 %v3834_v19, %v2169_v15  ;;  %v3612_v12 = vpop.f32.mrb[59].mxu1  ;;  %v5163_v15 = vld [vmem:[#allocation6 + $0xa0] sm:$0xff]  ;;  %v5171_v19 = vld [vmem:[#allocation7 + $0x10] sm:$0xff]  ;;  %v5178_v25 = vld [vmem:[#allocation7 + $0x28] sm:$0xff] }
 0x86c   :  { %v5194_v12 = vld [vmem:[#allocation7 + $0x88] sm:$0xff] }
 0x86d   :  { %v2171_v17 = vadd.f32 %v2170_v10, %v2168_v9  ;;  %v5182_v9 = vld [vmem:[#allocation7 + $0x40] sm:$0xff]  ;;  %v5190_v10 = vld [vmem:[#allocation7 + $0x70] sm:$0xff] }
 0x86f   :  { %3837 = vtanh.f32 %v2171_v17 }
 0x879   :  { %v3838_v54 = vpop.eup %3837 }
 0x87a   :  { %v2174_v44 = vmul.f32 %v3838_v54, %v2173_v16  ;;  %v5202_v54 = vld [vmem:[#allocation7 + $0xa0] sm:$0xff] }
 0x87c   :  { %v5131_v8 = vadd.f32 %v2175_v32, %v2174_v44  ;;  %v5206_v32 = vld [vmem:[#allocation7 + $0xb8] sm:$0xff] }
 0x87e   :  { %v2178_v3 = vpack.c.bf16 %v5131_v8, %v5131_v8 }
 0x880   :  { %3630 = vmatmul.mubr.bf16.vlgmr.msra.gmra.mrb[60].mxu0 %v2178_v3  ;;  %2424 = vmatmul.mubr.bf16.vlgmr.msra.gmra.mrb[64].mxu1 %v2178_v3 }
 0x881   :  { %3634 = vmatpush3.bf16.msra.mxu0 %v5135_v63  ;;  %3649 = vmatprep.mubr.msk.bf16.mxu0 %vm4014_vm1, %v5493_v23 }
 0x882   :  { %3635 = vmatprep.subr.bf16.mxu0 %v5493_v23  ;;  %3689 = vmatprep.mubr.msk.bf16.mxu1 %vm4014_vm1, %v5493_v23 }
 0x885   :  { %3636 = vmatpush3.bf16.msra.mxu0 %v5141_v47 }
 0x886   :  { %3637 = vmatprep.subr.bf16.mxu0 %v5493_v23 }
 0x888   :  { %v5196_v17 = vpop.f32.mrb[60].mxu1 }
 0x889   :  { %3638 = vmatpush3.bf16.msra.mxu0 %v5147_v24  ;;  %v5198_v28 = vpop.f32.mrb[61].mxu1 }
 0x88a   :  { %3639 = vmatprep.subr.bf16.mxu0 %v5493_v23  ;;  %v2323_v16 = vpop.f32.mrb[62].mxu1 }
 0x88b   :  { %v2324_v44 = vpop.f32.mrb[63].mxu1 }
 0x88d   :  { %3640 = vmatpush3.bf16.msra.mxu0 %v5151_v6 }
 0x88e   :  { %3641 = vmatprep.subr.bf16.mxu0 %v5493_v23 }
 0x891   :  { %3642 = vmatpush3.bf16.msra.mxu0 %v5155_v7 }
 0x892   :  { %3643 = vmatprep.subr.bf16.mxu0 %v5493_v23 }
 0x895   :  { %3644 = vmatpush3.bf16.msra.mxu0 %v5159_v60 }
 0x896   :  { %3645 = vmatprep.subr.bf16.mxu0 %v5493_v23 }
 0x899   :  { %3646 = vmatpush3.bf16.msra.mxu0 %v5163_v15 }
 0x89a   :  { %3647 = vmatprep.subr.bf16.mxu0 %v5493_v23 }
 0x89d   :  { %3648 = vmatpush3.bf16.msra.mxu0 %v5167_v59 }
 0x89e   :  { %3653 = vmatprep.subr.bf16.mxu0 %v5493_v23 }
 0x8a0   :  { %3650 = vmatmul.mubr.bf16.vlgmr.msra.gmra.mrb[64].mxu0 %v5069_v30  ;;  %v5186_v30 = vld [vmem:[#allocation7 + $0x58] sm:$0xff] }
 0x8a1   :  { %3654 = vmatpush3.bf16.msra.mxu0 %v5171_v19  ;;  %3669 = vmatprep.mubr.msk.bf16.mxu0 %vm4014_vm1, %v5493_v23 }
 0x8a2   :  { %3655 = vmatprep.subr.bf16.mxu0 %v5493_v23 }
 0x8a5   :  { %3656 = vmatpush3.bf16.msra.mxu0 %v5178_v25 }
 0x8a6   :  { %3657 = vmatprep.subr.bf16.mxu0 %v5493_v23 }
 0x8a9   :  { %3658 = vmatpush3.bf16.msra.mxu0 %v5182_v9 }
 0x8aa   :  { %3659 = vmatprep.subr.bf16.mxu0 %v5493_v23 }
 0x8ad   :  { %3660 = vmatpush3.bf16.msra.mxu0 %v5186_v30 }
 0x8ae   :  { %3661 = vmatprep.subr.bf16.mxu0 %v5493_v23 }
 0x8b1   :  { %3662 = vmatpush3.bf16.msra.mxu0 %v5190_v10 }
 0x8b2   :  { %3663 = vmatprep.subr.bf16.mxu0 %v5493_v23 }
 0x8b5   :  { %3664 = vmatpush3.bf16.msra.mxu0 %v5194_v12 }
 0x8b6   :  { %3665 = vmatprep.subr.bf16.mxu0 %v5493_v23 }
 0x8b9   :  { %3666 = vmatpush3.bf16.msra.mxu0 %v5202_v54 }
 0x8ba   :  { %3667 = vmatprep.subr.bf16.mxu0 %v5493_v23 }
 0x8bd   :  { %3668 = vmatpush3.bf16.msra.mxu0 %v5206_v32 }
 0x8be   :  { %2605 = vmatprep.subr.bf16.mxu0 %v5019_v31  ;;  %v5227_v31 = vld [vmem:[#allocation8] sm:$0xff] }
 0x8bf   :  { %3674 = vmatpush3.bf16.msra.mxu1 %v5227_v31 }
 0x8c0   :  { %3670 = vmatmul.mubr.bf16.vlgmr.msra.gmra.mrb[68].mxu0 %v2178_v3  ;;  %3675 = vmatprep.subr.bf16.mxu1 %v5493_v23 }
 0x8c1   :  { %2606 = vmatpush1.bf16.msra.mxu0 %v5021_v43  ;;  %2637 = vmatprep.mubr.bf16.mxu0 %v5494_v2  ;;  %v5229_v43 = vld [vmem:[#allocation11 + $0x1c] sm:$0xf] }
 0x8c2   :  { %2607 = vmatprep.subr.bf16.mxu0 %v5023_v27  ;;  %v5235_v27 = vld [vmem:[#allocation8 + $0x8] sm:$0xff] }
 0x8c3   :  { %3676 = vmatpush3.bf16.msra.mxu1 %v5235_v27 }
 0x8c4   :  { %3677 = vmatprep.subr.bf16.mxu1 %v5493_v23 }
 0x8c5   :  { %2608 = vmatpush1.bf16.msra.mxu0 %v5028_v5  ;;  %v5259_v5 = vld [vmem:[#allocation8 + $0x18] sm:$0xff] }
 0x8c6   :  { %2609 = vmatprep.subr.bf16.mxu0 %v5031_v51  ;;  %v5263_v51 = vld [vmem:[#allocation8 + $0x20] sm:$0xff] }
 0x8c9   :  { %2610 = vmatpush1.bf16.msra.mxu0 %v5034_v35  ;;  %v5267_v35 = vld [vmem:[#allocation8 + $0x28] sm:$0xff] }
 0x8ca   :  { %2611 = vmatprep.subr.bf16.mxu0 %v5037_v37  ;;  %v5271_v37 = vld [vmem:[#allocation8 + $0x30] sm:$0xff] }
 0x8cd   :  { %2612 = vmatpush1.bf16.msra.mxu0 %v5039_v40  ;;  %v5275_v40 = vld [vmem:[#allocation8 + $0x38] sm:$0xff] }
 0x8ce   :  { %2613 = vmatprep.subr.bf16.mxu0 %v5041_v41 }
 0x8d1   :  { %2614 = vmatpush1.bf16.msra.mxu0 %v5046_v50 }
 0x8d2   :  { %2615 = vmatprep.subr.bf16.mxu0 %v5048_v38 }
 0x8d5   :  { %2616 = vmatpush1.bf16.msra.mxu0 %v5052_v53 }
 0x8d6   :  { %2617 = vmatprep.subr.bf16.mxu0 %v5054_v56 }
 0x8d9   :  { %2618 = vmatpush1.bf16.msra.mxu0 %v5058_v13 }
 0x8da   :  { %2619 = vmatprep.subr.bf16.mxu0 %v5060_v18 }
 0x8dd   :  { %2620 = vmatpush1.bf16.msra.mxu0 %v5064_v45 }
 0x8de   :  { %2711 = vmatprep.subr.bf16.mxu0 %v5066_v1 }
 0x8e0   :  { %2638 = vmatmul.mubr.bf16.vlgmr.msra.gmra.mrb[72].mxu0 %v5229_v43 }
 0x8e1   :  { %2712 = vmatpush1.bf16.msra.mxu0 %v5072_v34  ;;  %2743 = vmatprep.mubr.bf16.mxu0 %v5494_v2  ;;  %v5253_v2 = vld [vmem:[#allocation8 + $0x10] sm:$0xff] }
 0x8e2   :  { %2713 = vmatprep.subr.bf16.mxu0 %v5074_v26  ;;  %3678 = vmatpush3.bf16.msra.mxu1 %v5253_v2 }
 0x8e3   :  { %3679 = vmatprep.subr.bf16.mxu1 %v5493_v23 }
 0x8e5   :  { %2714 = vmatpush1.bf16.msra.mxu0 %v5080_v29 }
 0x8e6   :  { %2715 = vmatprep.subr.bf16.mxu0 %v5083_v49  ;;  %3680 = vmatpush3.bf16.msra.mxu1 %v5259_v5 }
 0x8e7   :  { %3681 = vmatprep.subr.bf16.mxu1 %v5493_v23 }
 0x8e9   :  { %2716 = vmatpush1.bf16.msra.mxu0 %v5086_v33 }
 0x8ea   :  { %2717 = vmatprep.subr.bf16.mxu0 %v5089_v36  ;;  %3682 = vmatpush3.bf16.msra.mxu1 %v5263_v51 }
 0x8eb   :  { %3683 = vmatprep.subr.bf16.mxu1 %v5493_v23 }
 0x8ed   :  { %2718 = vmatpush1.bf16.msra.mxu0 %v5092_v39 }
 0x8ee   :  { %2719 = vmatprep.subr.bf16.mxu0 %v5095_v22  ;;  %3684 = vmatpush3.bf16.msra.mxu1 %v5267_v35 }
 0x8ef   :  { %3685 = vmatprep.subr.bf16.mxu1 %v5493_v23 }
 0x8f1   :  { %2720 = vmatpush1.bf16.msra.mxu0 %v5097_v42 }
 0x8f2   :  { %2721 = vmatprep.subr.bf16.mxu0 %v5099_v46  ;;  %3686 = vmatpush3.bf16.msra.mxu1 %v5271_v37 }
 0x8f3   :  { %3687 = vmatprep.subr.bf16.mxu1 %v5493_v23 }
 0x8f5   :  { %2722 = vmatpush1.bf16.msra.mxu0 %v5104_v52 }
 0x8f6   :  { %2723 = vmatprep.subr.bf16.mxu0 %v5106_v11  ;;  %3688 = vmatpush3.bf16.msra.mxu1 %v5275_v40 }
 0x8f7   :  { %3693 = vmatprep.subr.bf16.mxu1 %v5493_v23 }
 0x8f9   :  { %2724 = vmatpush1.bf16.msra.mxu0 %v5110_v58 }
 0x8fa   :  { %2725 = vmatprep.subr.bf16.mxu0 %v5112_v61 }
 0x8fd   :  { %2726 = vmatpush1.bf16.msra.mxu0 %v5116_v0 }
 0x8fe   :  { %3733 = vmatprep.subr.bf16.mxu0 %v5493_v23 }
 0x953   :  { %v2221_v41 = vpop.f32.mrb[60].mxu0  ;;  %v2425_v50 = vpop.f32.mrb[64].mxu1 }
 0x954   :  { %v2227_v38 = vpack.c.bf16 %v2221_v41, %v2221_v41  ;;  %v2472_v53 = vadd.f32 %v2425_v50, %v5196_v17  ;;  %v3631_v56 = vpop.f32.mrb[61].mxu0  ;;  %v2427_v13 = vpop.f32.mrb[65].mxu1  ;;  %v5281_v18 = vadd.f32 %v2221_v41, %v5551_v4 }
 0x955   :  { %v2480_v45 = vadd.f32 %v2427_v13, %v5198_v28  ;;  %v2224_v1 = vpop.f32.mrb[62].mxu0  ;;  %v2429_v34 = vpop.f32.mrb[66].mxu1 }
 0x956   :  { %2229 = vst [vmem:[#allocation14 + $0x14] sm:$0xf] %v2227_v38  ;;  %v3632_v26 = vpop.f32.mrb[63].mxu0  ;;  %v2430_v29 = vpop.f32.mrb[67].mxu1  ;;  %2231 = vmax.xlane.f32.xlu1 %v5281_v18  ;;  %v2473_v49 = vadd.f32 %v4943_v48, %v2472_v53 }
 0x957   :  { %v2481_v46 = vadd.f32 %v4946_v55, %v2480_v45 }
 0x958   :  { %v3015_v22 = vmul.f32 -1.442695, %v2473_v49 }
 0x959   :  { %v3016_v52 = vmul.f32 -1.442695, %v2481_v46 }
 0x95a   :  { %3839 = vpow2.f32 %v3015_v22 }
 0x95b   :  { %3841 = vpow2.f32 %v3016_v52 }
 0x964   :  { %v3840_v11 = vpop.eup %3839 }
 0x965   :  { %v2477_v58 = vadd.f32 1.0, %v3840_v11  ;;  %v3842_v61 = vpop.eup %3841 }
 0x966   :  { %v2485_v0 = vadd.f32 1.0, %v3842_v61 }
 0x967   :  { %3843 = vrcp.f32 %v2477_v58 }
 0x968   :  { %3845 = vrcp.f32 %v2485_v0 }
 0x971   :  { %v3844_v16 = vpop.eup %3843 }
 0x972   :  { %v3846_v56 = vpop.eup %3845 }
 0x973   :  { %v2360_v33 = vpop.f32.mrb[64].mxu0  ;;  %v2493_v13 = vsub.f32 1.0, %v3846_v56  ;;  %v2495_v34 = vmul.f32 %v3846_v56, %v5131_v8 }
 0x974   :  { %v3651_v36 = vpop.f32.mrb[65].mxu0  ;;  %v2488_v41 = vadd.f32 %v4952_v21, %v2360_v33 }
 0x975   :  { %v2363_v39 = vpop.f32.mrb[66].mxu0 }
 0x976   :  { %v3652_v42 = vpop.f32.mrb[67].mxu0 }
 0x993   :  { %v2466_v3 = vpop.f32.mrb[68].mxu0 }
 0x994   :  { %v2489_v17 = vadd.f32 %v4949_v62, %v2466_v3  ;;  %v3671_v28 = vpop.f32.mrb[69].mxu0 }
 0x995   :  { %v2469_v44 = vpop.f32.mrb[70].mxu0 }
 0x996   :  { %v2490_v50 = vmul.f32 %v3844_v16, %v2489_v17  ;;  %v3672_v38 = vpop.f32.mrb[71].mxu0 }
 0x998   :  { %v2491_v53 = vadd.f32 %v2490_v50, %v2488_v41 }
 0x99a   :  { %3847 = vtanh.f32 %v2491_v53 }
 0x9a4   :  { %v3848_v45 = vpop.eup %3847 }
 0x9a5   :  { %v2494_v1 = vmul.f32 %v3848_v45, %v2493_v13 }
 0x9a7   :  { %v5290_v26 = vadd.f32 %v2495_v34, %v2494_v1 }
 0x9a9   :  { %v2498_v29 = vpack.c.bf16 %v5290_v26, %v5290_v26 }
 0x9ab   :  { %3690 = vmatmul.mubr.bf16.vlgmr.msra.gmra.mrb[68].mxu1 %v2498_v29  ;;  %2744 = vmatmul.mubr.bf16.vlgmr.msra.gmra.mrb[76].mxu0 %v2498_v29 }
 0x9ac   :  { %3694 = vmatpush3.bf16.msra.mxu1 %v5135_v63  ;;  %3709 = vmatprep.mubr.msk.bf16.mxu1 %vm4014_vm1, %v5493_v23 }
 0x9ad   :  { %3695 = vmatprep.subr.bf16.mxu1 %v5493_v23  ;;  %3734 = vmatpush3.bf16.msra.mxu0 %v5227_v31 }
 0x9ae   :  { %3735 = vmatprep.subr.bf16.mxu0 %v5493_v23  ;;  %3749 = vmatprep.mubr.msk.bf16.mxu0 %vm4014_vm1, %v5493_v23 }
 0x9b0   :  { %3696 = vmatpush3.bf16.msra.mxu1 %v5141_v47 }
 0x9b1   :  { %3697 = vmatprep.subr.bf16.mxu1 %v5493_v23  ;;  %3736 = vmatpush3.bf16.msra.mxu0 %v5235_v27 }
 0x9b2   :  { %3737 = vmatprep.subr.bf16.mxu0 %v5493_v23 }
 0x9b3   :  { %v2639_v8 = vpop.f32.mrb[72].mxu0 }
 0x9b4   :  { %3698 = vmatpush3.bf16.msra.mxu1 %v5147_v24  ;;  %v2641_v63 = vpop.f32.mrb[73].mxu0 }
 0x9b5   :  { %3699 = vmatprep.subr.bf16.mxu1 %v5493_v23  ;;  %3738 = vmatpush3.bf16.msra.mxu0 %v5253_v2  ;;  %v2643_v47 = vpop.f32.mrb[74].mxu0 }
 0x9b6   :  { %3739 = vmatprep.subr.bf16.mxu0 %v5493_v23  ;;  %v2644_v24 = vpop.f32.mrb[75].mxu0 }
 0x9b8   :  { %3700 = vmatpush3.bf16.msra.mxu1 %v5151_v6  ;;  %v632_v6 = vpop.xlane.xlu0 %631 }
 0x9b9   :  { %3701 = vmatprep.subr.bf16.mxu1 %v5493_v23  ;;  %3740 = vmatpush3.bf16.msra.mxu0 %v5259_v5 }
 0x9ba   :  { %3741 = vmatprep.subr.bf16.mxu0 %v5493_v23 }
 0x9bc   :  { %3702 = vmatpush3.bf16.msra.mxu1 %v5155_v7  ;;  %v5552_v7 = vld [vmem:[#allocation40_spill] sm:$0xff] }
 0x9bd   :  { %3703 = vmatprep.subr.bf16.mxu1 %v5493_v23  ;;  %3742 = vmatpush3.bf16.msra.mxu0 %v5263_v51  ;;  %vm633_vm3 = vcmp.eq.f32.partialorder %v5552_v7, %v632_v6 }
 0x9be   :  { %3743 = vmatprep.subr.bf16.mxu0 %v5493_v23 }
 0x9c0   :  { %3704 = vmatpush3.bf16.msra.mxu1 %v5159_v60  ;;  %v5348_v60 = vpop.xlane.xlu0 %951 }
 0x9c1   :  { %3705 = vmatprep.subr.bf16.mxu1 %v5493_v23  ;;  %3744 = vmatpush3.bf16.msra.mxu0 %v5267_v35 }
 0x9c2   :  { %3745 = vmatprep.subr.bf16.mxu0 %v5493_v23 }
 0x9c4   :  { %3706 = vmatpush3.bf16.msra.mxu1 %v5163_v15  ;;  %v1272_v15 = vpop.xlane.xlu1 %1271 }
 0x9c5   :  { %3707 = vmatprep.subr.bf16.mxu1 %v5493_v23  ;;  %3746 = vmatpush3.bf16.msra.mxu0 %v5271_v37  ;;  %vm1273_vm4 = vcmp.eq.f32.partialorder %v4828_v20, %v1272_v15 }
 0x9c6   :  { %3747 = vmatprep.subr.bf16.mxu0 %v5493_v23 }
 0x9c8   :  { %3708 = vmatpush3.bf16.msra.mxu1 %v5167_v59  ;;  %v5553_v59 = vld [vmem:[#allocation38_spill] sm:$0xff] }
 0x9c9   :  { %3713 = vmatprep.subr.bf16.mxu1 %v5493_v23  ;;  %3748 = vmatpush3.bf16.msra.mxu0 %v5275_v40 }
 0x9cb   :  { %3710 = vmatmul.mubr.bf16.vlgmr.msra.gmra.mrb[72].mxu1 %v5229_v43  ;;  %v5357_v43 = vsel %vm1273_vm4, %v5553_v59, 128 }
 0x9cc   :  { %3714 = vmatpush3.bf16.msra.mxu1 %v5171_v19  ;;  %3729 = vmatprep.mubr.msk.bf16.mxu1 %vm4014_vm1, %v5493_v23  ;;  %v5351_v19 = vsel %vm633_vm3, %v5553_v59, 128  ;;  %v1276_v37 = vshra.s32 %v5357_v43, 16  ;;  %v1275_v7 = vand.u32 65535, %v5357_v43  ;;  %v5554_v43 = vld [vmem:[#allocation60_spill] sm:$0xff] }
 0x9cd   :  { %3715 = vmatprep.subr.bf16.mxu1 %v5493_v23  ;;  %v636_v31 = vshra.s32 %v5351_v19, 16  ;;  %vm953_vm11 = vcmp.eq.f32.partialorder %v5554_v43, %v5348_v60 }
 0x9ce   :  { %v1278_v49 = vcvt.s32.f32 %v1276_v37 }
 0x9cf   :  { %v638_v35 = vcvt.s32.f32 %v636_v31 }
 0x9d0   :  { %3716 = vmatpush3.bf16.msra.mxu1 %v5178_v25  ;;  %v1912_v25 = vpop.xlane.xlu0 %1911 }
 0x9d1   :  { %3717 = vmatprep.subr.bf16.mxu1 %v5493_v23  ;;  %vm1913_vm5 = vcmp.eq.f32.partialorder %v5122_v14, %v1912_v25 }
 0x9d2   :  { %v1914_v40 = vsel %vm1913_vm5, %v5553_v59, 128 }
 0x9d3   :  { %v1916_v33 = vshra.s32 %v1914_v40, 16 }
 0x9d4   :  { %3718 = vmatpush3.bf16.msra.mxu1 %v5182_v9 }
 0x9d5   :  { %3719 = vmatprep.subr.bf16.mxu1 %v5493_v23  ;;  %v1918_v36 = vcvt.s32.f32 %v1916_v33 }
 0x9d8   :  { %3720 = vmatpush3.bf16.msra.mxu1 %v5186_v30 }
 0x9d9   :  { %3721 = vmatprep.subr.bf16.mxu1 %v5493_v23 }
 0x9dc   :  { %3722 = vmatpush3.bf16.msra.mxu1 %v5190_v10 }
 0x9dd   :  { %3723 = vmatprep.subr.bf16.mxu1 %v5493_v23 }
 0x9e0   :  { %3724 = vmatpush3.bf16.msra.mxu1 %v5194_v12 }
 0x9e1   :  { %3725 = vmatprep.subr.bf16.mxu1 %v5493_v23 }
 0x9e4   :  { %3726 = vmatpush3.bf16.msra.mxu1 %v5202_v54 }
 0x9e5   :  { %3727 = vmatprep.subr.bf16.mxu1 %v5493_v23 }
 0x9e8   :  { %3728 = vmatpush3.bf16.msra.mxu1 %v5206_v32 }
 0x9eb   :  { %3730 = vmatmul.mubr.bf16.vlgmr.msra.gmra.mrb[76].mxu1 %v2498_v29 }
 0xa7e   :  { %v2541_v9 = vpop.f32.mrb[68].mxu1  ;;  %v2745_v30 = vpop.f32.mrb[76].mxu0 }
 0xa7f   :  { %v2547_v10 = vpack.c.bf16 %v2541_v9, %v2541_v9  ;;  %v2792_v12 = vadd.f32 %v2745_v30, %v2639_v8  ;;  %v3691_v23 = vpop.f32.mrb[69].mxu1  ;;  %v2747_v54 = vpop.f32.mrb[77].mxu0  ;;  %v2550_v32 = vadd.f32 %v2541_v9, %v5551_v4 }
 0xa80   :  { %v2800_v27 = vadd.f32 %v2747_v54, %v2641_v63  ;;  %v2544_v2 = vpop.f32.mrb[70].mxu1  ;;  %v2749_v5 = vpop.f32.mrb[78].mxu0 }
 0xa81   :  { %2549 = vst [vmem:[#allocation14 + $0x18] sm:$0xf] %v2547_v10  ;;  %v3692_v20 = vpop.f32.mrb[71].mxu1  ;;  %v2750_v51 = vpop.f32.mrb[79].mxu0  ;;  %2551 = vmax.xlane.f32.xlu0 %v2550_v32  ;;  %v2793_v39 = vadd.f32 %v4943_v48, %v2792_v12  ;;  %v1277_v10 = vcvt.s32.f32 %v1275_v7 }
 0xa82   :  { %v2801_v11 = vadd.f32 %v4946_v55, %v2800_v27  ;;  %v1592_v5 = vpop.xlane.xlu1 %1591  ;;  %v954_v51 = vsel %vm953_vm11, %v5553_v59, 128 }
 0xa83   :  { %v3018_v46 = vmul.f32 -1.442695, %v2793_v39  ;;  %vm1593_vm12 = vcmp.eq.f32.partialorder %v4939_v57, %v1592_v5 }
 0xa84   :  { %v3019_v58 = vmul.f32 -1.442695, %v2801_v11 }
 0xa85   :  { %639 = vmin.xlane.f32.xlu0 %v638_v35  ;;  %3849 = vpow2.f32 %v3018_v46  ;;  %v1594_v46 = vsel %vm1593_vm12, %v5553_v59, 128 }
 0xa86   :  { %3851 = vpow2.f32 %v3019_v58 }
 0xa89   :  { %1279 = vmin.xlane.f32.xlu0 %v1278_v49 }
 0xa8d   :  { %1919 = vmin.xlane.f32.xlu0 %v1918_v36 }
 0xa8f   :  { %v3850_v61 = vpop.eup %3849 }
 0xa90   :  { %v2797_v0 = vadd.f32 1.0, %v3850_v61  ;;  %v3852_v3 = vpop.eup %3851 }
 0xa91   :  { %v2805_v17 = vadd.f32 1.0, %v3852_v3 }
 0xa92   :  { %3853 = vrcp.f32 %v2797_v0 }
 0xa93   :  { %3855 = vrcp.f32 %v2805_v17  ;;  %v1596_v17 = vshra.s32 %v1594_v46, 16 }
 0xa9c   :  { %v3854_v48 = vpop.eup %3853 }
 0xa9d   :  { %v3856_v55 = vpop.eup %3855 }
 0xa9e   :  { %v2680_v22 = vpop.f32.mrb[72].mxu1  ;;  %v2813_v13 = vsub.f32 1.0, %v3856_v55  ;;  %v2815_v34 = vmul.f32 %v3856_v55, %v5290_v26  ;;  %v1915_v26 = vand.u32 65535, %v1914_v40 }
 0xa9f   :  { %v3711_v42 = vpop.f32.mrb[73].mxu1  ;;  %v2808_v50 = vadd.f32 %v4952_v21, %v2680_v22  ;;  %v635_v21 = vand.u32 65535, %v5351_v19 }
 0xaa0   :  { %v2683_v14 = vpop.f32.mrb[74].mxu1  ;;  %v1917_v23 = vcvt.s32.f32 %v1915_v26 }
 0xaa1   :  { %v3712_v52 = vpop.f32.mrb[75].mxu1  ;;  %v637_v25 = vcvt.s32.f32 %v635_v21  ;;  %v956_v14 = vshra.s32 %v954_v51, 16 }
 0xabe   :  { %v2786_v28 = vpop.f32.mrb[76].mxu1 }
 0xabf   :  { %v2809_v16 = vadd.f32 %v4949_v62, %v2786_v28  ;;  %v3731_v44 = vpop.f32.mrb[77].mxu1 }
 0xac0   :  { %v2789_v41 = vpop.f32.mrb[78].mxu1 }
 0xac1   :  { %v2810_v38 = vmul.f32 %v3854_v48, %v2809_v16  ;;  %v3732_v53 = vpop.f32.mrb[79].mxu1  ;;  %v1598_v41 = vcvt.s32.f32 %v1596_v17 }
 0xac3   :  { %v2811_v56 = vadd.f32 %v2810_v38, %v2808_v50 }
 0xac5   :  { %3857 = vtanh.f32 %v2811_v56 }
 0xacf   :  { %v3858_v45 = vpop.eup %3857 }
 0xad0   :  { %v2814_v1 = vmul.f32 %v3858_v45, %v2813_v13 }
 0xad2   :  { %v2816_v29 = vadd.f32 %v2815_v34, %v2814_v1 }
 0xad4   :  { %v2818_v8 = vpack.c.bf16 %v2816_v29, %v2816_v29  ;;  %v955_v29 = vand.u32 65535, %v954_v51 }
 0xad6   :  { %3750 = vmatmul.mubr.bf16.vlgmr.msra.gmra.mrb[80].mxu0 %v2818_v8  ;;  %v957_v21 = vcvt.s32.f32 %v955_v29 }
 0xb0e   :  { %v2552_v62 = vpop.xlane.xlu0 %2551 }
 0xb0f   :  { %vm2553_vm6 = vcmp.eq.f32.partialorder %v2550_v32, %v2552_v62 }
 0xb10   :  { %v2554_v63 = vsel %vm2553_vm6, %v5553_v59, 128 }
 0xb11   :  { %v2556_v47 = vshra.s32 %v2554_v63, 16  ;;  %v2555_v19 = vand.u32 65535, %v2554_v63  ;;  %v1595_v63 = vand.u32 65535, %v1594_v46 }
 0xb12   :  { %v640_v24 = vpop.xlane.xlu0 %639 }
 0xb13   :  { %v2558_v6 = vcvt.s32.f32 %v2556_v47  ;;  %vm641_vm7 = vcmp.eq.f32.partialorder %v638_v35, %v640_v24  ;;  %v2557_v31 = vcvt.s32.f32 %v2555_v19  ;;  %v646_v27 = vcvt.f32.s32 %v640_v24 }
 0xb14   :  { %v642_v9 = vsel %vm641_vm7, %v637_v25, inf }
 0xb15   :  { %2559 = vmin.xlane.f32.xlu0 %v2558_v6  ;;  %v647_v35 = vshll.u32 %v646_v27, 16 }
 0xb16   :  { %v1280_v15 = vpop.xlane.xlu0 %1279 }
 0xb17   :  { %vm1281_vm8 = vcmp.eq.f32.partialorder %v1278_v49, %v1280_v15  ;;  %v1286_v37 = vcvt.f32.s32 %v1280_v15  ;;  %v2232_v49 = vpop.xlane.xlu1 %2231  ;;  %v1597_v15 = vcvt.s32.f32 %v1595_v63 }
 0xb18   :  { %v1282_v12 = vsel %vm1281_vm8, %v1277_v10, inf  ;;  %vm2233_vm14 = vcmp.eq.f32.partialorder %v5281_v18, %v2232_v49 }
 0xb19   :  { %643 = vmin.xlane.f32.xlu0 %v642_v9  ;;  %v1287_v52 = vshll.u32 %v1286_v37, 16  ;;  %v2234_v28 = vsel %vm2233_vm14, %v5553_v59, 128 }
 0xb1a   :  { %v1920_v30 = vpop.xlane.xlu0 %1919  ;;  %v2236_v18 = vshra.s32 %v2234_v28, 16 }
 0xb1b   :  { %vm1921_vm9 = vcmp.eq.f32.partialorder %v1918_v36, %v1920_v30  ;;  %v1926_v11 = vcvt.f32.s32 %v1920_v30 }
 0xb1c   :  { %v1922_v54 = vsel %vm1921_vm9, %v1917_v23, inf  ;;  %v2238_v50 = vcvt.s32.f32 %v2236_v18 }
 0xb1d   :  { %1283 = vmin.xlane.f32.xlu0 %v1282_v12  ;;  %v1927_v16 = vshll.u32 %v1926_v11, 16 }
 0xb21   :  { %1923 = vmin.xlane.f32.xlu0 %v1922_v54 }
 0xba2   :  { %v2560_v32 = vpop.xlane.xlu0 %2559 }
 0xba3   :  { %vm2561_vm10 = vcmp.eq.f32.partialorder %v2558_v6, %v2560_v32  ;;  %v2566_v38 = vcvt.f32.s32 %v2560_v32  ;;  %v2235_v6 = vand.u32 65535, %v2234_v28 }
 0xba4   :  { %v2562_v2 = vsel %vm2561_vm10, %v2557_v31, inf }
 0xba5   :  { %2563 = vmin.xlane.f32.xlu0 %v2562_v2  ;;  %v2567_v56 = vshll.u32 %v2566_v38, 16  ;;  %v2237_v9 = vcvt.s32.f32 %v2235_v6 }
 0xba6   :  { %v644_v20 = vpop.xlane.xlu0 %643 }
 0xba7   :  { %v645_v40 = vcvt.f32.s32 %v644_v20 }
 0xba9   :  { %v648_v33 = vadd.s32 %v647_v35, %v645_v40  ;;  %v2861_v36 = vpop.f32.mrb[80].mxu0 }
 0xbaa   :  { %v2867_v39 = vpack.c.bf16 %v2861_v36, %v2861_v36  ;;  %v3751_v22 = vpop.f32.mrb[81].mxu0  ;;  %v1284_v42 = vpop.xlane.xlu0 %1283  ;;  %v2870_v60 = vadd.f32 %v2861_v36, %v5551_v4  ;;  %v958_v4 = vcvt.s32.f32 %v956_v14 }
 0xbab   :  { %652 = vst.msk [vmem:[%s5435_s9] sm:$0xff] %vm651_vm13, %v648_v33  ;;  %v2864_v57 = vpop.f32.mrb[82].mxu0  ;;  %v1285_v58 = vcvt.f32.s32 %v1284_v42 }
 0xbac   :  { %2869 = vst [vmem:[#allocation14 + $0x1c] sm:$0xf] %v2867_v39  ;;  %v3752_v61 = vpop.f32.mrb[83].mxu0  ;;  %2871 = vmax.xlane.f32.xlu1 %v2870_v60 }
 0xbad   :  { %v1288_v0 = vadd.s32 %v1287_v52, %v1285_v58 }
 0xbae   :  { %v1924_v3 = vpop.xlane.xlu0 %1923 }
 0xbaf   :  { %3005 = vst.msk [vmem:[%s5435_s9 + $0x10] sm:$0xff] %vm651_vm13, %v1288_v0  ;;  %v1925_v44 = vcvt.f32.s32 %v1924_v3 }
 0xbb0   :  { %959 = vmin.xlane.f32.xlu1 %v958_v4 }
 0xbb1   :  { %v1928_v48 = vadd.s32 %v1927_v16, %v1925_v44 }
 0xbb3   :  { %3011 = vst.msk [vmem:[%s5435_s9 + $0x20] sm:$0xff] %vm651_vm13, %v1928_v48 }
 0xbb4   :  { %1599 = vmin.xlane.f32.xlu1 %v1598_v41 }
 0xbb8   :  { %2239 = vmin.xlane.f32.xlu1 %v2238_v50 }
 0xc32   :  { %v2564_v53 = vpop.xlane.xlu0 %2563 }
 0xc33   :  { %v2565_v55 = vcvt.f32.s32 %v2564_v53 }
 0xc35   :  { %v2568_v13 = vadd.s32 %v2567_v56, %v2565_v55 }
 0xc37   :  { %3017 = vst.msk [vmem:[%s5435_s9 + $0x30] sm:$0xff] %vm651_vm13, %v2568_v13 }
 0xc39   :  { %v2872_v45 = vpop.xlane.xlu1 %2871 }
 0xc3a   :  { %vm2873_vm15 = vcmp.eq.f32.partialorder %v2870_v60, %v2872_v45 }
 0xc3b   :  { %v2874_v1 = vsel %vm2873_vm15, %v5553_v59, 128 }
 0xc3c   :  { %v2876_v34 = vshra.s32 %v2874_v1, 16  ;;  %v2875_v26 = vand.u32 65535, %v2874_v1 }
 0xc3d   :  { %v960_v8 = vpop.xlane.xlu1 %959 }
 0xc3e   :  { %v2878_v62 = vcvt.s32.f32 %v2876_v34  ;;  %vm961_vm0 = vcmp.eq.f32.partialorder %v958_v4, %v960_v8  ;;  %v2877_v10 = vcvt.s32.f32 %v2875_v26  ;;  %v966_v12 = vcvt.f32.s32 %v960_v8 }
 0xc3f   :  { %v962_v24 = vsel %vm961_vm0, %v957_v21, inf }
 0xc40   :  { %2879 = vmin.xlane.f32.xlu1 %v2878_v62  ;;  %v967_v19 = vshll.u32 %v966_v12, 16 }
 0xc41   :  { %v1600_v47 = vpop.xlane.xlu1 %1599 }
 0xc42   :  { %vm1601_vm1 = vcmp.eq.f32.partialorder %v1598_v41, %v1600_v47  ;;  %v1606_v32 = vcvt.f32.s32 %v1600_v47 }
 0xc43   :  { %v1602_v25 = vsel %vm1601_vm1, %v1597_v15, inf }
 0xc44   :  { %963 = vmin.xlane.f32.xlu1 %v962_v24  ;;  %v1607_v2 = vshll.u32 %v1606_v32, 16 }
 0xc45   :  { %v2240_v7 = vpop.xlane.xlu1 %2239 }
 0xc46   :  { %vm2241_vm2 = vcmp.eq.f32.partialorder %v2238_v50, %v2240_v7  ;;  %v2246_v5 = vcvt.f32.s32 %v2240_v7 }
 0xc47   :  { %v2242_v59 = vsel %vm2241_vm2, %v2237_v9, inf }
 0xc48   :  { %1603 = vmin.xlane.f32.xlu1 %v1602_v25  ;;  %v2247_v37 = vshll.u32 %v2246_v5, 16 }
 0xc4c   :  { %2243 = vmin.xlane.f32.xlu1 %v2242_v59 }
 0xccd   :  { %v2880_v30 = vpop.xlane.xlu1 %2879 }
 0xcce   :  { %vm2881_vm3 = vcmp.eq.f32.partialorder %v2878_v62, %v2880_v30 }
 0xccf   :  { %v2882_v23 = vsel %vm2881_vm3, %v2877_v10, inf }
 0xcd0   :  { %2883 = vmin.xlane.f32.xlu1 %v2882_v23 }
 0xcd1   :  { %v964_v54 = vpop.xlane.xlu1 %963 }
 0xcd2   :  { %v965_v31 = vcvt.f32.s32 %v964_v54 }
 0xcd4   :  { %v968_v27 = vadd.s32 %v967_v19, %v965_v31 }
 0xcd5   :  { %v1604_v43 = vpop.xlane.xlu1 %1603 }
 0xcd6   :  { %3002 = vst.msk [vmem:[%s5435_s9 + $0x8] sm:$0xff] %vm651_vm13, %v968_v27  ;;  %v1605_v20 = vcvt.f32.s32 %v1604_v43 }
 0xcd8   :  { %v1608_v51 = vadd.s32 %v1607_v2, %v1605_v20 }
 0xcd9   :  { %v2244_v35 = vpop.xlane.xlu1 %2243 }
 0xcda   :  { %3008 = vst.msk [vmem:[%s5435_s9 + $0x18] sm:$0xff] %vm651_vm13, %v1608_v51  ;;  %v2245_v40 = vcvt.f32.s32 %v2244_v35 }
 0xcdc   :  { %v2248_v49 = vadd.s32 %v2247_v37, %v2245_v40 }
 0xcde   :  { %3014 = vst.msk [vmem:[%s5435_s9 + $0x28] sm:$0xff] %vm651_vm13, %v2248_v49 }
 0xcdf   :  { %3962 = shalt.err (!%p3959_p8)
}
 0xce0   :  { %s3963_s12 = scalar_lea.hbm %s5434_s8, 512 }
 0xce1   :  { %p3964_p9 = scmp.ne.s32.totalorder %s5434_s8, %s3963_s12  ;;  %p3967_p10 = scmp.lt.u32.totalorder %s3963_s12, %s5434_s8 }
 0xce3   :  { %p3969_p11 = pnand %p3967_p10, %p3964_p9 }
 0xce5   :  { %3972 = shalt.err (!%p3969_p11)
}
 0xce6   :  { %2904 = dma.vmem_to_hbm [thread:$0]  %s2899_s29, 512, %s5434_s8, [#allocation13], %s3992_s19, %s3992_s19, %s3993_s20   ;;  %v2886_v33 = vcvt.f32.s32 %v2880_v30 }
 0xce8   :  { %v2887_v39 = vshll.u32 %v2886_v33, 16 }
 0xd5d   :  { %v2884_v36 = vpop.xlane.xlu1 %2883 }
 0xd5e   :  { %v2885_v22 = vcvt.f32.s32 %v2884_v36 }
 0xd60   :  { %v2888_v42 = vadd.s32 %v2887_v39, %v2885_v22 }
 0xd62   :  { %3020 = vst.msk [vmem:[%s5435_s9 + $0x38] sm:$0xff] %vm651_vm13, %v2888_v42 }
 0xd63   :  { %3989 = dma.done.wait [#allocation13], 512  }
 0xd64   :  { %3990 = vsyncadd [#allocation13], 4294966784 }
 0xd65   :  { %2912 = vsyncpa [#allocation12], 1 }
 0xd66   :  { %2913 = vsyncpa [#allocation13], 1 }
 0xd67   :  { %2914 = vsyncmov [#allocation10] }
 0xd6a   :  { %s2915_s27 = vpop.sfrf %2914 }
 0xd6b   :  { %p3021_p12 = scmp.ne.s32.totalorder %s2915_s27, 0 }
 0xd6d   :  { %2919 = shalt.err (%p3021_p12)  }
 0xd6e   :  { %2921 = vsyncmov [#allocation10 + $0x1] }
 0xd71   :  { %s2922_s8 = vpop.sfrf %2921 }
 0xd72   :  { %p3022_p13 = scmp.ne.s32.totalorder %s2922_s8, 0 }
 0xd74   :  { %2926 = shalt.err (%p3022_p13)  }
 0xd75   :  { %2928 = vsyncmov [#allocation10 + $0x2] }
 0xd78   :  { %s2929_s19 = vpop.sfrf %2928 }
 0xd79   :  { %p3023_p0 = scmp.ne.s32.totalorder %s2929_s19, 0 }
 0xd7b   :  { %2933 = shalt.err (%p3023_p0)  }
 0xd7c   :  { %2935 = vsyncmov [#allocation10 + $0x3] }
 0xd7f   :  { %s2936_s20 = vpop.sfrf %2935 }
 0xd80   :  { %p3024_p1 = scmp.ne.s32.totalorder %s2936_s20, 0 }
 0xd82   :  { %2940 = shalt.err (%p3024_p1)  }
 0xd83   :  { %2942 = vsyncmov [#allocation10 + $0x4] }
 0xd86   :  { %s2943_s9 = vpop.sfrf %2942 }
 0xd87   :  { %p3025_p2 = scmp.ne.s32.totalorder %s2943_s9, 0 }
 0xd89   :  { %2947 = shalt.err (%p3025_p2)  }
 0xd8a   :  { %2949 = vsyncmov [#allocation10 + $0x5] }
 0xd8d   :  { %s2950_s16 = vpop.sfrf %2949 }
 0xd8e   :  { %p3026_p3 = scmp.ne.s32.totalorder %s2950_s16, 0 }
 0xd90   :  { %2954 = shalt.err (%p3026_p3)  }
 0xd91   :  { %2956 = vsyncmov [#allocation10 + $0x6] }
 0xd94   :  { %s2957_s17 = vpop.sfrf %2956 }
 0xd95   :  { %p3027_p4 = scmp.ne.s32.totalorder %s2957_s17, 0 }
 0xd97   :  { %2961 = shalt.err (%p3027_p4)  }

</bundles_post_ra>
